<compile_context>
chip_gen: v7x
topology: tpu7x:2x2x1
jax: 0.10.0
libtpu: 0.0.40
codegen_flags: <defaults>
</compile_context>

<pallas_src>
import math
import jax
import jax.numpy as jnp
from jax import lax
from jax.experimental import pallas as pl
from jax.experimental.pallas import tpu as pltpu


# ----------------------------------------------------------------------------
# Single fused kernel
# ----------------------------------------------------------------------------

def _head_fused_kernel(
    # activations / labels (already in (channels, tokens) layout)
    xtr_ref, xte_ref, pos_tr_ref, pos_te_ref, lab_ref,
    # feature extractor (1x1 conv)
    fe_w_ref, fe_b_ref,
    # transformer encoder layer (Wq|Wk fused; 1/sqrt(C) folded into Wq, bq)
    wqk_ref, bqk_ref, wv_ref, bv_ref, wo_ref, bo_ref,
    w1_ref, b1_ref, w2_ref, b2_ref,
    # filter predictor
    fp_w_ref, fp_b_ref, enc_w_ref, enc_b_ref,
    # fused head: row 0 = ones (classifier), rows 1..4 = Wreg^T
    head_w_ref, head_b_ref,
    # output slab (5, B*Nte): row 0 scores, rows 1..4 boxes
    out_ref,
):
    f32 = jnp.float32
    bf16 = jnp.bfloat16

    C = pos_tr_ref.shape[0]
    Ntr, B = lab_ref.shape
    Nte = xte_ref.shape[1] // B

    def mm(w_ref, x, b_ref):
        # (C_out, C_in) @ (C_in, tokens) + bias column; bf16 MXU, f32 accumulate.
        y = jnp.dot(w_ref[...], x.astype(bf16), preferred_element_type=f32)
        return y + b_ref[...]

    # ---- feature extractor: 1x1 conv as channel-mixing matmul --------------
    xtr = mm(fe_w_ref, xtr_ref[...], fe_b_ref)            # (C, B*Ntr)
    xte = mm(fe_w_ref, xte_ref[...], fe_b_ref)            # (C, B*Nte)

    # ---- one transformer encoder layer (shared weights, both branches) -----
    def encoder(x, pos, L):
        xp = x + pos                                      # q/k input (with pos)
        qk = mm(wqk_ref, xp, bqk_ref)                     # (2C, B*L)
        v = mm(wv_ref, x, bv_ref)                         # (C, B*L)
        q = qk[:C, :]
        k = qk[C:, :]
        outs = []
        for b in range(B):                                # static, B is tiny
            lo = b * L
            qb = q[:, lo:lo + L]                          # (C, L)
            kb = k[:, lo:lo + L]
            vb = v[:, lo:lo + L]
            # s[i, j] = sum_c q[c, i] * k[c, j]   (scale already in Wq)
            s = jnp.dot(qb.T, kb, preferred_element_type=f32)      # (L, L)
            s = s - jnp.max(s, axis=-1, keepdims=True)
            p = jnp.exp(s)
            denom = jnp.sum(p, axis=-1, keepdims=True)
            p = p * pl.reciprocal(denom, approx=True)     # EUP, off VALU path
            # out[c, i] = sum_j v[c, j] * p[i, j]
            ob = lax.dot_general(vb, p, (((1,), (1,)), ((), ())),
                                 preferred_element_type=f32)       # (C, L)
            outs.append(ob)
        attn = jnp.concatenate(outs, axis=1)              # (C, B*L)
        x = x + mm(wo_ref, attn, bo_ref)                  # attn residual
        h = jnp.maximum(mm(w1_ref, x, b1_ref), 0.0)       # FFN
        return x + mm(w2_ref, h, b2_ref)

    ytr = encoder(xtr, pos_tr_ref[...], Ntr)              # (C, B*Ntr)
    yte = encoder(xte, pos_te_ref[...], Nte)              # (C, B*Nte)

    # ---- filter predictor: label-weighted pooling -> target filter ---------
    lab = lab_ref[...]                                    # (Ntr, B)
    pooled_cols = []
    for b in range(B):
        fb = ytr[:, b * Ntr:(b + 1) * Ntr]                # (C, Ntr)
        lb = lab[:, b:b + 1]                              # (Ntr, 1)
        num = jnp.dot(fb, lb, preferred_element_type=f32)  # (C, 1)
        den = jnp.sum(lb) + 1e-6
        pooled_cols.append(num / den)
    pooled = jnp.concatenate(pooled_cols, axis=1)         # (C, B)
    filt = mm(fp_w_ref, pooled, fp_b_ref)                 # (C, B) shared filter

    # ---- test-feature encoding + fused classifier / box regressor ----------
    test_enc = mm(enc_w_ref, yte, enc_b_ref)              # (C, B*Nte)
    out_cols = []
    for b in range(B):
        eb = test_enc[:, b * Nte:(b + 1) * Nte]           # (C, Nte)
        fb = filt[:, b:b + 1]                             # (C, 1)
        mod = eb * fb                                     # filter-modulated
        out_cols.append(mm(head_w_ref, mod, head_b_ref))  # (5, Nte)
    out_ref[...] = jnp.concatenate(out_cols, axis=1)      # (5, B*Nte)


# ----------------------------------------------------------------------------
# Parameter-free sine positional encoding (plain-JAX glue, computed once)
# ----------------------------------------------------------------------------

def position_embedding_sine(h, w, num_pos_feats, max_spatial_resolution=18):
    # TODO(synk): exact lin_sine / avoid_aliazing constants of the original
    # PositionEmbeddingSine are approximated with linearly spaced frequencies.
    y_embed = jnp.arange(1, h + 1, dtype=jnp.float32)
    x_embed = jnp.arange(1, w + 1, dtype=jnp.float32)
    dim_i = jnp.arange(num_pos_feats, dtype=jnp.float32)
    freqs = (jnp.floor(dim_i / 2.0) + 1.0) * (math.pi / max_spatial_resolution)

    def interleave(p):                       # (n, P) -> sin/cos interleaved
        s = jnp.sin(p[:, 0::2])
        c = jnp.cos(p[:, 1::2])
        return jnp.stack([s, c], axis=2).reshape(p.shape[0], -1)

    pos_y = interleave(y_embed[:, None] * freqs[None, :])      # (h, P)
    pos_x = interleave(x_embed[:, None] * freqs[None, :])      # (w, P)
    pos = jnp.concatenate([
        jnp.broadcast_to(pos_y[:, None, :], (h, w, num_pos_feats)),
        jnp.broadcast_to(pos_x[None, :, :], (h, w, num_pos_feats)),
    ], axis=-1)                                                 # (h, w, 2P)
    return jnp.transpose(pos, (2, 0, 1))                        # (2P, h, w)


# ----------------------------------------------------------------------------
# One-time weight preparation (transpose / fuse / cast OUTSIDE the hot path)
# ----------------------------------------------------------------------------

def prepare_head_params(params):
    f32, bf16 = jnp.float32, jnp.bfloat16
    C = params['wq'].shape[0]
    scale = 1.0 / math.sqrt(C)

    def col(b):
        return jnp.asarray(b, f32).reshape(-1, 1)

    return {
        'fe_w': jnp.asarray(params['fe_w'].T, bf16),                # (C, C_in)
        'fe_b': col(params['fe_b']),
        # Wq|Wk fused, 1/sqrt(C) folded into the q half (weight AND bias).
        'wqk': jnp.concatenate([params['wq'].T * scale, params['wk'].T],
                               axis=0).astype(bf16),                # (2C, C)
        'bqk': jnp.concatenate([params['bq'] * scale,
                                params['bk']]).reshape(-1, 1).astype(f32),
        'wv': jnp.asarray(params['wv'].T, bf16), 'bv': col(params['bv']),
        'wo': jnp.asarray(params['wo'].T, bf16), 'bo': col(params['bo']),
        'w1': jnp.asarray(params['w1'].T, bf16), 'b1': col(params['b1']),
        'w2': jnp.asarray(params['w2'].T, bf16), 'b2': col(params['b2']),
        'fp_w': jnp.asarray(params['fp_w'].T, bf16), 'fp_b': col(params['fp_b']),
        'enc_w': jnp.asarray(params['enc_w'].T, bf16), 'enc_b': col(params['enc_b']),
        # Fused head: row 0 = classifier (sum over channels), rows 1..4 = Wreg^T.
        'head_w': jnp.concatenate([jnp.ones((1, C), f32), params['reg_w'].T],
                                  axis=0).astype(bf16),             # (5, C)
        'head_b': jnp.concatenate([jnp.zeros((1,), f32),
                                   params['reg_b']]).reshape(-1, 1).astype(f32),
    }


# ----------------------------------------------------------------------------
# Head.forward (layout glue + one fused pallas_call)
# ----------------------------------------------------------------------------

def head_forward(kparams, train_feat, test_feat, train_bb, train_label):
    assert train_bb.ndim == 3
    B = train_bb.shape[1]                      # num_sequences
    f32 = jnp.float32

    if train_feat.ndim == 5:
        train_feat = train_feat.reshape(-1, *train_feat.shape[-3:])
    if test_feat.ndim == 5:
        test_feat = test_feat.reshape(-1, *test_feat.shape[-3:])

    C = kparams['fe_w'].shape[0]
    Cin, H, W = train_feat.shape[-3:]
    Ftr = train_feat.shape[0] // B             # train frames (no 2*f hardcode)
    Fte = test_feat.shape[0] // B
    Ntr = Ftr * H * W
    Nte = Fte * H * W

    def to_tokens(x, F):
        # (F*B, Cin, H, W) -> (Cin, B*F*H*W), token order: b-major, then f, h, w
        x = x.reshape(F, B, Cin, H, W)
        x = jnp.transpose(x, (2, 1, 0, 3, 4))   # (Cin, B, F, H, W)
        return x.reshape(Cin, B * F * H * W).astype(f32)

    xtr = to_tokens(train_feat, Ftr)
    xte = to_tokens(test_feat, Fte)

    pos2d = position_embedding_sine(H, W, num_pos_feats=C // 2)   # (C, H, W)
    pos_hw = pos2d.reshape(C, H * W).astype(f32)
    pos_tr = jnp.tile(pos_hw, (1, B * Ftr))                        # (C, B*Ntr)
    pos_te = jnp.tile(pos_hw, (1, B * Fte))                        # (C, B*Nte)

    # train label: (Ftr, B, H, W) -> (Ntr, B), row order f, h, w
    lab = jnp.transpose(train_label, (0, 2, 3, 1)).reshape(Ntr, B).astype(f32)

    out = pl.pallas_call(
        _head_fused_kernel,
        out_shape=jax.ShapeDtypeStruct((5, B * Nte), jnp.float32),
        compiler_params=pltpu.CompilerParams(vmem_limit_bytes=32 * 1024 * 1024),
    )(xtr, xte, pos_tr, pos_te, lab,
      kparams['fe_w'], kparams['fe_b'],
      kparams['wqk'], kparams['bqk'], kparams['wv'], kparams['bv'],
      kparams['wo'], kparams['bo'],
      kparams['w1'], kparams['b1'], kparams['w2'], kparams['b2'],
      kparams['fp_w'], kparams['fp_b'], kparams['enc_w'], kparams['enc_b'],
      kparams['head_w'], kparams['head_b'])

    # Split the lane-dense slab into the module's output shapes (tiny glue).
    target_scores = out[0].reshape(B, Fte, H, W).transpose(1, 0, 2, 3)         # (F, B, H, W)
    bbox_preds = out[1:5].reshape(4, B, Fte, H, W).transpose(2, 1, 0, 3, 4)    # (F, B, 4, H, W)
    return target_scores, bbox_preds


# ----------------------------------------------------------------------------
# Main
# ----------------------------------------------------------------------------

if __name__ == "__main__":
    C_in, C, H, W = 8, 32, 8, 8
    n_train, n_test, n_seq = 2, 1, 2
    Dff = 64

    key = jax.random.PRNGKey(0)
    ks = jax.random.split(key, 24)

    def init(k, shape, scale=0.05):
        return (scale * jax.random.normal(k, shape)).astype(jnp.float32)

    params = {
        # feature_extractor (1x1 conv)
        'fe_w': init(ks[0], (C_in, C)), 'fe_b': init(ks[1], (C,)),
        # transformer_branch
        'wq': init(ks[2], (C, C)), 'bq': init(ks[3], (C,)),
        'wk': init(ks[4], (C, C)), 'bk': init(ks[5], (C,)),
        'wv': init(ks[6], (C, C)), 'bv': init(ks[7], (C,)),
        'wo': init(ks[8], (C, C)), 'bo': init(ks[9], (C,)),
        'w1': init(ks[10], (C, Dff)), 'b1': init(ks[11], (Dff,)),
        'w2': init(ks[12], (Dff, C)), 'b2': init(ks[13], (C,)),
        # filter_predictor
        'fp_w': init(ks[14], (C, C)), 'fp_b': init(ks[15], (C,)),
        'enc_w': init(ks[16], (C, C)), 'enc_b': init(ks[17], (C,)),
        # bb_regressor
        'reg_w': init(ks[18], (C, 4)), 'reg_b': init(ks[19], (4,)),
    }

    train_feat = jax.random.normal(ks[20], (n_train, n_seq, C_in, H, W), jnp.float32)
    test_feat = jax.random.normal(ks[21], (n_test, n_seq, C_in, H, W), jnp.float32)
    train_bb = jax.random.uniform(ks[22], (n_train, n_seq, 4), jnp.float32)
    train_label = jax.random.uniform(ks[23], (n_train, n_seq, H, W), jnp.float32)

    kparams = prepare_head_params(params)          # one-time, outside hot path
    fwd = jax.jit(head_forward)
    target_scores, bbox_preds = fwd(kparams, train_feat, test_feat, train_bb, train_label)
    jax.block_until_ready((target_scores, bbox_preds))

    assert target_scores.shape == (n_test, n_seq, H, W)
    assert bbox_preds.shape == (n_test, n_seq, 4, H, W)
    print("KERNEL_OK")
</pallas_src>

<mosaic_0001>
module attributes {stable_mosaic.version = 11 : i64} {
  func.func @_head_fused_kernel(%arg0: memref<8x256xf32, #tpu.memory_space<vmem>>, %arg1: memref<8x128xf32, #tpu.memory_space<vmem>>, %arg2: memref<32x256xf32, #tpu.memory_space<vmem>>, %arg3: memref<32x128xf32, #tpu.memory_space<vmem>>, %arg4: memref<128x2xf32, #tpu.memory_space<vmem>>, %arg5: memref<32x8xbf16, #tpu.memory_space<vmem>>, %arg6: memref<32x1xf32, #tpu.memory_space<vmem>>, %arg7: memref<64x32xbf16, #tpu.memory_space<vmem>>, %arg8: memref<64x1xf32, #tpu.memory_space<vmem>>, %arg9: memref<32x32xbf16, #tpu.memory_space<vmem>>, %arg10: memref<32x1xf32, #tpu.memory_space<vmem>>, %arg11: memref<32x32xbf16, #tpu.memory_space<vmem>>, %arg12: memref<32x1xf32, #tpu.memory_space<vmem>>, %arg13: memref<64x32xbf16, #tpu.memory_space<vmem>>, %arg14: memref<64x1xf32, #tpu.memory_space<vmem>>, %arg15: memref<32x64xbf16, #tpu.memory_space<vmem>>, %arg16: memref<32x1xf32, #tpu.memory_space<vmem>>, %arg17: memref<32x32xbf16, #tpu.memory_space<vmem>>, %arg18: memref<32x1xf32, #tpu.memory_space<vmem>>, %arg19: memref<32x32xbf16, #tpu.memory_space<vmem>>, %arg20: memref<32x1xf32, #tpu.memory_space<vmem>>, %arg21: memref<5x32xbf16, #tpu.memory_space<vmem>>, %arg22: memref<5x1xf32, #tpu.memory_space<vmem>>, %arg23: memref<5x128xf32, #tpu.memory_space<vmem>>) attributes {dimension_semantics = [], scalar_prefetch = 0 : i64, scratch_operands = 0 : i64, tpu.core_type = #tpu.core_type<tc>} {
    %c0 = arith.constant 0 : index
    %c0_0 = arith.constant 0 : index
    %0 = vector.load %arg0[%c0, %c0_0] : memref<8x256xf32, #tpu.memory_space<vmem>>, vector<8x256xf32>
    %c0_1 = arith.constant 0 : index
    %c0_2 = arith.constant 0 : index
    %1 = vector.load %arg5[%c0_1, %c0_2] : memref<32x8xbf16, #tpu.memory_space<vmem>>, vector<32x8xbf16>
    %2 = arith.truncf %0 : vector<8x256xf32> to vector<8x256xbf16>
    %cst = arith.constant dense<0.000000e+00> : vector<32x256xf32>
    %3 = tpu.matmul %1, %2, %cst {dimension_numbers = #tpu.dot_dimension_numbers<[1], [0], [0], [1], [0, 0, 1, 1], [], []>} : vector<32x8xbf16>, vector<8x256xbf16>, vector<32x256xf32> -> vector<32x256xf32>
    %c0_3 = arith.constant 0 : index
    %c0_4 = arith.constant 0 : index
    %4 = vector.load %arg6[%c0_3, %c0_4] : memref<32x1xf32, #tpu.memory_space<vmem>>, vector<32x1xf32>
    %5 = vector.broadcast %4 : vector<32x1xf32> to vector<32x256xf32>
    %6 = arith.addf %3, %5 : vector<32x256xf32>
    %c0_5 = arith.constant 0 : index
    %c0_6 = arith.constant 0 : index
    %7 = vector.load %arg1[%c0_5, %c0_6] : memref<8x128xf32, #tpu.memory_space<vmem>>, vector<8x128xf32>
    %c0_7 = arith.constant 0 : index
    %c0_8 = arith.constant 0 : index
    %8 = vector.load %arg5[%c0_7, %c0_8] : memref<32x8xbf16, #tpu.memory_space<vmem>>, vector<32x8xbf16>
    %9 = arith.truncf %7 : vector<8x128xf32> to vector<8x128xbf16>
    %cst_9 = arith.constant dense<0.000000e+00> : vector<32x128xf32>
    %10 = tpu.matmul %8, %9, %cst_9 {dimension_numbers = #tpu.dot_dimension_numbers<[1], [0], [0], [1], [0, 0, 1, 1], [], []>} : vector<32x8xbf16>, vector<8x128xbf16>, vector<32x128xf32> -> vector<32x128xf32>
    %c0_10 = arith.constant 0 : index
    %c0_11 = arith.constant 0 : index
    %11 = vector.load %arg6[%c0_10, %c0_11] : memref<32x1xf32, #tpu.memory_space<vmem>>, vector<32x1xf32>
    %12 = vector.broadcast %11 : vector<32x1xf32> to vector<32x128xf32>
    %13 = arith.addf %10, %12 : vector<32x128xf32>
    %c0_12 = arith.constant 0 : index
    %c0_13 = arith.constant 0 : index
    %14 = vector.load %arg2[%c0_12, %c0_13] : memref<32x256xf32, #tpu.memory_space<vmem>>, vector<32x256xf32>
    %15 = arith.addf %6, %14 : vector<32x256xf32>
    %c0_14 = arith.constant 0 : index
    %c0_15 = arith.constant 0 : index
    %16 = vector.load %arg7[%c0_14, %c0_15] : memref<64x32xbf16, #tpu.memory_space<vmem>>, vector<64x32xbf16>
    %17 = arith.truncf %15 : vector<32x256xf32> to vector<32x256xbf16>
    %cst_16 = arith.constant dense<0.000000e+00> : vector<64x256xf32>
    %18 = tpu.matmul %16, %17, %cst_16 {dimension_numbers = #tpu.dot_dimension_numbers<[1], [0], [0], [1], [0, 0, 1, 1], [], []>} : vector<64x32xbf16>, vector<32x256xbf16>, vector<64x256xf32> -> vector<64x256xf32>
    %c0_17 = arith.constant 0 : index
    %c0_18 = arith.constant 0 : index
    %19 = vector.load %arg8[%c0_17, %c0_18] : memref<64x1xf32, #tpu.memory_space<vmem>>, vector<64x1xf32>
    %20 = vector.broadcast %19 : vector<64x1xf32> to vector<64x256xf32>
    %21 = arith.addf %18, %20 : vector<64x256xf32>
    %c0_19 = arith.constant 0 : index
    %c0_20 = arith.constant 0 : index
    %22 = vector.load %arg9[%c0_19, %c0_20] : memref<32x32xbf16, #tpu.memory_space<vmem>>, vector<32x32xbf16>
    %23 = arith.truncf %6 : vector<32x256xf32> to vector<32x256xbf16>
    %cst_21 = arith.constant dense<0.000000e+00> : vector<32x256xf32>
    %24 = tpu.matmul %22, %23, %cst_21 {dimension_numbers = #tpu.dot_dimension_numbers<[1], [0], [0], [1], [0, 0, 1, 1], [], []>} : vector<32x32xbf16>, vector<32x256xbf16>, vector<32x256xf32> -> vector<32x256xf32>
    %c0_22 = arith.constant 0 : index
    %c0_23 = arith.constant 0 : index
    %25 = vector.load %arg10[%c0_22, %c0_23] : memref<32x1xf32, #tpu.memory_space<vmem>>, vector<32x1xf32>
    %26 = vector.broadcast %25 : vector<32x1xf32> to vector<32x256xf32>
    %27 = arith.addf %24, %26 : vector<32x256xf32>
    %28 = vector.extract_strided_slice %21 {offsets = [0, 0], sizes = [32, 256], strides = [1, 1]} : vector<64x256xf32> to vector<32x256xf32>
    %29 = vector.extract_strided_slice %21 {offsets = [32, 0], sizes = [32, 256], strides = [1, 1]} : vector<64x256xf32> to vector<32x256xf32>
    %30 = vector.extract_strided_slice %28 {offsets = [0, 0], sizes = [32, 128], strides = [1, 1]} : vector<32x256xf32> to vector<32x128xf32>
    %31 = vector.extract_strided_slice %29 {offsets = [0, 0], sizes = [32, 128], strides = [1, 1]} : vector<32x256xf32> to vector<32x128xf32>
    %32 = vector.extract_strided_slice %27 {offsets = [0, 0], sizes = [32, 128], strides = [1, 1]} : vector<32x256xf32> to vector<32x128xf32>
    %33 = tpu.transpose %30, [1, 0] : vector<32x128xf32> -> vector<128x32xf32>
    %cst_24 = arith.constant dense<0.000000e+00> : vector<128x128xf32>
    %34 = tpu.matmul %33, %31, %cst_24 {dimension_numbers = #tpu.dot_dimension_numbers<[1], [0], [0], [1], [0, 0, 1, 1], [], []>} : vector<128x32xf32>, vector<32x128xf32>, vector<128x128xf32> -> vector<128x128xf32>
    %cst_25 = arith.constant dense<0xFF800000> : vector<128xf32>
    %35 = vector.multi_reduction <maximumf>, %34, %cst_25 [1] : vector<128x128xf32> to vector<128xf32>
    %36 = vector.shape_cast %35 : vector<128xf32> to vector<128x1xf32>
    %37 = vector.broadcast %36 : vector<128x1xf32> to vector<128x128xf32>
    %38 = arith.subf %34, %37 : vector<128x128xf32>
    %39 = math.exp %38 : vector<128x128xf32>
    %cst_26 = arith.constant dense<0.000000e+00> : vector<128xf32>
    %40 = vector.multi_reduction <add>, %39, %cst_26 [1] : vector<128x128xf32> to vector<128xf32>
    %41 = vector.shape_cast %40 : vector<128xf32> to vector<128x1xf32>
    %42 = tpu.reciprocal %41 {approx = true} : vector<128x1xf32> -> vector<128x1xf32>
    %43 = vector.broadcast %42 : vector<128x1xf32> to vector<128x128xf32>
    %44 = arith.mulf %39, %43 : vector<128x128xf32>
    %cst_27 = arith.constant dense<0.000000e+00> : vector<32x128xf32>
    %45 = tpu.matmul %32, %44, %cst_27 {dimension_numbers = #tpu.dot_dimension_numbers<[1], [1], [0], [0], [0, 0, 1, 0], [], []>} : vector<32x128xf32>, vector<128x128xf32>, vector<32x128xf32> -> vector<32x128xf32>
    %46 = vector.extract_strided_slice %28 {offsets = [0, 128], sizes = [32, 128], strides = [1, 1]} : vector<32x256xf32> to vector<32x128xf32>
    %47 = vector.extract_strided_slice %29 {offsets = [0, 128], sizes = [32, 128], strides = [1, 1]} : vector<32x256xf32> to vector<32x128xf32>
    %48 = vector.extract_strided_slice %27 {offsets = [0, 128], sizes = [32, 128], strides = [1, 1]} : vector<32x256xf32> to vector<32x128xf32>
    %49 = tpu.transpose %46, [1, 0] : vector<32x128xf32> -> vector<128x32xf32>
    %cst_28 = arith.constant dense<0.000000e+00> : vector<128x128xf32>
    %50 = tpu.matmul %49, %47, %cst_28 {dimension_numbers = #tpu.dot_dimension_numbers<[1], [0], [0], [1], [0, 0, 1, 1], [], []>} : vector<128x32xf32>, vector<32x128xf32>, vector<128x128xf32> -> vector<128x128xf32>
    %cst_29 = arith.constant dense<0xFF800000> : vector<128xf32>
    %51 = vector.multi_reduction <maximumf>, %50, %cst_29 [1] : vector<128x128xf32> to vector<128xf32>
    %52 = vector.shape_cast %51 : vector<128xf32> to vector<128x1xf32>
    %53 = vector.broadcast %52 : vector<128x1xf32> to vector<128x128xf32>
    %54 = arith.subf %50, %53 : vector<128x128xf32>
    %55 = math.exp %54 : vector<128x128xf32>
    %cst_30 = arith.constant dense<0.000000e+00> : vector<128xf32>
    %56 = vector.multi_reduction <add>, %55, %cst_30 [1] : vector<128x128xf32> to vector<128xf32>
    %57 = vector.shape_cast %56 : vector<128xf32> to vector<128x1xf32>
    %58 = tpu.reciprocal %57 {approx = true} : vector<128x1xf32> -> vector<128x1xf32>
    %59 = vector.broadcast %58 : vector<128x1xf32> to vector<128x128xf32>
    %60 = arith.mulf %55, %59 : vector<128x128xf32>
    %cst_31 = arith.constant dense<0.000000e+00> : vector<32x128xf32>
    %61 = tpu.matmul %48, %60, %cst_31 {dimension_numbers = #tpu.dot_dimension_numbers<[1], [1], [0], [0], [0, 0, 1, 0], [], []>} : vector<32x128xf32>, vector<128x128xf32>, vector<32x128xf32> -> vector<32x128xf32>
    %62 = tpu.concatenate %45, %61 in 1 : vector<32x128xf32>, vector<32x128xf32> -> vector<32x256xf32>
    %c0_32 = arith.constant 0 : index
    %c0_33 = arith.constant 0 : index
    %63 = vector.load %arg11[%c0_32, %c0_33] : memref<32x32xbf16, #tpu.memory_space<vmem>>, vector<32x32xbf16>
    %64 = arith.truncf %62 : vector<32x256xf32> to vector<32x256xbf16>
    %cst_34 = arith.constant dense<0.000000e+00> : vector<32x256xf32>
    %65 = tpu.matmul %63, %64, %cst_34 {dimension_numbers = #tpu.dot_dimension_numbers<[1], [0], [0], [1], [0, 0, 1, 1], [], []>} : vector<32x32xbf16>, vector<32x256xbf16>, vector<32x256xf32> -> vector<32x256xf32>
    %c0_35 = arith.constant 0 : index
    %c0_36 = arith.constant 0 : index
    %66 = vector.load %arg12[%c0_35, %c0_36] : memref<32x1xf32, #tpu.memory_space<vmem>>, vector<32x1xf32>
    %67 = vector.broadcast %66 : vector<32x1xf32> to vector<32x256xf32>
    %68 = arith.addf %65, %67 : vector<32x256xf32>
    %69 = arith.addf %6, %68 : vector<32x256xf32>
    %c0_37 = arith.constant 0 : index
    %c0_38 = arith.constant 0 : index
    %70 = vector.load %arg13[%c0_37, %c0_38] : memref<64x32xbf16, #tpu.memory_space<vmem>>, vector<64x32xbf16>
    %71 = arith.truncf %69 : vector<32x256xf32> to vector<32x256xbf16>
    %cst_39 = arith.constant dense<0.000000e+00> : vector<64x256xf32>
    %72 = tpu.matmul %70, %71, %cst_39 {dimension_numbers = #tpu.dot_dimension_numbers<[1], [0], [0], [1], [0, 0, 1, 1], [], []>} : vector<64x32xbf16>, vector<32x256xbf16>, vector<64x256xf32> -> vector<64x256xf32>
    %c0_40 = arith.constant 0 : index
    %c0_41 = arith.constant 0 : index
    %73 = vector.load %arg14[%c0_40, %c0_41] : memref<64x1xf32, #tpu.memory_space<vmem>>, vector<64x1xf32>
    %74 = vector.broadcast %73 : vector<64x1xf32> to vector<64x256xf32>
    %75 = arith.addf %72, %74 : vector<64x256xf32>
    %cst_42 = arith.constant 0.000000e+00 : f32
    %76 = vector.broadcast %cst_42 : f32 to vector<64x256xf32>
    %77 = arith.maximumf %75, %76 : vector<64x256xf32>
    %c0_43 = arith.constant 0 : index
    %c0_44 = arith.constant 0 : index
    %78 = vector.load %arg15[%c0_43, %c0_44] : memref<32x64xbf16, #tpu.memory_space<vmem>>, vector<32x64xbf16>
    %79 = arith.truncf %77 : vector<64x256xf32> to vector<64x256xbf16>
    %cst_45 = arith.constant dense<0.000000e+00> : vector<32x256xf32>
    %80 = tpu.matmul %78, %79, %cst_45 {dimension_numbers = #tpu.dot_dimension_numbers<[1], [0], [0], [1], [0, 0, 1, 1], [], []>} : vector<32x64xbf16>, vector<64x256xbf16>, vector<32x256xf32> -> vector<32x256xf32>
    %c0_46 = arith.constant 0 : index
    %c0_47 = arith.constant 0 : index
    %81 = vector.load %arg16[%c0_46, %c0_47] : memref<32x1xf32, #tpu.memory_space<vmem>>, vector<32x1xf32>
    %82 = vector.broadcast %81 : vector<32x1xf32> to vector<32x256xf32>
    %83 = arith.addf %80, %82 : vector<32x256xf32>
    %84 = arith.addf %69, %83 : vector<32x256xf32>
    %c0_48 = arith.constant 0 : index
    %c0_49 = arith.constant 0 : index
    %85 = vector.load %arg3[%c0_48, %c0_49] : memref<32x128xf32, #tpu.memory_space<vmem>>, vector<32x128xf32>
    %86 = arith.addf %13, %85 : vector<32x128xf32>
    %c0_50 = arith.constant 0 : index
    %c0_51 = arith.constant 0 : index
    %87 = vector.load %arg7[%c0_50, %c0_51] : memref<64x32xbf16, #tpu.memory_space<vmem>>, vector<64x32xbf16>
    %88 = arith.truncf %86 : vector<32x128xf32> to vector<32x128xbf16>
    %cst_52 = arith.constant dense<0.000000e+00> : vector<64x128xf32>
    %89 = tpu.matmul %87, %88, %cst_52 {dimension_numbers = #tpu.dot_dimension_numbers<[1], [0], [0], [1], [0, 0, 1, 1], [], []>} : vector<64x32xbf16>, vector<32x128xbf16>, vector<64x128xf32> -> vector<64x128xf32>
    %c0_53 = arith.constant 0 : index
    %c0_54 = arith.constant 0 : index
    %90 = vector.load %arg8[%c0_53, %c0_54] : memref<64x1xf32, #tpu.memory_space<vmem>>, vector<64x1xf32>
    %91 = vector.broadcast %90 : vector<64x1xf32> to vector<64x128xf32>
    %92 = arith.addf %89, %91 : vector<64x128xf32>
    %c0_55 = arith.constant 0 : index
    %c0_56 = arith.constant 0 : index
    %93 = vector.load %arg9[%c0_55, %c0_56] : memref<32x32xbf16, #tpu.memory_space<vmem>>, vector<32x32xbf16>
    %94 = arith.truncf %13 : vector<32x128xf32> to vector<32x128xbf16>
    %cst_57 = arith.constant dense<0.000000e+00> : vector<32x128xf32>
    %95 = tpu.matmul %93, %94, %cst_57 {dimension_numbers = #tpu.dot_dimension_numbers<[1], [0], [0], [1], [0, 0, 1, 1], [], []>} : vector<32x32xbf16>, vector<32x128xbf16>, vector<32x128xf32> -> vector<32x128xf32>
    %c0_58 = arith.constant 0 : index
    %c0_59 = arith.constant 0 : index
    %96 = vector.load %arg10[%c0_58, %c0_59] : memref<32x1xf32, #tpu.memory_space<vmem>>, vector<32x1xf32>
    %97 = vector.broadcast %96 : vector<32x1xf32> to vector<32x128xf32>
    %98 = arith.addf %95, %97 : vector<32x128xf32>
    %99 = vector.extract_strided_slice %92 {offsets = [0, 0], sizes = [32, 128], strides = [1, 1]} : vector<64x128xf32> to vector<32x128xf32>
    %100 = vector.extract_strided_slice %92 {offsets = [32, 0], sizes = [32, 128], strides = [1, 1]} : vector<64x128xf32> to vector<32x128xf32>
    %101 = vector.extract_strided_slice %99 {offsets = [0, 0], sizes = [32, 64], strides = [1, 1]} : vector<32x128xf32> to vector<32x64xf32>
    %102 = vector.extract_strided_slice %100 {offsets = [0, 0], sizes = [32, 64], strides = [1, 1]} : vector<32x128xf32> to vector<32x64xf32>
    %103 = vector.extract_strided_slice %98 {offsets = [0, 0], sizes = [32, 64], strides = [1, 1]} : vector<32x128xf32> to vector<32x64xf32>
    %104 = tpu.transpose %101, [1, 0] : vector<32x64xf32> -> vector<64x32xf32>
    %cst_60 = arith.constant dense<0.000000e+00> : vector<64x64xf32>
    %105 = tpu.matmul %104, %102, %cst_60 {dimension_numbers = #tpu.dot_dimension_numbers<[1], [0], [0], [1], [0, 0, 1, 1], [], []>} : vector<64x32xf32>, vector<32x64xf32>, vector<64x64xf32> -> vector<64x64xf32>
    %cst_61 = arith.constant dense<0xFF800000> : vector<64xf32>
    %106 = vector.multi_reduction <maximumf>, %105, %cst_61 [1] : vector<64x64xf32> to vector<64xf32>
    %107 = vector.shape_cast %106 : vector<64xf32> to vector<64x1xf32>
    %108 = vector.broadcast %107 : vector<64x1xf32> to vector<64x64xf32>
    %109 = arith.subf %105, %108 : vector<64x64xf32>
    %110 = math.exp %109 : vector<64x64xf32>
    %cst_62 = arith.constant dense<0.000000e+00> : vector<64xf32>
    %111 = vector.multi_reduction <add>, %110, %cst_62 [1] : vector<64x64xf32> to vector<64xf32>
    %112 = vector.shape_cast %111 : vector<64xf32> to vector<64x1xf32>
    %113 = tpu.reciprocal %112 {approx = true} : vector<64x1xf32> -> vector<64x1xf32>
    %114 = vector.broadcast %113 : vector<64x1xf32> to vector<64x64xf32>
    %115 = arith.mulf %110, %114 : vector<64x64xf32>
    %cst_63 = arith.constant dense<0.000000e+00> : vector<32x64xf32>
    %116 = tpu.matmul %103, %115, %cst_63 {dimension_numbers = #tpu.dot_dimension_numbers<[1], [1], [0], [0], [0, 0, 1, 0], [], []>} : vector<32x64xf32>, vector<64x64xf32>, vector<32x64xf32> -> vector<32x64xf32>
    %117 = vector.extract_strided_slice %99 {offsets = [0, 64], sizes = [32, 64], strides = [1, 1]} : vector<32x128xf32> to vector<32x64xf32>
    %118 = vector.extract_strided_slice %100 {offsets = [0, 64], sizes = [32, 64], strides = [1, 1]} : vector<32x128xf32> to vector<32x64xf32>
    %119 = vector.extract_strided_slice %98 {offsets = [0, 64], sizes = [32, 64], strides = [1, 1]} : vector<32x128xf32> to vector<32x64xf32>
    %120 = tpu.transpose %117, [1, 0] : vector<32x64xf32> -> vector<64x32xf32>
    %cst_64 = arith.constant dense<0.000000e+00> : vector<64x64xf32>
    %121 = tpu.matmul %120, %118, %cst_64 {dimension_numbers = #tpu.dot_dimension_numbers<[1], [0], [0], [1], [0, 0, 1, 1], [], []>} : vector<64x32xf32>, vector<32x64xf32>, vector<64x64xf32> -> vector<64x64xf32>
    %cst_65 = arith.constant dense<0xFF800000> : vector<64xf32>
    %122 = vector.multi_reduction <maximumf>, %121, %cst_65 [1] : vector<64x64xf32> to vector<64xf32>
    %123 = vector.shape_cast %122 : vector<64xf32> to vector<64x1xf32>
    %124 = vector.broadcast %123 : vector<64x1xf32> to vector<64x64xf32>
    %125 = arith.subf %121, %124 : vector<64x64xf32>
    %126 = math.exp %125 : vector<64x64xf32>
    %cst_66 = arith.constant dense<0.000000e+00> : vector<64xf32>
    %127 = vector.multi_reduction <add>, %126, %cst_66 [1] : vector<64x64xf32> to vector<64xf32>
    %128 = vector.shape_cast %127 : vector<64xf32> to vector<64x1xf32>
    %129 = tpu.reciprocal %128 {approx = true} : vector<64x1xf32> -> vector<64x1xf32>
    %130 = vector.broadcast %129 : vector<64x1xf32> to vector<64x64xf32>
    %131 = arith.mulf %126, %130 : vector<64x64xf32>
    %cst_67 = arith.constant dense<0.000000e+00> : vector<32x64xf32>
    %132 = tpu.matmul %119, %131, %cst_67 {dimension_numbers = #tpu.dot_dimension_numbers<[1], [1], [0], [0], [0, 0, 1, 0], [], []>} : vector<32x64xf32>, vector<64x64xf32>, vector<32x64xf32> -> vector<32x64xf32>
    %133 = tpu.concatenate %116, %132 in 1 : vector<32x64xf32>, vector<32x64xf32> -> vector<32x128xf32>
    %c0_68 = arith.constant 0 : index
    %c0_69 = arith.constant 0 : index
    %134 = vector.load %arg11[%c0_68, %c0_69] : memref<32x32xbf16, #tpu.memory_space<vmem>>, vector<32x32xbf16>
    %135 = arith.truncf %133 : vector<32x128xf32> to vector<32x128xbf16>
    %cst_70 = arith.constant dense<0.000000e+00> : vector<32x128xf32>
    %136 = tpu.matmul %134, %135, %cst_70 {dimension_numbers = #tpu.dot_dimension_numbers<[1], [0], [0], [1], [0, 0, 1, 1], [], []>} : vector<32x32xbf16>, vector<32x128xbf16>, vector<32x128xf32> -> vector<32x128xf32>
    %c0_71 = arith.constant 0 : index
    %c0_72 = arith.constant 0 : index
    %137 = vector.load %arg12[%c0_71, %c0_72] : memref<32x1xf32, #tpu.memory_space<vmem>>, vector<32x1xf32>
    %138 = vector.broadcast %137 : vector<32x1xf32> to vector<32x128xf32>
    %139 = arith.addf %136, %138 : vector<32x128xf32>
    %140 = arith.addf %13, %139 : vector<32x128xf32>
    %c0_73 = arith.constant 0 : index
    %c0_74 = arith.constant 0 : index
    %141 = vector.load %arg13[%c0_73, %c0_74] : memref<64x32xbf16, #tpu.memory_space<vmem>>, vector<64x32xbf16>
    %142 = arith.truncf %140 : vector<32x128xf32> to vector<32x128xbf16>
    %cst_75 = arith.constant dense<0.000000e+00> : vector<64x128xf32>
    %143 = tpu.matmul %141, %142, %cst_75 {dimension_numbers = #tpu.dot_dimension_numbers<[1], [0], [0], [1], [0, 0, 1, 1], [], []>} : vector<64x32xbf16>, vector<32x128xbf16>, vector<64x128xf32> -> vector<64x128xf32>
    %c0_76 = arith.constant 0 : index
    %c0_77 = arith.constant 0 : index
    %144 = vector.load %arg14[%c0_76, %c0_77] : memref<64x1xf32, #tpu.memory_space<vmem>>, vector<64x1xf32>
    %145 = vector.broadcast %144 : vector<64x1xf32> to vector<64x128xf32>
    %146 = arith.addf %143, %145 : vector<64x128xf32>
    %cst_78 = arith.constant 0.000000e+00 : f32
    %147 = vector.broadcast %cst_78 : f32 to vector<64x128xf32>
    %148 = arith.maximumf %146, %147 : vector<64x128xf32>
    %c0_79 = arith.constant 0 : index
    %c0_80 = arith.constant 0 : index
    %149 = vector.load %arg15[%c0_79, %c0_80] : memref<32x64xbf16, #tpu.memory_space<vmem>>, vector<32x64xbf16>
    %150 = arith.truncf %148 : vector<64x128xf32> to vector<64x128xbf16>
    %cst_81 = arith.constant dense<0.000000e+00> : vector<32x128xf32>
    %151 = tpu.matmul %149, %150, %cst_81 {dimension_numbers = #tpu.dot_dimension_numbers<[1], [0], [0], [1], [0, 0, 1, 1], [], []>} : vector<32x64xbf16>, vector<64x128xbf16>, vector<32x128xf32> -> vector<32x128xf32>
    %c0_82 = arith.constant 0 : index
    %c0_83 = arith.constant 0 : index
    %152 = vector.load %arg16[%c0_82, %c0_83] : memref<32x1xf32, #tpu.memory_space<vmem>>, vector<32x1xf32>
    %153 = vector.broadcast %152 : vector<32x1xf32> to vector<32x128xf32>
    %154 = arith.addf %151, %153 : vector<32x128xf32>
    %155 = arith.addf %140, %154 : vector<32x128xf32>
    %c0_84 = arith.constant 0 : index
    %c0_85 = arith.constant 0 : index
    %156 = vector.load %arg4[%c0_84, %c0_85] : memref<128x2xf32, #tpu.memory_space<vmem>>, vector<128x2xf32>
    %157 = vector.extract_strided_slice %84 {offsets = [0, 0], sizes = [32, 128], strides = [1, 1]} : vector<32x256xf32> to vector<32x128xf32>
    %158 = vector.extract_strided_slice %156 {offsets = [0, 0], sizes = [128, 1], strides = [1, 1]} : vector<128x2xf32> to vector<128x1xf32>
    %cst_86 = arith.constant dense<0.000000e+00> : vector<32x1xf32>
    %159 = tpu.matmul %157, %158, %cst_86 {dimension_numbers = #tpu.dot_dimension_numbers<[1], [0], [0], [1], [0, 0, 1, 1], [], []>} : vector<32x128xf32>, vector<128x1xf32>, vector<32x1xf32> -> vector<32x1xf32>
    %160 = vector.shape_cast %158 : vector<128x1xf32> to vector<1x128x1xf32>
    %cst_87 = arith.constant dense<0.000000e+00> : vector<1xf32>
    %161 = vector.multi_reduction <add>, %160, %cst_87 [1, 2] : vector<1x128x1xf32> to vector<1xf32>
    %162 = vector.shape_cast %161 : vector<1xf32> to vector<1x1x1xf32>
    %163 = vector.extract %162[0, 0, 0] : f32 from vector<1x1x1xf32>
    %cst_88 = arith.constant 9.99999997E-7 : f32
    %164 = arith.addf %163, %cst_88 : f32
    %165 = vector.broadcast %164 : f32 to vector<32x1xf32>
    %166 = arith.divf %159, %165 : vector<32x1xf32>
    %167 = vector.extract_strided_slice %84 {offsets = [0, 128], sizes = [32, 128], strides = [1, 1]} : vector<32x256xf32> to vector<32x128xf32>
    %168 = vector.extract_strided_slice %156 {offsets = [0, 1], sizes = [128, 1], strides = [1, 1]} : vector<128x2xf32> to vector<128x1xf32>
    %cst_89 = arith.constant dense<0.000000e+00> : vector<32x1xf32>
    %169 = tpu.matmul %167, %168, %cst_89 {dimension_numbers = #tpu.dot_dimension_numbers<[1], [0], [0], [1], [0, 0, 1, 1], [], []>} : vector<32x128xf32>, vector<128x1xf32>, vector<32x1xf32> -> vector<32x1xf32>
    %170 = vector.shape_cast %168 : vector<128x1xf32> to vector<1x128x1xf32>
    %cst_90 = arith.constant dense<0.000000e+00> : vector<1xf32>
    %171 = vector.multi_reduction <add>, %170, %cst_90 [1, 2] : vector<1x128x1xf32> to vector<1xf32>
    %172 = vector.shape_cast %171 : vector<1xf32> to vector<1x1x1xf32>
    %173 = vector.extract %172[0, 0, 0] : f32 from vector<1x1x1xf32>
    %cst_91 = arith.constant 9.99999997E-7 : f32
    %174 = arith.addf %173, %cst_91 : f32
    %175 = vector.broadcast %174 : f32 to vector<32x1xf32>
    %176 = arith.divf %169, %175 : vector<32x1xf32>
    %177 = tpu.concatenate %166, %176 in 1 : vector<32x1xf32>, vector<32x1xf32> -> vector<32x2xf32>
    %c0_92 = arith.constant 0 : index
    %c0_93 = arith.constant 0 : index
    %178 = vector.load %arg17[%c0_92, %c0_93] : memref<32x32xbf16, #tpu.memory_space<vmem>>, vector<32x32xbf16>
    %179 = arith.truncf %177 : vector<32x2xf32> to vector<32x2xbf16>
    %cst_94 = arith.constant dense<0.000000e+00> : vector<32x2xf32>
    %180 = tpu.matmul %178, %179, %cst_94 {dimension_numbers = #tpu.dot_dimension_numbers<[1], [0], [0], [1], [0, 0, 1, 1], [], []>} : vector<32x32xbf16>, vector<32x2xbf16>, vector<32x2xf32> -> vector<32x2xf32>
    %c0_95 = arith.constant 0 : index
    %c0_96 = arith.constant 0 : index
    %181 = vector.load %arg18[%c0_95, %c0_96] : memref<32x1xf32, #tpu.memory_space<vmem>>, vector<32x1xf32>
    %182 = vector.broadcast %181 : vector<32x1xf32> to vector<32x2xf32>
    %183 = arith.addf %180, %182 : vector<32x2xf32>
    %c0_97 = arith.constant 0 : index
    %c0_98 = arith.constant 0 : index
    %184 = vector.load %arg19[%c0_97, %c0_98] : memref<32x32xbf16, #tpu.memory_space<vmem>>, vector<32x32xbf16>
    %185 = arith.truncf %155 : vector<32x128xf32> to vector<32x128xbf16>
    %cst_99 = arith.constant dense<0.000000e+00> : vector<32x128xf32>
    %186 = tpu.matmul %184, %185, %cst_99 {dimension_numbers = #tpu.dot_dimension_numbers<[1], [0], [0], [1], [0, 0, 1, 1], [], []>} : vector<32x32xbf16>, vector<32x128xbf16>, vector<32x128xf32> -> vector<32x128xf32>
    %c0_100 = arith.constant 0 : index
    %c0_101 = arith.constant 0 : index
    %187 = vector.load %arg20[%c0_100, %c0_101] : memref<32x1xf32, #tpu.memory_space<vmem>>, vector<32x1xf32>
    %188 = vector.broadcast %187 : vector<32x1xf32> to vector<32x128xf32>
    %189 = arith.addf %186, %188 : vector<32x128xf32>
    %190 = vector.extract_strided_slice %189 {offsets = [0, 0], sizes = [32, 64], strides = [1, 1]} : vector<32x128xf32> to vector<32x64xf32>
    %191 = vector.extract_strided_slice %183 {offsets = [0, 0], sizes = [32, 1], strides = [1, 1]} : vector<32x2xf32> to vector<32x1xf32>
    %192 = vector.broadcast %191 : vector<32x1xf32> to vector<32x64xf32>
    %193 = arith.mulf %190, %192 : vector<32x64xf32>
    %c0_102 = arith.constant 0 : index
    %c0_103 = arith.constant 0 : index
    %194 = vector.load %arg21[%c0_102, %c0_103] : memref<5x32xbf16, #tpu.memory_space<vmem>>, vector<5x32xbf16>
    %195 = arith.truncf %193 : vector<32x64xf32> to vector<32x64xbf16>
    %cst_104 = arith.constant dense<0.000000e+00> : vector<5x64xf32>
    %196 = tpu.matmul %194, %195, %cst_104 {dimension_numbers = #tpu.dot_dimension_numbers<[1], [0], [0], [1], [0, 0, 1, 1], [], []>} : vector<5x32xbf16>, vector<32x64xbf16>, vector<5x64xf32> -> vector<5x64xf32>
    %c0_105 = arith.constant 0 : index
    %c0_106 = arith.constant 0 : index
    %197 = vector.load %arg22[%c0_105, %c0_106] : memref<5x1xf32, #tpu.memory_space<vmem>>, vector<5x1xf32>
    %198 = vector.broadcast %197 : vector<5x1xf32> to vector<5x64xf32>
    %199 = arith.addf %196, %198 : vector<5x64xf32>
    %200 = vector.extract_strided_slice %189 {offsets = [0, 64], sizes = [32, 64], strides = [1, 1]} : vector<32x128xf32> to vector<32x64xf32>
    %201 = vector.extract_strided_slice %183 {offsets = [0, 1], sizes = [32, 1], strides = [1, 1]} : vector<32x2xf32> to vector<32x1xf32>
    %202 = vector.broadcast %201 : vector<32x1xf32> to vector<32x64xf32>
    %203 = arith.mulf %200, %202 : vector<32x64xf32>
    %c0_107 = arith.constant 0 : index
    %c0_108 = arith.constant 0 : index
    %204 = vector.load %arg21[%c0_107, %c0_108] : memref<5x32xbf16, #tpu.memory_space<vmem>>, vector<5x32xbf16>
    %205 = arith.truncf %203 : vector<32x64xf32> to vector<32x64xbf16>
    %cst_109 = arith.constant dense<0.000000e+00> : vector<5x64xf32>
    %206 = tpu.matmul %204, %205, %cst_109 {dimension_numbers = #tpu.dot_dimension_numbers<[1], [0], [0], [1], [0, 0, 1, 1], [], []>} : vector<5x32xbf16>, vector<32x64xbf16>, vector<5x64xf32> -> vector<5x64xf32>
    %c0_110 = arith.constant 0 : index
    %c0_111 = arith.constant 0 : index
    %207 = vector.load %arg22[%c0_110, %c0_111] : memref<5x1xf32, #tpu.memory_space<vmem>>, vector<5x1xf32>
    %208 = vector.broadcast %207 : vector<5x1xf32> to vector<5x64xf32>
    %209 = arith.addf %206, %208 : vector<5x64xf32>
    %210 = tpu.concatenate %199, %209 in 1 : vector<5x64xf32>, vector<5x64xf32> -> vector<5x128xf32>
    %c0_112 = arith.constant 0 : index
    %c0_113 = arith.constant 0 : index
    %211 = vector.load %arg23[%c0_112, %c0_113] : memref<5x128xf32, #tpu.memory_space<vmem>>, vector<5x128xf32>
    tpu.vector_store %arg23[%c0_112, %c0_113], %210 {strides = array<i32>} : memref<5x128xf32, #tpu.memory_space<vmem>>, vector<5x128xf32>,
    return
  }
}

</mosaic_0001>

<bundles_post_ra>
// kernel: tile.11
= control target key start
LH: loop header
LB: loop body
LE: loop exit
PB: predicated region body
PF: predicated region fallthrough
CT: control target
= control target key end

     0   :  { %vm354_vm0 = vcmask 1047556   ;;  %s572_s22 = smov 3  ;;  %vm162_vm1 = vcmask 523264   ;;  %s574_s23 = smov 3  ;;  %vm358_vm2 = vcmask 1048064   ;;  %s871_s0 = inlined_call_operand.vmem [shape: f32[32,4,64], index: 0, kind: input, shape index: {}]   ;;  %s872_s1 = inlined_call_operand.vmem [shape: f32[32,256], index: 1, kind: output, shape index: {}]  }
   0x1   :  { %v491_v0 = vld [vmem:[%s871_s0 + $0x1c] sm:$0xf]  ;;  %v492_v1 = vld [vmem:[%s871_s0 + $0x18] sm:$0xf]  ;;  %v493_v2 = vld [vmem:[%s871_s0 + $0x14] sm:$0xf] }
   0x2   :  { %128 = vst [vmem:[#allocation0 + $0x38] sm:$0xf] %v491_v0  ;;  %133 = vst [vmem:[#allocation0 + $0x30] sm:$0xf] %v492_v1  ;;  %v494_v3 = vld [vmem:[%s871_s0 + $0x10] sm:$0xf] }
   0x3   :  { %138 = vst [vmem:[#allocation0 + $0x28] sm:$0xf] %v493_v2  ;;  %v495_v4 = vld [vmem:[%s871_s0 + $0xc] sm:$0xf]  ;;  %v496_v5 = vld [vmem:[%s871_s0 + $0x8] sm:$0xf] }
   0x4   :  { %143 = vst [vmem:[#allocation0 + $0x20] sm:$0xf] %v494_v3  ;;  %148 = vst [vmem:[#allocation0 + $0x18] sm:$0xf] %v495_v4  ;;  %v497_v6 = vld [vmem:[%s871_s0 + $0x4] sm:$0xf] }
   0x5   :  { %153 = vst [vmem:[#allocation0 + $0x10] sm:$0xf] %v496_v5  ;;  %v158_v7 = vld [vmem:[%s871_s0] sm:$0xf]  ;;  %157 = vst [vmem:[#allocation0 + $0x8] sm:$0xf] %v497_v6 }
   0x6   :  { %159 = vst [vmem:[#allocation0] sm:$0xf] %v158_v7  ;;  %v490_v8 = vld [vmem:[%s871_s0 + $0x20] sm:$0xf]  ;;  %s171_s26 = smov 3  ;;  %s579_s27 = smov 3 }
   0x7   :  { %123 = vst [vmem:[#allocation0 + $0x40] sm:$0xf] %v490_v8  ;;  %v475_v9 = vld [vmem:[%s871_s0 + $0x5c] sm:$0xf]  ;;  %v476_v10 = vld [vmem:[%s871_s0 + $0x58] sm:$0xf] }
   0x8   :  { %s587_s3 = smov 3  ;;  %s189_s4 = smov 3  ;;  %48 = vst [vmem:[#allocation0 + $0xb8] sm:$0xf] %v475_v9  ;;  %53 = vst [vmem:[#allocation0 + $0xb0] sm:$0xf] %v476_v10 }
   0x9   :  { %v477_v11 = vld [vmem:[%s871_s0 + $0x54] sm:$0xf]  ;;  %v478_v12 = vld [vmem:[%s871_s0 + $0x50] sm:$0xf]  ;;  %s195_s9 = smov 3  ;;  %s595_s10 = smov 3 }
   0xa   :  { %58 = vst [vmem:[#allocation0 + $0xa8] sm:$0xf] %v477_v11  ;;  %63 = vst [vmem:[#allocation0 + $0xa0] sm:$0xf] %v478_v12  ;;  %v479_v13 = vld [vmem:[%s871_s0 + $0x4c] sm:$0xf] }
   0xb   :  { %v480_v14 = vld [vmem:[%s871_s0 + $0x48] sm:$0xf]  ;;  %68 = vst [vmem:[#allocation0 + $0x98] sm:$0xf] %v479_v13  ;;  %v481_v15 = vld [vmem:[%s871_s0 + $0x44] sm:$0xf] }
   0xc   :  { %73 = vst [vmem:[#allocation0 + $0x90] sm:$0xf] %v480_v14  ;;  %v482_v16 = vld [vmem:[%s871_s0 + $0x40] sm:$0xf]  ;;  %s609_s19 = smov 3  ;;  %s611_s20 = smov 3 }
   0xd   :  { %v190_v17 = vld [vmem:[#allocation0 + $0x28] ss:$2 sm:%s189_s4]   ;;  %78 = vst [vmem:[#allocation0 + $0x88] sm:$0xf] %v481_v15  ;;  %83 = vst [vmem:[#allocation0 + $0x80] sm:$0xf] %v482_v16 }
   0xe   :  { %v196_v18 = vld [vmem:[#allocation0 + $0x30] ss:$2 sm:%s195_s9]   ;;  %s267_s21 = smov 3  ;;  %s273_s24 = smov 3  ;;  %v161_v22 = vld [vmem:[#allocation0] ss:$2 sm:%s572_s22]  }
   0xf   :  { %v374_v19 = vld [vmem:[#allocation0 + $0x3] ss:$8 sm:$0xf0]   ;;  %v172_v20 = vld [vmem:[#allocation0 + $0x10] ss:$2 sm:%s171_s26]   ;;  %s279_s30 = smov 3 }
  0x10   :  { %502 = vst.msk [vmem:[%s872_s1 + $0x5] ss:$8 sm:$0x3] %vm162_vm1, %v190_v17   ;;  %503 = vst.msk [vmem:[%s872_s1 + $0x6] ss:$8 sm:$0x3] %vm162_vm1, %v196_v18  }
  0x11   :  { %v372_v21 = vld [vmem:[#allocation0 + $0x3] ss:$8 sm:$0xf]   ;;  %499 = vst.msk [vmem:[%s872_s1 + $0x2] ss:$8 sm:$0x3] %vm162_vm1, %v172_v20  }
  0x12   :  { %s626_s4 = smov 3  ;;  %v376_v23 = vsel %vm354_vm0, %v374_v19, %v372_v21  ;;  %163 = vst.msk [vmem:[%s872_s1] ss:$8 sm:$0x3] %vm162_vm1, %v161_v22   ;;  %v166_v24 = vld [vmem:[#allocation0 + $0x8] ss:$2 sm:%s574_s23]  }
  0x13   :  { %v178_v25 = vld [vmem:[#allocation0 + $0x18] ss:$2 sm:%s579_s27]   ;;  %s537_s23 = smov 64   ;;  %498 = vst.msk [vmem:[%s872_s1 + $0x1] ss:$8 sm:$0x3] %vm162_vm1, %v166_v24  }
  0x14   :  { %v184_v26 = vld [vmem:[#allocation0 + $0x20] ss:$2 sm:%s587_s3]   ;;  %377 = vrot.lane.b32.xlu1 %v376_v23, %s537_s23  ;;  %500 = vst.msk [vmem:[%s872_s1 + $0x3] ss:$8 sm:$0x3] %vm162_vm1, %v178_v25   ;;  %s717_s17 = smov 3 }
  0x15   :  { %501 = vst.msk [vmem:[%s872_s1 + $0x4] ss:$8 sm:$0x3] %vm162_vm1, %v184_v26   ;;  %v351_v27 = vld [vmem:[#allocation0 + $0x1] ss:$8 sm:$0xf]  }
  0x16   :  { %v353_v28 = vld [vmem:[#allocation0 + $0x1] ss:$8 sm:$0xf0]   ;;  %v202_v30 = vld [vmem:[#allocation0 + $0x38] ss:$2 sm:%s595_s10]   ;;  %s291_s10 = smov 3 }
  0x17   :  { %v355_v29 = vsel %vm354_vm0, %v353_v28, %v351_v27  ;;  %v385_v31 = vld [vmem:[#allocation0 + $0x83] ss:$8 sm:$0xf0]   ;;  %504 = vst.msk [vmem:[%s872_s1 + $0x7] ss:$8 sm:$0x3] %vm162_vm1, %v202_v30  }
  0x18   :  { %356 = vrot.lane.b32.xlu0 %v355_v29, %s537_s23  ;;  %v268_v32 = vld [vmem:[#allocation0 + $0x90] ss:$2 sm:%s267_s21]   ;;  %v280_v34 = vld [vmem:[#allocation0 + $0xa0] ss:$2 sm:%s279_s30]   ;;  %s669_s21 = smov 3  ;;  %s719_s18 = smov 3 }
  0x19   :  { %v274_v33 = vld [vmem:[#allocation0 + $0x98] ss:$2 sm:%s273_s24]   ;;  %v383_v35 = vld [vmem:[#allocation0 + $0x83] ss:$8 sm:$0xf]   ;;  %s225_s24 = smov 3 }
  0x1a   :  { %v256_v36 = vld [vmem:[#allocation0 + $0x80] ss:$2 sm:%s609_s19]   ;;  %515 = vst.msk [vmem:[%s872_s1 + $0x22] ss:$8 sm:$0x3] %vm162_vm1, %v268_v32   ;;  %v387_v37 = vsel %vm354_vm0, %v385_v31, %v383_v35  ;;  %s721_s19 = smov 3 }
  0x1b   :  { %516 = vst.msk [vmem:[%s872_s1 + $0x23] ss:$8 sm:$0x3] %vm162_vm1, %v274_v33   ;;  %517 = vst.msk [vmem:[%s872_s1 + $0x24] ss:$8 sm:$0x3] %vm162_vm1, %v280_v34   ;;  %388 = vrot.lane.b32.xlu1 %v387_v37, %s537_s23 }
  0x1c   :  { %513 = vst.msk [vmem:[%s872_s1 + $0x20] ss:$8 sm:$0x3] %vm162_vm1, %v256_v36   ;;  %v262_v38 = vld [vmem:[#allocation0 + $0x88] ss:$2 sm:%s611_s20]   ;;  %s231_s29 = smov 3 }
  0x1d   :  { %v286_v39 = vld [vmem:[#allocation0 + $0xa8] ss:$2 sm:%s626_s4]   ;;  %v474_v40 = vld [vmem:[%s871_s0 + $0x60] sm:$0xf]  ;;  %v483_v45 = vld [vmem:[%s871_s0 + $0x3c] sm:$0xf] }
  0x1e   :  { %514 = vst.msk [vmem:[%s872_s1 + $0x21] ss:$8 sm:$0x3] %vm162_vm1, %v262_v38   ;;  %518 = vst.msk [vmem:[%s872_s1 + $0x25] ss:$8 sm:$0x3] %vm162_vm1, %v286_v39  }
  0x1f   :  { %v361_v41 = vld [vmem:[#allocation0 + $0x81] ss:$8 sm:$0xf]   ;;  %43 = vst [vmem:[#allocation0 + $0xc0] sm:$0xf] %v474_v40  ;;  %s237_s30 = smov 3 }
  0x20   :  { %v363_v42 = vld [vmem:[#allocation0 + $0x81] ss:$8 sm:$0xf0]   ;;  %v292_v44 = vld [vmem:[#allocation0 + $0xb0] ss:$2 sm:%s291_s10]   ;;  %s243_s6 = smov 3 }
  0x21   :  { %v365_v43 = vsel %vm354_vm0, %v363_v42, %v361_v41  ;;  %v484_v46 = vld [vmem:[%s871_s0 + $0x38] sm:$0xf]  ;;  %519 = vst.msk [vmem:[%s872_s1 + $0x26] ss:$8 sm:$0x3] %vm162_vm1, %v292_v44   ;;  %s249_s27 = smov 3 }
  0x22   :  { %366 = vrot.lane.b32.xlu0 %v365_v43, %s537_s23  ;;  %88 = vst [vmem:[#allocation0 + $0x78] sm:$0xf] %v483_v45  ;;  %93 = vst [vmem:[#allocation0 + $0x70] sm:$0xf] %v484_v46  ;;  %v485_v47 = vld [vmem:[%s871_s0 + $0x34] sm:$0xf] }
  0x23   :  { %v486_v48 = vld [vmem:[%s871_s0 + $0x30] sm:$0xf]  ;;  %v487_v49 = vld [vmem:[%s871_s0 + $0x2c] sm:$0xf]  ;;  %98 = vst [vmem:[#allocation0 + $0x68] sm:$0xf] %v485_v47 }
  0x24   :  { %103 = vst [vmem:[#allocation0 + $0x60] sm:$0xf] %v486_v48  ;;  %108 = vst [vmem:[#allocation0 + $0x58] sm:$0xf] %v487_v49  ;;  %v488_v50 = vld [vmem:[%s871_s0 + $0x28] sm:$0xf] }
  0x25   :  { %v489_v51 = vld [vmem:[%s871_s0 + $0x24] sm:$0xf]  ;;  %113 = vst [vmem:[#allocation0 + $0x50] sm:$0xf] %v488_v50  ;;  %v467_v52 = vld [vmem:[%s871_s0 + $0x7c] sm:$0xf] }
  0x26   :  { %118 = vst [vmem:[#allocation0 + $0x48] sm:$0xf] %v489_v51  ;;  %v468_v53 = vld [vmem:[%s871_s0 + $0x78] sm:$0xf]  ;;  %8 = vst [vmem:[#allocation0 + $0xf8] sm:$0xf] %v467_v52 }
  0x27   :  { %13 = vst [vmem:[#allocation0 + $0xf0] sm:$0xf] %v468_v53  ;;  %v469_v54 = vld [vmem:[%s871_s0 + $0x74] sm:$0xf]  ;;  %v470_v55 = vld [vmem:[%s871_s0 + $0x70] sm:$0xf] }
  0x28   :  { %18 = vst [vmem:[#allocation0 + $0xe8] sm:$0xf] %v469_v54  ;;  %23 = vst [vmem:[#allocation0 + $0xe0] sm:$0xf] %v470_v55  ;;  %v471_v56 = vld [vmem:[%s871_s0 + $0x6c] sm:$0xf] }
  0x29   :  { %v472_v57 = vld [vmem:[%s871_s0 + $0x68] sm:$0xf]  ;;  %v298_v58 = vld [vmem:[#allocation0 + $0xb8] ss:$2 sm:%s669_s21]   ;;  %28 = vst [vmem:[#allocation0 + $0xd8] sm:$0xf] %v471_v56 }
  0x2a   :  { %33 = vst [vmem:[#allocation0 + $0xd0] sm:$0xf] %v472_v57  ;;  %v473_v59 = vld [vmem:[%s871_s0 + $0x64] sm:$0xf]  ;;  %s745_s0 = smov 3  ;;  %s747_s10 = smov 3 }
  0x2b   :  { %520 = vst.msk [vmem:[%s872_s1 + $0x27] ss:$8 sm:$0x3] %vm162_vm1, %v298_v58   ;;  %38 = vst [vmem:[#allocation0 + $0xc8] sm:$0xf] %v473_v59  ;;  %s315_s14 = smov 3 }
  0x2c   :  { %s753_s15 = smov 3  ;;  %v244_v60 = vld [vmem:[#allocation0 + $0x70] ss:$2 sm:%s243_s6]   ;;  %s755_s16 = smov 3  ;;  %v232_v63 = vld [vmem:[#allocation0 + $0x60] ss:$2 sm:%s231_s29]  }
  0x2d   :  { %v250_v61 = vld [vmem:[#allocation0 + $0x78] ss:$2 sm:%s249_s27]   ;;  %s757_s25 = smov 3  ;;  %v238_v0 = vld [vmem:[#allocation0 + $0x68] ss:$2 sm:%s237_s30]   ;;  %s339_s7 = smov 3 }
  0x2e   :  { %v226_v62 = vld [vmem:[#allocation0 + $0x58] ss:$2 sm:%s225_s24]   ;;  %511 = vst.msk [vmem:[%s872_s1 + $0x16] ss:$8 sm:$0x3] %vm162_vm1, %v244_v60  }
  0x2f   :  { %512 = vst.msk [vmem:[%s872_s1 + $0x17] ss:$8 sm:$0x3] %vm162_vm1, %v250_v61   ;;  %v208_v1 = vld [vmem:[#allocation0 + $0x40] ss:$2 sm:%s717_s17]  }
  0x30   :  { %v214_v2 = vld [vmem:[#allocation0 + $0x48] ss:$2 sm:%s719_s18]   ;;  %508 = vst.msk [vmem:[%s872_s1 + $0x13] ss:$8 sm:$0x3] %vm162_vm1, %v226_v62  }
  0x31   :  { %v220_v3 = vld [vmem:[#allocation0 + $0x50] ss:$2 sm:%s721_s19]   ;;  %509 = vst.msk [vmem:[%s872_s1 + $0x14] ss:$8 sm:$0x3] %vm162_vm1, %v232_v63  }
  0x32   :  { %510 = vst.msk [vmem:[%s872_s1 + $0x15] ss:$8 sm:$0x3] %vm162_vm1, %v238_v0   ;;  %505 = vst.msk [vmem:[%s872_s1 + $0x10] ss:$8 sm:$0x3] %vm162_vm1, %v208_v1  }
  0x33   :  { %506 = vst.msk [vmem:[%s872_s1 + $0x11] ss:$8 sm:$0x3] %vm162_vm1, %v214_v2   ;;  %507 = vst.msk [vmem:[%s872_s1 + $0x12] ss:$8 sm:$0x3] %vm162_vm1, %v220_v3  }
  0x34   :  { %v394_v4 = vld [vmem:[#allocation0 + $0x41] ss:$8 sm:$0xf]   ;;  %v416_v8 = vld [vmem:[#allocation0 + $0x43] ss:$8 sm:$0xf]  }
  0x35   :  { %v396_v5 = vld [vmem:[#allocation0 + $0x41] ss:$8 sm:$0xf0]   ;;  %v316_v9 = vld [vmem:[#allocation0 + $0xd0] ss:$2 sm:%s315_s14]   ;;  %s345_s14 = smov 3 }
  0x36   :  { %v398_v6 = vsel %vm354_vm0, %v396_v5, %v394_v4  ;;  %v407_v7 = vld [vmem:[#allocation0 + $0xc1] ss:$8 sm:$0xf0]   ;;  %v418_v10 = vld [vmem:[#allocation0 + $0x43] ss:$8 sm:$0xf0]  }
  0x37   :  { %399 = vrot.lane.b32.xlu0 %v398_v6, %s537_s23  ;;  %v304_v11 = vld [vmem:[#allocation0 + $0xc0] ss:$2 sm:%s745_s0]   ;;  %523 = vst.msk [vmem:[%s872_s1 + $0x32] ss:$8 sm:$0x3] %vm162_vm1, %v316_v9   ;;  %v420_v13 = vsel %vm354_vm0, %v418_v10, %v416_v8 }
  0x38   :  { %v310_v12 = vld [vmem:[#allocation0 + $0xc8] ss:$2 sm:%s747_s10]   ;;  %v322_v14 = vld [vmem:[#allocation0 + $0xd8] ss:$2 sm:%s753_s15]  }
  0x39   :  { %521 = vst.msk [vmem:[%s872_s1 + $0x30] ss:$8 sm:$0x3] %vm162_vm1, %v304_v11   ;;  %522 = vst.msk [vmem:[%s872_s1 + $0x31] ss:$8 sm:$0x3] %vm162_vm1, %v310_v12  }
  0x3a   :  { %v405_v15 = vld [vmem:[#allocation0 + $0xc1] ss:$8 sm:$0xf]   ;;  %524 = vst.msk [vmem:[%s872_s1 + $0x33] ss:$8 sm:$0x3] %vm162_vm1, %v322_v14  }
  0x3b   :  { %v328_v16 = vld [vmem:[#allocation0 + $0xe0] ss:$2 sm:%s755_s16]   ;;  %v409_v17 = vsel %vm354_vm0, %v407_v7, %v405_v15  ;;  %v427_v19 = vld [vmem:[#allocation0 + $0xc3] ss:$8 sm:$0xf]   ;;  %421 = vrot.lane.b32.xlu0 %v420_v13, %s537_s23 }
  0x3c   :  { %525 = vst.msk [vmem:[%s872_s1 + $0x34] ss:$8 sm:$0x3] %vm162_vm1, %v328_v16   ;;  %v334_v18 = vld [vmem:[#allocation0 + $0xe8] ss:$2 sm:%s757_s25]   ;;  %410 = vrot.lane.b32.xlu1 %v409_v17, %s537_s23 }
  0x3d   :  { %526 = vst.msk [vmem:[%s872_s1 + $0x35] ss:$8 sm:$0x3] %vm162_vm1, %v334_v18   ;;  %v429_v20 = vld [vmem:[#allocation0 + $0xc3] ss:$8 sm:$0xf0]  }
  0x3e   :  { %v340_v21 = vld [vmem:[#allocation0 + $0xf0] ss:$2 sm:%s339_s7]   ;;  %v431_v22 = vsel %vm354_vm0, %v429_v20, %v427_v19 }
  0x3f   :  { %527 = vst.msk [vmem:[%s872_s1 + $0x36] ss:$8 sm:$0x3] %vm162_vm1, %v340_v21   ;;  %v346_v23 = vld [vmem:[#allocation0 + $0xf8] ss:$2 sm:%s345_s14]  }
  0x40   :  { %528 = vst.msk [vmem:[%s872_s1 + $0x37] ss:$8 sm:$0x3] %vm162_vm1, %v346_v23   ;;  %432 = vrot.lane.b32.xlu1 %v431_v22, %s537_s23 }
  0x86   :  { %v378_v24 = vpop.permute.xlu1 %377  }
  0x87   :  { %530 = vst.msk [vmem:[%s872_s1 + $0x8] sm:$0xff] %vm358_vm2, %v378_v24  }
  0x8a   :  { %v357_v25 = vpop.permute.xlu0 %356  }
  0x8b   :  { %359 = vst.msk [vmem:[%s872_s1] sm:$0xff] %vm358_vm2, %v357_v25  }
  0x8d   :  { %v389_v26 = vpop.permute.xlu1 %388  }
  0x8e   :  { %531 = vst.msk [vmem:[%s872_s1 + $0x28] sm:$0xff] %vm358_vm2, %v389_v26  }
  0x94   :  { %v367_v27 = vpop.permute.xlu0 %366  }
  0x95   :  { %529 = vst.msk [vmem:[%s872_s1 + $0x20] sm:$0xff] %vm358_vm2, %v367_v27  }
  0xa9   :  { %v400_v28 = vpop.permute.xlu0 %399  }
  0xaa   :  { %532 = vst.msk [vmem:[%s872_s1 + $0x10] sm:$0xff] %vm358_vm2, %v400_v28  }
  0xad   :  { %v422_v30 = vpop.permute.xlu0 %421  }
  0xae   :  { %v411_v29 = vpop.permute.xlu1 %410   ;;  %534 = vst.msk [vmem:[%s872_s1 + $0x18] sm:$0xff] %vm358_vm2, %v422_v30  }
  0xaf   :  { %533 = vst.msk [vmem:[%s872_s1 + $0x30] sm:$0xff] %vm358_vm2, %v411_v29  }
  0xb2   :  { %v433_v31 = vpop.permute.xlu1 %432  }
  0xb3   :  { %535 = vst.msk [vmem:[%s872_s1 + $0x38] sm:$0xff] %vm358_vm2, %v433_v31  }

// kernel: tile.15
= control target key start
LH: loop header
LB: loop body
LE: loop exit
PB: predicated region body
PF: predicated region fallthrough
CT: control target
= control target key end

     0   :  { %vm162_vm0 = vcmask 1047556   ;;  %s304_s10 = smov 64   ;;  %vm164_vm1 = vcmask 523264   ;;  %vm201_vm2 = vcmask 1048064   ;;  %s451_s0 = inlined_call_operand.vmem [shape: f32[32,2,64], index: 0, kind: input, shape index: {}]   ;;  %s452_s1 = inlined_call_operand.vmem [shape: f32[32,128], index: 1, kind: output, shape index: {}]  }
   0x1   :  { %v290_v0 = vld [vmem:[%s451_s0 + $0xe] sm:$0x3]  ;;  %v291_v1 = vld [vmem:[%s451_s0 + $0xc] sm:$0x3]  ;;  %v292_v2 = vld [vmem:[%s451_s0 + $0xa] sm:$0x3] }
   0x2   :  { %128 = vst [vmem:[#allocation0 + $0x38] sm:$0x3] %v290_v0  ;;  %133 = vst [vmem:[#allocation0 + $0x30] sm:$0x3] %v291_v1  ;;  %v293_v3 = vld [vmem:[%s451_s0 + $0x8] sm:$0x3] }
   0x3   :  { %138 = vst [vmem:[#allocation0 + $0x28] sm:$0x3] %v292_v2  ;;  %v294_v4 = vld [vmem:[%s451_s0 + $0x6] sm:$0x3]  ;;  %v295_v5 = vld [vmem:[%s451_s0 + $0x4] sm:$0x3] }
   0x4   :  { %143 = vst [vmem:[#allocation0 + $0x20] sm:$0x3] %v293_v3  ;;  %148 = vst [vmem:[#allocation0 + $0x18] sm:$0x3] %v294_v4  ;;  %v296_v6 = vld [vmem:[%s451_s0 + $0x2] sm:$0x3] }
   0x5   :  { %153 = vst [vmem:[#allocation0 + $0x10] sm:$0x3] %v295_v5  ;;  %v158_v7 = vld [vmem:[%s451_s0] sm:$0x3]  ;;  %157 = vst [vmem:[#allocation0 + $0x8] sm:$0x3] %v296_v6 }
   0x6   :  { %159 = vst [vmem:[#allocation0] sm:$0x3] %v158_v7  ;;  %v274_v8 = vld [vmem:[%s451_s0 + $0x2e] sm:$0x3]  ;;  %v275_v9 = vld [vmem:[%s451_s0 + $0x2c] sm:$0x3] }
   0x7   :  { %v276_v10 = vld [vmem:[%s451_s0 + $0x2a] sm:$0x3]  ;;  %48 = vst [vmem:[#allocation0 + $0xb8] sm:$0x3] %v274_v8  ;;  %53 = vst [vmem:[#allocation0 + $0xb0] sm:$0x3] %v275_v9 }
   0x8   :  { %58 = vst [vmem:[#allocation0 + $0xa8] sm:$0x3] %v276_v10  ;;  %v277_v11 = vld [vmem:[%s451_s0 + $0x28] sm:$0x3]  ;;  %v278_v12 = vld [vmem:[%s451_s0 + $0x26] sm:$0x3] }
   0x9   :  { %v279_v13 = vld [vmem:[%s451_s0 + $0x24] sm:$0x3]  ;;  %63 = vst [vmem:[#allocation0 + $0xa0] sm:$0x3] %v277_v11  ;;  %68 = vst [vmem:[#allocation0 + $0x98] sm:$0x3] %v278_v12 }
   0xa   :  { %73 = vst [vmem:[#allocation0 + $0x90] sm:$0x3] %v279_v13  ;;  %v280_v14 = vld [vmem:[%s451_s0 + $0x22] sm:$0x3]  ;;  %v281_v15 = vld [vmem:[%s451_s0 + $0x20] sm:$0x3] }
   0xb   :  { %v282_v16 = vld [vmem:[%s451_s0 + $0x1e] sm:$0x3]  ;;  %78 = vst [vmem:[#allocation0 + $0x88] sm:$0x3] %v280_v14  ;;  %83 = vst [vmem:[#allocation0 + $0x80] sm:$0x3] %v281_v15 }
   0xc   :  { %88 = vst [vmem:[#allocation0 + $0x78] sm:$0x3] %v282_v16  ;;  %v283_v17 = vld [vmem:[%s451_s0 + $0x1c] sm:$0x3]  ;;  %v284_v18 = vld [vmem:[%s451_s0 + $0x1a] sm:$0x3] }
   0xd   :  { %v285_v19 = vld [vmem:[%s451_s0 + $0x18] sm:$0x3]  ;;  %93 = vst [vmem:[#allocation0 + $0x70] sm:$0x3] %v283_v17  ;;  %98 = vst [vmem:[#allocation0 + $0x68] sm:$0x3] %v284_v18 }
   0xe   :  { %103 = vst [vmem:[#allocation0 + $0x60] sm:$0x3] %v285_v19  ;;  %v286_v20 = vld [vmem:[%s451_s0 + $0x16] sm:$0x3]  ;;  %v287_v21 = vld [vmem:[%s451_s0 + $0x14] sm:$0x3] }
   0xf   :  { %v288_v22 = vld [vmem:[%s451_s0 + $0x12] sm:$0x3]  ;;  %108 = vst [vmem:[#allocation0 + $0x58] sm:$0x3] %v286_v20  ;;  %113 = vst [vmem:[#allocation0 + $0x50] sm:$0x3] %v287_v21 }
  0x10   :  { %118 = vst [vmem:[#allocation0 + $0x48] sm:$0x3] %v288_v22  ;;  %v289_v23 = vld [vmem:[%s451_s0 + $0x10] sm:$0x3]  ;;  %v266_v24 = vld [vmem:[%s451_s0 + $0x3e] sm:$0x3] }
  0x11   :  { %v267_v25 = vld [vmem:[%s451_s0 + $0x3c] sm:$0x3]  ;;  %v196_v26 = vld [vmem:[#allocation0 + $0x1] ss:$8 sm:$0xf0]  }
  0x12   :  { %123 = vst [vmem:[#allocation0 + $0x40] sm:$0x3] %v289_v23  ;;  %8 = vst [vmem:[#allocation0 + $0xf8] sm:$0x3] %v266_v24  ;;  %v268_v27 = vld [vmem:[%s451_s0 + $0x3a] sm:$0x3] }
  0x13   :  { %13 = vst [vmem:[#allocation0 + $0xf0] sm:$0x3] %v267_v25  ;;  %v194_v28 = vld [vmem:[#allocation0 + $0x1] ss:$8 sm:$0xf]  }
  0x14   :  { %18 = vst [vmem:[#allocation0 + $0xe8] sm:$0x3] %v268_v27  ;;  %v269_v29 = vld [vmem:[%s451_s0 + $0x38] sm:$0x3]  ;;  %v198_v30 = vsel %vm162_vm0, %v196_v26, %v194_v28  ;;  %v270_v31 = vld [vmem:[%s451_s0 + $0x36] sm:$0x3] }
  0x15   :  { %23 = vst [vmem:[#allocation0 + $0xe0] sm:$0x3] %v269_v29  ;;  %v271_v32 = vld [vmem:[%s451_s0 + $0x34] sm:$0x3]  ;;  %v272_v33 = vld [vmem:[%s451_s0 + $0x32] sm:$0x3]  ;;  %199 = vrot.lane.b32.xlu0 %v198_v30, %s304_s10 }
  0x16   :  { %v217_v34 = vld [vmem:[#allocation0 + $0x81] ss:$8 sm:$0xf0]   ;;  %28 = vst [vmem:[#allocation0 + $0xd8] sm:$0x3] %v270_v31 }
  0x17   :  { %33 = vst [vmem:[#allocation0 + $0xd0] sm:$0x3] %v271_v32  ;;  %38 = vst [vmem:[#allocation0 + $0xc8] sm:$0x3] %v272_v33  ;;  %v273_v35 = vld [vmem:[%s451_s0 + $0x30] sm:$0x3] }
  0x18   :  { %v215_v36 = vld [vmem:[#allocation0 + $0x81] ss:$8 sm:$0xf]   ;;  %43 = vst [vmem:[#allocation0 + $0xc0] sm:$0x3] %v273_v35 }
  0x19   :  { %v160_v37 = vld [vmem:[#allocation0] ss:$8 sm:$0xf]   ;;  %v219_v38 = vsel %vm162_vm0, %v217_v34, %v215_v36  ;;  %v206_v39 = vld [vmem:[#allocation0 + $0x41] ss:$8 sm:$0xf0]  }
  0x1a   :  { %v161_v40 = vld [vmem:[#allocation0] ss:$8 sm:$0xf0]   ;;  %220 = vrot.lane.b32.xlu1 %v219_v38, %s304_s10  ;;  %v204_v44 = vld [vmem:[#allocation0 + $0x41] ss:$8 sm:$0xf]  }
  0x1b   :  { %v163_v41 = vsel %vm162_vm0, %v161_v40, %v160_v37  ;;  %v176_v42 = vld [vmem:[#allocation0 + $0x80] ss:$8 sm:$0xf]   ;;  %v208_v47 = vsel %vm162_vm0, %v206_v39, %v204_v44 }
  0x1c   :  { %v178_v43 = vld [vmem:[#allocation0 + $0x80] ss:$8 sm:$0xf0]   ;;  %165 = vst.msk [vmem:[%s452_s1] sm:$0xff] %vm164_vm1, %v163_v41   ;;  %209 = vrot.lane.b32.xlu0 %v208_v47, %s304_s10 }
  0x1d   :  { %v180_v45 = vsel %vm162_vm0, %v178_v43, %v176_v42  ;;  %v167_v46 = vld [vmem:[#allocation0 + $0x40] ss:$8 sm:$0xf]   ;;  %v228_v49 = vld [vmem:[#allocation0 + $0xc1] ss:$8 sm:$0xf0]  }
  0x1e   :  { %298 = vst.msk [vmem:[%s452_s1 + $0x10] sm:$0xff] %vm164_vm1, %v180_v45   ;;  %v169_v48 = vld [vmem:[#allocation0 + $0x40] ss:$8 sm:$0xf0]  }
  0x1f   :  { %v171_v50 = vsel %vm162_vm0, %v169_v48, %v167_v46  ;;  %v187_v51 = vld [vmem:[#allocation0 + $0xc0] ss:$8 sm:$0xf0]   ;;  %v226_v52 = vld [vmem:[#allocation0 + $0xc1] ss:$8 sm:$0xf]  }
  0x20   :  { %297 = vst.msk [vmem:[%s452_s1 + $0x8] sm:$0xff] %vm164_vm1, %v171_v50   ;;  %v185_v53 = vld [vmem:[#allocation0 + $0xc0] ss:$8 sm:$0xf]   ;;  %v230_v54 = vsel %vm162_vm0, %v228_v49, %v226_v52 }
  0x21   :  { %v189_v55 = vsel %vm162_vm0, %v187_v51, %v185_v53  ;;  %231 = vrot.lane.b32.xlu1 %v230_v54, %s304_s10 }
  0x22   :  { %299 = vst.msk [vmem:[%s452_s1 + $0x18] sm:$0xff] %vm164_vm1, %v189_v55  }
  0x87   :  { %v200_v56 = vpop.permute.xlu0 %199  }
  0x88   :  { %202 = vst.msk [vmem:[%s452_s1] sm:$0xff] %vm201_vm2, %v200_v56  }
  0x8c   :  { %v221_v57 = vpop.permute.xlu1 %220  }
  0x8d   :  { %301 = vst.msk [vmem:[%s452_s1 + $0x10] sm:$0xff] %vm201_vm2, %v221_v57  }
  0x8e   :  { %v210_v58 = vpop.permute.xlu0 %209  }
  0x8f   :  { %300 = vst.msk [vmem:[%s452_s1 + $0x8] sm:$0xff] %vm201_vm2, %v210_v58  }
  0x93   :  { %v232_v59 = vpop.permute.xlu1 %231  }
  0x94   :  { %302 = vst.msk [vmem:[%s452_s1 + $0x18] sm:$0xff] %vm201_vm2, %v232_v59  }

// kernel: squeeze.1
= control target key start
LH: loop header
LB: loop body
LE: loop exit
PB: predicated region body
PF: predicated region fallthrough
CT: control target
= control target key end

     0   :  { %s207_s0 = inlined_call_operand.vmem [shape: f32[128], index: 0, kind: input, shape index: {}]   ;;  %s208_s1 = inlined_call_operand.hbm [shape: f32[1,2,8,8], index: 1, kind: output, shape index: {}]  }
   0x1   :  { %v5_v0 = vld [vmem:[%s207_s0] sm:$0x1] }
   0x2   :  { %6 = vst [vmem:[#allocation2] sm:$0x1] %v5_v0 }
   0x3   :  { %2 = vsyncpa [#allocation1], 0  ;;  %s150_s0 = smov 120   ;;  %s151_s8 = smov 104   ;;  %vm8_vm0 = vcmask 64512  }
   0x4   :  { %s152_s9 = smov 112   ;;  %s153_s10 = smov 96  }
   0x5   :  { %s154_s11 = smov 88   ;;  %s155_s12 = smov 80  }
   0x6   :  { %s156_s13 = smov 72   ;;  %s157_s14 = smov 64  }
   0x7   :  { %s158_s15 = smov 56   ;;  %s159_s16 = smov 48  }
   0x8   :  { %s160_s17 = smov 40   ;;  %s161_s18 = smov 32  }
   0x9   :  { %v10_v1 = vld [vmem:[#allocation2] sm:$0x1]   ;;  %s162_s19 = smov 24   ;;  %s163_s20 = smov 16  }
   0xa   :  { %v22_v2 = vld [vmem:[#allocation2] sm:$0x1]   ;;  %11 = vrot.lane.b32.xlu0 %v10_v1, %s150_s0  ;;  %s164_s21 = smov 8   ;;  %s165_s22 = smov [#allocation0]  }
   0xb   :  { %23 = vrot.lane.b32.xlu1 %v22_v2, %s151_s8  ;;  %v16_v3 = vld [vmem:[#allocation2] sm:$0x1]   ;;  %s104_s23 = sshll.u32 %s165_s22, 4  ;;  %s105_s23 = int_to_ptr.vmem [resolvable:$true] %s104_s23 }
   0xc   :  { %v28_v4 = vld [vmem:[#allocation2] sm:$0x1]   ;;  %s126_s24 = scalar_lea.vmem %s105_s23, 256  ;;  %p131_p1 = scmp.lt.s32.totalorder %s105_s23, %s105_s23 }
   0xd   :  { %v34_v5 = vld [vmem:[#allocation2] sm:$0x1]   ;;  %p127_p0 = scmp.ne.s32.totalorder %s105_s23, %s126_s24  ;;  %p132_p2 = scmp.lt.s32.totalorder %s126_s24, %s126_s24 }
   0xe   :  { %17 = vrot.lane.b32.xlu0 %v16_v3, %s152_s9  ;;  %v40_v6 = vld [vmem:[#allocation2] sm:$0x1]  }
   0xf   :  { %29 = vrot.lane.b32.xlu1 %v28_v4, %s153_s10  ;;  %v46_v7 = vld [vmem:[#allocation2] sm:$0x1]   ;;  %p133_p3 = por %p132_p2, %p131_p1 }
  0x10   :  { %v52_v8 = vld [vmem:[#allocation2] sm:$0x1]  }
  0x11   :  { %v58_v9 = vld [vmem:[#allocation2] sm:$0x1]   ;;  %p134_p4 = pnand %p133_p3, %p127_p0 }
  0x12   :  { %35 = vrot.lane.b32.xlu0 %v34_v5, %s154_s11  ;;  %v64_v10 = vld [vmem:[#allocation2] sm:$0x1]  }
  0x13   :  { %41 = vrot.lane.b32.xlu1 %v40_v6, %s155_s12  ;;  %v7_v11 = vld [vmem:[#allocation2] sm:$0x1]  }
  0x14   :  { %9 = vst.msk [vmem:[#allocation0] sm:$0x1] %vm8_vm0, %v7_v11   ;;  %v70_v12 = vld [vmem:[#allocation2] sm:$0x1]  }
  0x15   :  { %v76_v13 = vld [vmem:[#allocation2] sm:$0x1]  }
  0x16   :  { %47 = vrot.lane.b32.xlu0 %v46_v7, %s156_s13  ;;  %v82_v14 = vld [vmem:[#allocation2] sm:$0x1]  }
  0x17   :  { %53 = vrot.lane.b32.xlu1 %v52_v8, %s157_s14  ;;  %v88_v15 = vld [vmem:[#allocation2] sm:$0x1]  }
  0x18   :  { %v94_v16 = vld [vmem:[#allocation2] sm:$0x1]  }
  0x1a   :  { %59 = vrot.lane.b32.xlu0 %v58_v9, %s158_s15 }
  0x1b   :  { %65 = vrot.lane.b32.xlu1 %v64_v10, %s159_s16 }
  0x1e   :  { %71 = vrot.lane.b32.xlu0 %v70_v12, %s160_s17 }
  0x1f   :  { %77 = vrot.lane.b32.xlu1 %v76_v13, %s161_s18 }
  0x22   :  { %83 = vrot.lane.b32.xlu0 %v82_v14, %s162_s19 }
  0x23   :  { %89 = vrot.lane.b32.xlu1 %v88_v15, %s163_s20 }
  0x26   :  { %95 = vrot.lane.b32.xlu0 %v94_v16, %s164_s21 }
  0x7c   :  { %v12_v17 = vpop.permute.xlu0 %11  }
  0x7d   :  { %v24_v18 = vpop.permute.xlu1 %23   ;;  %15 = vst.msk [vmem:[#allocation0 + $0x1] sm:$0x1] %vm8_vm0, %v12_v17  }
  0x7e   :  { %27 = vst.msk [vmem:[#allocation0 + $0x3] sm:$0x1] %vm8_vm0, %v24_v18  }
  0x80   :  { %v18_v19 = vpop.permute.xlu0 %17  }
  0x81   :  { %v30_v20 = vpop.permute.xlu1 %29   ;;  %21 = vst.msk [vmem:[#allocation0 + $0x2] sm:$0x1] %vm8_vm0, %v18_v19  }
  0x82   :  { %33 = vst.msk [vmem:[#allocation0 + $0x4] sm:$0x1] %vm8_vm0, %v30_v20  }
  0x84   :  { %v36_v21 = vpop.permute.xlu0 %35  }
  0x85   :  { %v42_v22 = vpop.permute.xlu1 %41   ;;  %39 = vst.msk [vmem:[#allocation0 + $0x5] sm:$0x1] %vm8_vm0, %v36_v21  }
  0x86   :  { %45 = vst.msk [vmem:[#allocation0 + $0x6] sm:$0x1] %vm8_vm0, %v42_v22  }
  0x88   :  { %v48_v23 = vpop.permute.xlu0 %47  }
  0x89   :  { %v54_v24 = vpop.permute.xlu1 %53   ;;  %51 = vst.msk [vmem:[#allocation0 + $0x7] sm:$0x1] %vm8_vm0, %v48_v23  }
  0x8a   :  { %57 = vst.msk [vmem:[#allocation0 + $0x8] sm:$0x1] %vm8_vm0, %v54_v24  }
  0x8c   :  { %v60_v25 = vpop.permute.xlu0 %59  }
  0x8d   :  { %v66_v26 = vpop.permute.xlu1 %65   ;;  %63 = vst.msk [vmem:[#allocation0 + $0x9] sm:$0x1] %vm8_vm0, %v60_v25  }
  0x8e   :  { %69 = vst.msk [vmem:[#allocation0 + $0xa] sm:$0x1] %vm8_vm0, %v66_v26  }
  0x90   :  { %v72_v27 = vpop.permute.xlu0 %71  }
  0x91   :  { %v78_v28 = vpop.permute.xlu1 %77   ;;  %75 = vst.msk [vmem:[#allocation0 + $0xb] sm:$0x1] %vm8_vm0, %v72_v27  }
  0x92   :  { %81 = vst.msk [vmem:[#allocation0 + $0xc] sm:$0x1] %vm8_vm0, %v78_v28  }
  0x94   :  { %v84_v29 = vpop.permute.xlu0 %83  }
  0x95   :  { %v90_v30 = vpop.permute.xlu1 %89   ;;  %87 = vst.msk [vmem:[#allocation0 + $0xd] sm:$0x1] %vm8_vm0, %v84_v29  }
  0x96   :  { %93 = vst.msk [vmem:[#allocation0 + $0xe] sm:$0x1] %vm8_vm0, %v90_v30  }
  0x98   :  { %v96_v31 = vpop.permute.xlu0 %95  }
  0x99   :  { %99 = vst.msk [vmem:[#allocation0 + $0xf] sm:$0x1] %vm8_vm0, %v96_v31  }
  0x9a   :  { %137 = shalt.err (!%p134_p4)
}
  0x9b   :  { %s138_s27 = scalar_lea.hbm %s208_s1, 256 }
  0x9c   :  { %p139_p5 = scmp.ne.s32.totalorder %s208_s1, %s138_s27  ;;  %p142_p6 = scmp.lt.u32.totalorder %s138_s27, %s208_s1 }
  0x9e   :  { %p144_p7 = pnand %p142_p6, %p139_p5 }
  0xa0   :  { %147 = shalt.err (!%p144_p7)
}
  0xa1   :  { %107 = dma.vmem_to_hbm [thread:$0]  %s105_s23, 256, %s208_s1, [#allocation1]  }
  0xa2   :  { %148 = dma.done.wait [#allocation1], 256  }
  0xa3   :  { %149 = vsyncadd [#allocation1], 4294967040 }
  0xa4   :  { %109 = vsyncpa [#allocation1], 1 }

// kernel: head_forward.1
= control target key start
LH: loop header
LB: loop body
LE: loop exit
PB: predicated region body
PF: predicated region fallthrough
CT: control target
= control target key end

     0   :  { %vm124_vm0 = vcmask 1043456   ;;  %v6423_v3 = vmov 0   ;;  %vm117_vm1 = vcmask 64512   ;;  %vm334_vm2 = vcmask 261120   ;;  %s6392_s0 = inlined_call_operand.vmem [shape: f32[8,256], index: 0, kind: input, shape index: {}]   ;;  %s6393_s1 = inlined_call_operand.vmem [shape: f32[8,128], index: 1, kind: input, shape index: {}]   ;;  %s6394_s5 = inlined_call_operand.vmem [shape: bf16[32,8], index: 5, kind: input, shape index: {}]   ;;  %s6395_s6 = inlined_call_operand.vmem [shape: f32[32,1], index: 6, kind: input, shape index: {}]   ;;  %s6396_s8 = inlined_call_operand.vmem [shape: f32[64,1], index: 8, kind: input, shape index: {}]   ;;  %s6397_s7 = inlined_call_operand.vmem [shape: bf16[64,32], index: 7, kind: input, shape index: {}]   ;;  %s6398_s2 = inlined_call_operand.vmem [shape: f32[32,256], index: 2, kind: input, shape index: {}]   ;;  %s6399_s9 = inlined_call_operand.vmem [shape: bf16[32,32], index: 9, kind: input, shape index: {}]   ;;  %s6400_s10 = inlined_call_operand.vmem [shape: f32[32,1], index: 10, kind: input, shape index: {}]   ;;  %s6401_s12 = inlined_call_operand.vmem [shape: f32[32,1], index: 12, kind: input, shape index: {}]   ;;  %s6402_s3 = inlined_call_operand.vmem [shape: f32[32,128], index: 3, kind: input, shape index: {}]   ;;  %s6403_s11 = inlined_call_operand.vmem [shape: bf16[32,32], index: 11, kind: input, shape index: {}]   ;;  %s6404_s13 = inlined_call_operand.vmem [shape: bf16[64,32], index: 13, kind: input, shape index: {}]   ;;  %s6405_s14 = inlined_call_operand.vmem [shape: f32[64,1], index: 14, kind: input, shape index: {}]   ;;  %s6406_s15 = inlined_call_operand.vmem [shape: bf16[32,64], index: 15, kind: input, shape index: {}]   ;;  %s6407_s4 = inlined_call_operand.vmem [shape: f32[128,2], index: 4, kind: input, shape index: {}]   ;;  %s6408_s16 = inlined_call_operand.vmem [shape: f32[32,1], index: 16, kind: input, shape index: {}]   ;;  %s6409_s17 = inlined_call_operand.vmem [shape: bf16[32,32], index: 17, kind: input, shape index: {}]   ;;  %s6410_s18 = inlined_call_operand.vmem [shape: f32[32,1], index: 18, kind: input, shape index: {}]   ;;  %s6411_s19 = inlined_call_operand.vmem [shape: bf16[32,32], index: 19, kind: input, shape index: {}]   ;;  %s6412_s20 = inlined_call_operand.vmem [shape: f32[32,1], index: 20, kind: input, shape index: {}]   ;;  %s6413_s22 = inlined_call_operand.vmem [shape: f32[5,1], index: 22, kind: input, shape index: {}]   ;;  %s6414_s21 = inlined_call_operand.vmem [shape: bf16[5,32], index: 21, kind: input, shape index: {}]   ;;  %s6415_s23 = inlined_call_operand.vmem [shape: f32[5,128], index: 23, kind: output, shape index: {}]  }
   0x1   :  { %6444 = sst [smem:[#allocation19_spill]] %s6392_s0  ;;  %163 = vmatprep.mubr.bf16.mxu0 %v6423_v3  ;;  %4605 = vset.pattern.permute.xlu0 %v6423_v3  ;;  %vm1765_vm3 = vcmask 523264   ;;  %vm3043_vm5 = vcmask 7168   ;;  %vm4877_vm6 = vmmov 0  }
   0x2   :  { %6445 = sst [smem:[#allocation20_spill]] %s6393_s1  ;;  %s6452_s24 = sld [smem:[#allocation19_spill]]  ;;  %4606 = vset.pattern.permute.xlu1 %v6423_v3  ;;  %vm5978_vm4 = vmpackc.low %vm1765_vm3, %vm1765_vm3 }
   0x3   :  { %6446 = sst [smem:[#allocation21_spill]] %s6394_s5  ;;  %s6453_s1 = sld [smem:[#allocation20_spill]] }
   0x4   :  { %6447 = sst [smem:[#allocation22_spill]] %s6395_s6 }
   0x5   :  { %6448 = sst [smem:[#allocation23_spill]] %s6396_s8  ;;  %s6455_s8 = sld [smem:[#allocation22_spill]] }
   0x6   :  { %6449 = sst [smem:[#allocation24_spill]] %s6397_s7  ;;  %s6456_s27 = sld [smem:[#allocation23_spill]] }
   0x7   :  { %6450 = sst [smem:[#allocation25_spill]] %s6398_s2  ;;  %s6466_s6 = sld [smem:[#allocation24_spill]] }
   0x8   :  { %6451 = sst [smem:[#allocation26_spill]] %s6399_s9  ;;  %v76_v0 = vld [vmem:[%s6452_s24 + $0x8] sm:$0xff]  ;;  %v75_v2 = vld [vmem:[%s6452_s24] sm:$0xff]  ;;  %s6454_s9 = sld [smem:[#allocation21_spill]] }
   0x9   :  { %v184_v1 = vld [vmem:[%s6453_s1] sm:$0xff]  ;;  %v82_v4 = vpack.c.bf16 %v76_v0, %v76_v0  ;;  %v81_v6 = vpack.c.bf16 %v75_v2, %v75_v2  ;;  %s6458_s29 = sld [smem:[#allocation25_spill]]  ;;  %s6467_s26 = sld [smem:[#allocation26_spill]] }
   0xa   :  { %v185_v5 = vpack.c.bf16 %v184_v1, %v184_v1  ;;  %s4873_s24 = smov 127  }
   0xb   :  { %3655 = vmatprep.subr.msk.bf16.mxu0 %vm124_vm0, %v82_v4  ;;  %v126_v8 = vsel %vm124_vm0, %v81_v6, 0  ;;  %v83_v11 = vld [vmem:[%s6455_s8] sm:$0xff]  ;;  %v85_v12 = vld [vmem:[%s6455_s8 + $0x10] sm:$0xff]  ;;  %v84_v13 = vld [vmem:[%s6455_s8 + $0x8] sm:$0xff] }
   0xc   :  { %4593 = vmatprep.subr.msk.bf16.mxu1 %vm124_vm0, %v185_v5  ;;  %v187_v9 = vsel %vm124_vm0, %v185_v5, 0  ;;  %132 = vmatpush1.bf16.msra.mxu0 %v126_v8  ;;  %v86_v14 = vld [vmem:[%s6455_s8 + $0x18] sm:$0xff]  ;;  %v266_v15 = vld [vmem:[%s6456_s27] sm:$0xff]  ;;  %v267_v16 = vld [vmem:[%s6456_s27 + $0x8] sm:$0xff] }
   0xd   :  { %3996 = vmatpush3.bf16.msra.mxu1 %v187_v9  ;;  %89 = vperm.xlu0 %4605, %v83_v11   ;;  %v268_v17 = vld [vmem:[%s6456_s27 + $0x10] sm:$0xff]  ;;  %v269_v18 = vld [vmem:[%s6456_s27 + $0x18] sm:$0xff]  ;;  %v270_v19 = vld [vmem:[%s6456_s27 + $0x20] sm:$0xff] }
   0xe   :  { %v4642_v7 = vld [vmem:[%s6454_s9] sm:$0xff]   ;;  %v4643_v10 = vld [vmem:[%s6454_s9 + $0x8] sm:$0xff]   ;;  %99 = vperm.xlu1 %4606, %v85_v12   ;;  %v272_v21 = vld [vmem:[%s6456_s27 + $0x30] sm:$0xff] }
   0xf   :  { %3997 = vmatprep.mubr.msk.bf16.mxu1 %vm117_vm1, %v4642_v7  ;;  %3656 = vmatmul.mubr.msk.bf16.vlgmr.msra.gmra.mrb[0].mxu0 %vm117_vm1, %v4642_v7  ;;  %v271_v20 = vld [vmem:[%s6456_s27 + $0x28] sm:$0xff]  ;;  %v273_v22 = vld [vmem:[%s6456_s27 + $0x38] sm:$0xff]  ;;  %v240_v31 = vld [vmem:[%s6458_s29 + $0x10] sm:$0xff]  ;;  %s4872_s27 = smov 64  }
  0x10   :  { %3998 = vmatmul.mubr.msk.bf16.vlgmr.msra.gmra.mrb[0].mxu1 %vm117_vm1, %v4643_v10  ;;  %173 = vmatprep.mubr.bf16.mxu0 %v6423_v3  ;;  %v239_v34 = vld [vmem:[%s6458_s29 + $0x8] sm:$0xff]  ;;  %v241_v37 = vld [vmem:[%s6458_s29 + $0x18] sm:$0xff]  ;;  %v238_v40 = vld [vmem:[%s6458_s29] sm:$0xff] }
  0x11   :  { %379 = vmatprep.mubr.bf16.mxu1 %v6423_v3  ;;  %94 = vperm.xlu0 %4605, %v84_v13   ;;  %v244_v55 = vld [vmem:[%s6458_s29 + $0x30] sm:$0xff]  ;;  %v243_v57 = vld [vmem:[%s6458_s29 + $0x28] sm:$0xff]  ;;  %v245_v60 = vld [vmem:[%s6458_s29 + $0x38] sm:$0xff] }
  0x12   :  { %104 = vperm.xlu1 %4606, %v86_v14   ;;  %v242_v61 = vld [vmem:[%s6458_s29 + $0x20] sm:$0xff]  ;;  %v4645_v9 = vld [vmem:[%s6466_s6 + $0x8] sm:$0xff]   ;;  %v4647_v11 = vld [vmem:[%s6466_s6 + $0x18] sm:$0xff]  }
  0x13   :  { %v4644_v8 = vld [vmem:[%s6466_s6] sm:$0xff]   ;;  %v4649_v13 = vld [vmem:[%s6467_s26 + $0x8] sm:$0xff]  }
  0x14   :  { %v4648_v12 = vld [vmem:[%s6467_s26] sm:$0xff]  }
  0x15   :  { %276 = vperm.xlu0 %4605, %v266_v15  }
  0x16   :  { %281 = vperm.xlu1 %4606, %v267_v16  }
  0x17   :  { %3657 = vmatmul.mubr.msk.bf16.gmra.mrb[4].mxu0 %vm117_vm1, %v4643_v10  ;;  %v4646_v10 = vld [vmem:[%s6466_s6 + $0x10] sm:$0xff]  }
  0x18   :  { %500 = vmatprep.mubr.bf16.mxu0 %v6423_v3 }
  0x19   :  { %286 = vperm.xlu0 %4605, %v268_v17  }
  0x1a   :  { %291 = vperm.xlu1 %4606, %v269_v18  }
  0x1d   :  { %296 = vperm.xlu0 %4605, %v270_v19  }
  0x1e   :  { %301 = vperm.xlu1 %4606, %v271_v20  }
  0x21   :  { %306 = vperm.xlu0 %4605, %v272_v21  }
  0x22   :  { %311 = vperm.xlu1 %4606, %v273_v22  }
  0x8c   :  { %v5063_v23 = vpop.permute.xlu0 %89 }
  0x8d   :  { %v5093_v39 = vpop.permute.xlu1 %99 }
  0x90   :  { %v5065_v24 = vpop.permute.xlu0 %94 }
  0x91   :  { %v5109_v52 = vpop.permute.xlu1 %104 }
  0x94   :  { %v5171_v14 = vpop.permute.xlu0 %276 }
  0x95   :  { %6468 = vst [vmem:[#allocation10_spill] sm:$0xff] %v5171_v14  ;;  %v5175_v21 = vpop.permute.xlu1 %281 }
  0x96   :  { %6469 = vst [vmem:[#allocation11_spill] sm:$0xff] %v5175_v21 }
  0xe2   :  { %v165_v25 = vpop.f32.mrb[0].mxu0 }
  0xe3   :  { %v5067_v26 = vpop.f32.mrb[0].mxu1  ;;  %v167_v27 = vpop.f32.mrb[1].mxu0  ;;  %v5080_v33 = vadd.f32 %v165_v25, %v5063_v23 }
  0xe4   :  { %v5069_v28 = vpop.f32.mrb[1].mxu1  ;;  %v5072_v29 = vadd.f32 %v167_v27, %v5063_v23  ;;  %v169_v30 = vpop.f32.mrb[2].mxu0 }
  0xe5   :  { %v5077_v32 = vpop.f32.mrb[2].mxu1  ;;  %6459 = vst [vmem:[#allocation3_spill] sm:$0xff] %v5080_v33  ;;  %v5086_v35 = vadd.f32 %v169_v30, %v5065_v24  ;;  %v171_v36 = vpop.f32.mrb[3].mxu0  ;;  %v246_v46 = vadd.f32 %v238_v40, %v5080_v33 }
  0xe6   :  { %6457 = vst [vmem:[#allocation2_spill] sm:$0xff] %v5072_v29  ;;  %v5091_v38 = vpop.f32.mrb[3].mxu1  ;;  %v5099_v41 = vadd.f32 %v171_v36, %v5065_v24  ;;  %v247_v43 = vadd.f32 %v239_v34, %v5072_v29  ;;  %v5179_v27 = vpop.permute.xlu0 %286 }
  0xe7   :  { %6460 = vst [vmem:[#allocation4_spill] sm:$0xff] %v5086_v35  ;;  %v248_v42 = vadd.f32 %v240_v31, %v5086_v35  ;;  %v424_v47 = vpack.c.bf16 %v5086_v35, %v5080_v33  ;;  %6470 = vst [vmem:[#allocation12_spill] sm:$0xff] %v5179_v27 }
  0xe8   :  { %6461 = vst [vmem:[#allocation5_spill] sm:$0xff] %v5099_v41  ;;  %v249_v44 = vadd.f32 %v241_v37, %v5099_v41  ;;  %v425_v45 = vpack.c.bf16 %v5099_v41, %v5072_v29 }
  0xe9   :  { %v262_v50 = vpack.c.bf16 %v248_v42, %v246_v46  ;;  %v5183_v42 = vpop.permute.xlu1 %291 }
  0xea   :  { %v175_v48 = vpop.f32.mrb[4].mxu0  ;;  %468 = vmatprep.subr.bf16.mxu0 %v425_v45  ;;  %v263_v49 = vpack.c.bf16 %v249_v44, %v247_v43  ;;  %6471 = vst [vmem:[#allocation13_spill] sm:$0xff] %v5183_v42  ;;  %v5187_v46 = vpop.permute.xlu0 %296 }
  0xeb   :  { %v177_v51 = vpop.f32.mrb[5].mxu0  ;;  %469 = vmatpush1.bf16.msra.mxu0 %v424_v47  ;;  %v5118_v56 = vadd.f32 %v175_v48, %v5093_v39  ;;  %6472 = vst [vmem:[#allocation14_spill] sm:$0xff] %v5187_v46 }
  0xec   :  { %v5112_v53 = vadd.f32 %v177_v51, %v5093_v39  ;;  %v179_v54 = vpop.f32.mrb[6].mxu0  ;;  %347 = vmatprep.subr.bf16.mxu1 %v263_v49 }
  0xed   :  { %6463 = vst [vmem:[#allocation7_spill] sm:$0xff] %v5118_v56  ;;  %v5124_v58 = vadd.f32 %v179_v54, %v5109_v52  ;;  %v181_v59 = vpop.f32.mrb[7].mxu0  ;;  %348 = vmatpush1.bf16.msra.mxu1 %v262_v50  ;;  %v250_v4 = vadd.f32 %v242_v61, %v5118_v56  ;;  %v5189_v48 = vpop.permute.xlu1 %301 }
  0xee   :  { %6462 = vst [vmem:[#allocation6_spill] sm:$0xff] %v5112_v53  ;;  %v5133_v62 = vadd.f32 %v181_v59, %v5109_v52  ;;  %v251_v0 = vadd.f32 %v243_v57, %v5112_v53  ;;  %6473 = vst [vmem:[#allocation15_spill] sm:$0xff] %v5189_v48 }
  0xef   :  { %6464 = vst [vmem:[#allocation8_spill] sm:$0xff] %v5124_v58  ;;  %v252_v63 = vadd.f32 %v244_v55, %v5124_v58  ;;  %v426_v5 = vpack.c.bf16 %v5124_v58, %v5118_v56 }
  0xf0   :  { %6465 = vst [vmem:[#allocation9_spill] sm:$0xff] %v5133_v62  ;;  %v253_v1 = vadd.f32 %v245_v60, %v5133_v62  ;;  %v427_v2 = vpack.c.bf16 %v5133_v62, %v5112_v53 }
  0xf1   :  { %v264_v7 = vpack.c.bf16 %v252_v63, %v250_v4  ;;  %v5195_v63 = vpop.permute.xlu0 %306 }
  0xf2   :  { %470 = vmatprep.subr.bf16.mxu0 %v427_v2  ;;  %v265_v6 = vpack.c.bf16 %v253_v1, %v251_v0  ;;  %6474 = vst [vmem:[#allocation16_spill] sm:$0xff] %v5195_v63  ;;  %v5197_v1 = vpop.permute.xlu1 %311 }
  0xf3   :  { %471 = vmatpush1.bf16.msra.mxu0 %v426_v5  ;;  %6475 = vst [vmem:[#allocation17_spill] sm:$0xff] %v5197_v1 }
  0xf4   :  { %349 = vmatprep.subr.bf16.mxu1 %v265_v6 }
  0xf5   :  { %350 = vmatpush1.bf16.msra.mxu1 %v264_v7 }
  0xf6   :  { %3670 = vmatmul.mubr.msk.bf16.vlgmr.msra.gmra.mrb[8].mxu0 %vm334_vm2, %v4648_v12 }
  0xf7   :  { %510 = vmatprep.mubr.bf16.mxu0 %v6423_v3 }
  0xf8   :  { %3664 = vmatmul.mubr.msk.bf16.vlgmr.msra.gmra.mrb[4].mxu1 %vm334_vm2, %v4644_v8 }
  0xf9   :  { %389 = vmatprep.mubr.bf16.mxu1 %v6423_v3 }
  0xfe   :  { %3671 = vmatmul.mubr.msk.bf16.gmra.mrb[12].mxu0 %vm334_vm2, %v4649_v13 }
 0x100   :  { %3665 = vmatmul.mubr.msk.bf16.gmra.mrb[8].mxu1 %vm334_vm2, %v4645_v9 }
 0x101   :  { %399 = vmatprep.mubr.bf16.mxu1 %v6423_v3 }
 0x108   :  { %3666 = vmatmul.mubr.msk.bf16.gmra.mrb[12].mxu1 %vm334_vm2, %v4646_v10 }
 0x109   :  { %409 = vmatprep.mubr.bf16.mxu1 %v6423_v3 }
 0x110   :  { %3667 = vmatmul.mubr.msk.bf16.gmra.mrb[16].mxu1 %vm334_vm2, %v4647_v11 }
 0x1c9   :  { %v5203_v11 = vpop.f32.mrb[8].mxu0 }
 0x1ca   :  { %v5205_v12 = vpop.f32.mrb[9].mxu0 }
 0x1cb   :  { %v381_v15 = vpop.f32.mrb[4].mxu1  ;;  %v5207_v13 = vpop.f32.mrb[10].mxu0 }
 0x1cc   :  { %v382_v16 = vadd.f32 %v381_v15, %v5171_v14  ;;  %v383_v17 = vpop.f32.mrb[5].mxu1  ;;  %v5209_v15 = vpop.f32.mrb[11].mxu0 }
 0x1cd   :  { %v384_v18 = vadd.f32 %v383_v17, %v5171_v14  ;;  %v385_v19 = vpop.f32.mrb[6].mxu1 }
 0x1ce   :  { %v387_v20 = vpop.f32.mrb[7].mxu1  ;;  %521 = vxpose.xlu0.b32.start [1/4] (short) %v382_v16, 128  ;;  %v386_v22 = vadd.f32 %v385_v19, %v5175_v21 }
 0x1cf   :  { %975 = vxpose.xlu1.b32.start [1/4] (short) %v384_v18, 128  ;;  %v388_v25 = vadd.f32 %v387_v20, %v5175_v21 }
 0x1d1   :  { %v5211_v16 = vpop.f32.mrb[12].mxu0 }
 0x1d2   :  { %522 = vxpose.xlu0.b32.cont [2/4] (short) %v386_v22, 128  ;;  %v5213_v17 = vpop.f32.mrb[13].mxu0 }
 0x1d3   :  { %v391_v30 = vpop.f32.mrb[8].mxu1  ;;  %976 = vxpose.xlu1.b32.cont [2/4] (short) %v388_v25, 128  ;;  %v5215_v18 = vpop.f32.mrb[14].mxu0 }
 0x1d4   :  { %v392_v31 = vadd.f32 %v391_v30, %v5179_v27  ;;  %v393_v34 = vpop.f32.mrb[9].mxu1  ;;  %v5217_v19 = vpop.f32.mrb[15].mxu0 }
 0x1d5   :  { %v394_v36 = vadd.f32 %v393_v34, %v5179_v27  ;;  %v395_v37 = vpop.f32.mrb[10].mxu1  ;;  %6476 = vst [vmem:[#allocation18_spill] sm:$0xff] %v5217_v19 }
 0x1d6   :  { %v397_v40 = vpop.f32.mrb[11].mxu1  ;;  %523 = vxpose.xlu0.b32.cont [3/4] (short) %v392_v31, 128  ;;  %v396_v43 = vadd.f32 %v395_v37, %v5183_v42 }
 0x1d7   :  { %977 = vxpose.xlu1.b32.cont [3/4] (short) %v394_v36, 128  ;;  %v398_v44 = vadd.f32 %v397_v40, %v5183_v42 }
 0x1da   :  { %524 = vxpose.xlu0.b32.end [4/4] (short) %v396_v43, 128 }
 0x1db   :  { %v401_v45 = vpop.f32.mrb[12].mxu1  ;;  %978 = vxpose.xlu1.b32.end [4/4] (short) %v398_v44, 128 }
 0x1dc   :  { %v403_v47 = vpop.f32.mrb[13].mxu1  ;;  %v402_v50 = vadd.f32 %v401_v45, %v5187_v46 }
 0x1dd   :  { %v405_v49 = vpop.f32.mrb[14].mxu1  ;;  %v404_v55 = vadd.f32 %v403_v47, %v5187_v46 }
 0x1de   :  { %v406_v51 = vadd.f32 %v405_v49, %v5189_v48  ;;  %v407_v54 = vpop.f32.mrb[15].mxu1 }
 0x1df   :  { %v408_v57 = vadd.f32 %v407_v54, %v5189_v48 }
 0x1e0   :  { %v4385_v59 = vpack.c.bf16 %v406_v51, %v402_v50 }
 0x1e1   :  { %v4425_v60 = vpack.c.bf16 %v408_v57, %v404_v55 }
 0x1e2   :  { %4386 = vmatprep.subr.bf16.mxu0 %v4385_v59 }
 0x1e3   :  { %v411_v61 = vpop.f32.mrb[16].mxu1  ;;  %4388 = vmatpush3.bf16.msra.mxu0 %v4385_v59 }
 0x1e4   :  { %v413_v0 = vpop.f32.mrb[17].mxu1  ;;  %v412_v4 = vadd.f32 %v411_v61, %v5195_v63 }
 0x1e5   :  { %v415_v2 = vpop.f32.mrb[18].mxu1  ;;  %v414_v7 = vadd.f32 %v413_v0, %v5195_v63 }
 0x1e6   :  { %v416_v5 = vadd.f32 %v415_v2, %v5197_v1  ;;  %v417_v6 = vpop.f32.mrb[19].mxu1 }
 0x1e7   :  { %v418_v8 = vadd.f32 %v417_v6, %v5197_v1 }
 0x1e8   :  { %v4389_v9 = vpack.c.bf16 %v416_v5, %v412_v4 }
 0x1e9   :  { %v4429_v10 = vpack.c.bf16 %v418_v8, %v414_v7 }
 0x1ea   :  { %4390 = vmatprep.subr.bf16.mxu0 %v4389_v9 }
 0x1eb   :  { %4392 = vmatpush3.bf16.msra.mxu0 %v4389_v9 }
 0x1ec   :  { %4426 = vmatprep.subr.bf16.mxu0 %v4425_v60 }
 0x24e   :  { %v537_v20 = vpop.trf.xlu0 }
 0x24f   :  { %4009 = vmatprep.mubr.msk.f32.mxu0 %vm334_vm2, %v537_v20  ;;  %v991_v22 = vpop.trf.xlu1 }
 0x252   :  { %v538_v25 = vpop.trf.xlu0 }
 0x253   :  { %4010 = vmatmul.mubr.msk.f32.vlgmr.msra.gmra.mrb[16].mxu0 %vm334_vm2, %v538_v25  ;;  %v992_v30 = vpop.trf.xlu1 }
 0x254   :  { %4428 = vmatpush3.bf16.msra.mxu0 %v4425_v60 }
 0x255   :  { %4430 = vmatprep.subr.bf16.mxu0 %v4429_v10 }
 0x256   :  { %v539_v31 = vpop.trf.xlu0 }
 0x257   :  { %4012 = vmatprep.mubr.msk.f32.mxu0 %vm334_vm2, %v539_v31  ;;  %v993_v36 = vpop.trf.xlu1 }
 0x258   :  { %4432 = vmatpush3.bf16.msra.mxu0 %v4429_v10 }
 0x25a   :  { %v540_v34 = vpop.trf.xlu0 }
 0x25b   :  { %4013 = vmatmul.mubr.msk.f32.gmra.mrb[18].mxu0 %vm334_vm2, %v540_v34  ;;  %v994_v40 = vpop.trf.xlu1 }
 0x25e   :  { %v541_v37 = vpop.trf.xlu0 }
 0x25f   :  { %4015 = vmatprep.mubr.msk.f32.mxu0 %vm334_vm2, %v541_v37  ;;  %v995_v45 = vpop.trf.xlu1 }
 0x262   :  { %v542_v43 = vpop.trf.xlu0 }
 0x263   :  { %4016 = vmatmul.mubr.msk.f32.gmra.mrb[20].mxu0 %vm334_vm2, %v542_v43  ;;  %v996_v49 = vpop.trf.xlu1 }
 0x266   :  { %v543_v44 = vpop.trf.xlu0 }
 0x267   :  { %4018 = vmatprep.mubr.msk.f32.mxu0 %vm334_vm2, %v543_v44  ;;  %v997_v54 = vpop.trf.xlu1 }
 0x26a   :  { %v544_v47 = vpop.trf.xlu0 }
 0x26b   :  { %4019 = vmatmul.mubr.msk.f32.gmra.mrb[22].mxu0 %vm334_vm2, %v544_v47  ;;  %v998_v57 = vpop.trf.xlu1 }
 0x26e   :  { %v545_v50 = vpop.trf.xlu0 }
 0x26f   :  { %4021 = vmatprep.mubr.msk.f32.mxu0 %vm334_vm2, %v545_v50  ;;  %v999_v61 = vpop.trf.xlu1 }
 0x272   :  { %v546_v51 = vpop.trf.xlu0 }
 0x273   :  { %4022 = vmatmul.mubr.msk.f32.gmra.mrb[24].mxu0 %vm334_vm2, %v546_v51  ;;  %v1000_v2 = vpop.trf.xlu1 }
 0x276   :  { %v547_v55 = vpop.trf.xlu0 }
 0x277   :  { %4024 = vmatprep.mubr.msk.f32.mxu0 %vm334_vm2, %v547_v55  ;;  %v1001_v6 = vpop.trf.xlu1 }
 0x27a   :  { %v548_v59 = vpop.trf.xlu0 }
 0x27b   :  { %4025 = vmatmul.mubr.msk.f32.gmra.mrb[26].mxu0 %vm334_vm2, %v548_v59  ;;  %v1002_v7 = vpop.trf.xlu1 }
 0x27e   :  { %v549_v60 = vpop.trf.xlu0 }
 0x27f   :  { %4027 = vmatprep.mubr.msk.f32.mxu0 %vm334_vm2, %v549_v60  ;;  %v1003_v8 = vpop.trf.xlu1 }
 0x282   :  { %v550_v0 = vpop.trf.xlu0 }
 0x283   :  { %4028 = vmatmul.mubr.msk.f32.gmra.mrb[28].mxu0 %vm334_vm2, %v550_v0  ;;  %v1004_v9 = vpop.trf.xlu1 }
 0x286   :  { %v551_v4 = vpop.trf.xlu0 }
 0x287   :  { %4030 = vmatprep.mubr.msk.f32.mxu0 %vm334_vm2, %v551_v4  ;;  %v1005_v10 = vpop.trf.xlu1 }
 0x28a   :  { %v552_v5 = vpop.trf.xlu0 }
 0x28b   :  { %4031 = vmatmul.mubr.msk.f32.gmra.mrb[30].mxu0 %vm334_vm2, %v552_v5  ;;  %v1006_v20 = vpop.trf.xlu1 }
 0x28c   :  { %4079 = vmatprep.mubr.msk.f32.mxu0 %vm334_vm2, %v991_v22 }
 0x28f   :  { %4080 = vmatmul.mubr.msk.f32.vlgmr.msra.gmra.mrb[32].mxu0 %vm334_vm2, %v992_v30 }
 0x290   :  { %4082 = vmatprep.mubr.msk.f32.mxu0 %vm334_vm2, %v993_v36 }
 0x293   :  { %4083 = vmatmul.mubr.msk.f32.gmra.mrb[34].mxu0 %vm334_vm2, %v994_v40 }
 0x294   :  { %4085 = vmatprep.mubr.msk.f32.mxu0 %vm334_vm2, %v995_v45 }
 0x297   :  { %4086 = vmatmul.mubr.msk.f32.gmra.mrb[36].mxu0 %vm334_vm2, %v996_v49 }
 0x298   :  { %4088 = vmatprep.mubr.msk.f32.mxu0 %vm334_vm2, %v997_v54 }
 0x29b   :  { %4089 = vmatmul.mubr.msk.f32.gmra.mrb[38].mxu0 %vm334_vm2, %v998_v57 }
 0x29c   :  { %4091 = vmatprep.mubr.msk.f32.mxu0 %vm334_vm2, %v999_v61 }
 0x29f   :  { %4092 = vmatmul.mubr.msk.f32.gmra.mrb[40].mxu0 %vm334_vm2, %v1000_v2 }
 0x2a0   :  { %4094 = vmatprep.mubr.msk.f32.mxu0 %vm334_vm2, %v1001_v6 }
 0x2a3   :  { %4095 = vmatmul.mubr.msk.f32.gmra.mrb[42].mxu0 %vm334_vm2, %v1002_v7 }
 0x2a4   :  { %4097 = vmatprep.mubr.msk.f32.mxu0 %vm334_vm2, %v1003_v8 }
 0x2a7   :  { %4098 = vmatmul.mubr.msk.f32.gmra.mrb[44].mxu0 %vm334_vm2, %v1004_v9 }
 0x2a8   :  { %4100 = vmatprep.mubr.msk.f32.mxu0 %vm334_vm2, %v1005_v10 }
 0x2ab   :  { %4101 = vmatmul.mubr.msk.f32.gmra.mrb[46].mxu0 %vm334_vm2, %v1006_v20 }
 0x326   :  { %v5251_v22 = vpop.f32.mrb[16].mxu0 }
 0x327   :  { %v5253_v25 = vpop.f32.mrb[17].mxu0 }
 0x328   :  { %746 = vmax.xlane.f32.xlu0 %v5253_v25 }
 0x32e   :  { %v5256_v30 = vpop.f32.mrb[18].mxu0 }
 0x32f   :  { %v5258_v31 = vpop.f32.mrb[19].mxu0 }
 0x336   :  { %v5260_v34 = vpop.f32.mrb[20].mxu0 }
 0x337   :  { %v5262_v36 = vpop.f32.mrb[21].mxu0 }
 0x33e   :  { %v5264_v37 = vpop.f32.mrb[22].mxu0 }
 0x33f   :  { %v5266_v40 = vpop.f32.mrb[23].mxu0 }
 0x346   :  { %v5268_v43 = vpop.f32.mrb[24].mxu0 }
 0x347   :  { %v5270_v44 = vpop.f32.mrb[25].mxu0 }
 0x34e   :  { %v5272_v45 = vpop.f32.mrb[26].mxu0 }
 0x34f   :  { %v5274_v47 = vpop.f32.mrb[27].mxu0 }
 0x356   :  { %v5276_v49 = vpop.f32.mrb[28].mxu0 }
 0x357   :  { %v5278_v50 = vpop.f32.mrb[29].mxu0 }
 0x35e   :  { %v5280_v51 = vpop.f32.mrb[30].mxu0 }
 0x35f   :  { %v5282_v54 = vpop.f32.mrb[31].mxu0 }
 0x362   :  { %v5284_v55 = vpop.f32.mrb[32].mxu0 }
 0x363   :  { %1202 = vmax.xlane.f32.xlu1 %v5284_v55  ;;  %v5287_v57 = vpop.f32.mrb[33].mxu0 }
 0x364   :  { %1200 = vmax.xlane.f32.xlu0 %v5287_v57 }
 0x366   :  { %v5290_v59 = vpop.f32.mrb[34].mxu0 }
 0x367   :  { %750 = vmax.xlane.f32.xlu1 %v5258_v31  ;;  %v5293_v60 = vpop.f32.mrb[35].mxu0 }
 0x368   :  { %748 = vmax.xlane.f32.xlu0 %v5251_v22 }
 0x36a   :  { %v5296_v61 = vpop.f32.mrb[36].mxu0 }
 0x36b   :  { %754 = vmax.xlane.f32.xlu1 %v5262_v36  ;;  %v5299_v0 = vpop.f32.mrb[37].mxu0 }
 0x36c   :  { %1206 = vmax.xlane.f32.xlu0 %v5290_v59 }
 0x36e   :  { %v5302_v2 = vpop.f32.mrb[38].mxu0 }
 0x36f   :  { %1204 = vmax.xlane.f32.xlu1 %v5293_v60  ;;  %v5305_v4 = vpop.f32.mrb[39].mxu0 }
 0x370   :  { %752 = vmax.xlane.f32.xlu0 %v5256_v30 }
 0x372   :  { %v5308_v5 = vpop.f32.mrb[40].mxu0 }
 0x373   :  { %758 = vmax.xlane.f32.xlu1 %v5266_v40  ;;  %v5311_v6 = vpop.f32.mrb[41].mxu0 }
 0x374   :  { %1210 = vmax.xlane.f32.xlu0 %v5296_v61 }
 0x376   :  { %v5314_v7 = vpop.f32.mrb[42].mxu0 }
 0x377   :  { %1208 = vmax.xlane.f32.xlu1 %v5299_v0  ;;  %v5317_v8 = vpop.f32.mrb[43].mxu0 }
 0x378   :  { %756 = vmax.xlane.f32.xlu0 %v5260_v34 }
 0x37a   :  { %v5320_v9 = vpop.f32.mrb[44].mxu0 }
 0x37b   :  { %762 = vmax.xlane.f32.xlu1 %v5270_v44  ;;  %v5323_v10 = vpop.f32.mrb[45].mxu0 }
 0x37c   :  { %1214 = vmax.xlane.f32.xlu0 %v5302_v2 }
 0x37e   :  { %v5326_v20 = vpop.f32.mrb[46].mxu0 }
 0x37f   :  { %1212 = vmax.xlane.f32.xlu1 %v5305_v4  ;;  %v5329_v3 = vpop.f32.mrb[47].mxu0 }
 0x380   :  { %760 = vmax.xlane.f32.xlu0 %v5264_v37 }
 0x383   :  { %766 = vmax.xlane.f32.xlu1 %v5274_v47 }
 0x384   :  { %1218 = vmax.xlane.f32.xlu0 %v5308_v5 }
 0x387   :  { %1216 = vmax.xlane.f32.xlu1 %v5311_v6 }
 0x388   :  { %764 = vmax.xlane.f32.xlu0 %v5268_v43 }
 0x38b   :  { %770 = vmax.xlane.f32.xlu1 %v5278_v50 }
 0x38c   :  { %1222 = vmax.xlane.f32.xlu0 %v5314_v7 }
 0x38f   :  { %1220 = vmax.xlane.f32.xlu1 %v5317_v8 }
 0x390   :  { %768 = vmax.xlane.f32.xlu0 %v5272_v45 }
 0x393   :  { %774 = vmax.xlane.f32.xlu1 %v5282_v54 }
 0x394   :  { %1226 = vmax.xlane.f32.xlu0 %v5320_v9 }
 0x397   :  { %1224 = vmax.xlane.f32.xlu1 %v5323_v10 }
 0x398   :  { %772 = vmax.xlane.f32.xlu0 %v5276_v49 }
 0x39b   :  { %1228 = vmax.xlane.f32.xlu1 %v5329_v3 }
 0x39c   :  { %1230 = vmax.xlane.f32.xlu0 %v5326_v20 }
 0x3a0   :  { %776 = vmax.xlane.f32.xlu0 %v5280_v51 }
 0x3b5   :  { %v747_v56 = vpop.xlane.xlu0 %746 }
 0x3b6   :  { %v778_v62 = vsub.f32 %v5253_v25, %v747_v56 }
 0x3b8   :  { %v794_v53 = vmul.f32 1.442695, %v778_v62 }
 0x3ba   :  { %4662 = vpow2.f32 %v794_v53 }
 0x3c4   :  { %v5348_v58 = vpop.eup %4662 }
 0x3c5   :  { %826 = vadd.xlane.f32.xlu1 %v5348_v58 }
 0x3f0   :  { %v1203_v33 = vpop.xlane.xlu1 %1202 }
 0x3f1   :  { %v1201_v41 = vpop.xlane.xlu0 %1200  ;;  %v1233_v46 = vsub.f32 %v5284_v55, %v1203_v33 }
 0x3f2   :  { %v1232_v56 = vsub.f32 %v5287_v57, %v1201_v41 }
 0x3f3   :  { %v1250_v25 = vmul.f32 1.442695, %v1233_v46 }
 0x3f4   :  { %v751_v29 = vpop.xlane.xlu1 %750  ;;  %v1248_v19 = vmul.f32 1.442695, %v1232_v56 }
 0x3f5   :  { %v780_v35 = vsub.f32 %v5258_v31, %v751_v29  ;;  %v749_v48 = vpop.xlane.xlu0 %748 }
 0x3f6   :  { %v779_v1 = vsub.f32 %v5251_v22, %v749_v48 }
 0x3f7   :  { %v798_v63 = vmul.f32 1.442695, %v780_v35 }
 0x3f8   :  { %v796_v42 = vmul.f32 1.442695, %v779_v1  ;;  %v755_v27 = vpop.xlane.xlu1 %754 }
 0x3f9   :  { %4664 = vpow2.f32 %v798_v63  ;;  %v782_v53 = vsub.f32 %v5262_v36, %v755_v27  ;;  %v1207_v62 = vpop.xlane.xlu0 %1206 }
 0x3fa   :  { %4666 = vpow2.f32 %v796_v42  ;;  %v1235_v33 = vsub.f32 %v5290_v59, %v1207_v62 }
 0x3fb   :  { %v802_v21 = vmul.f32 1.442695, %v782_v53 }
 0x3fc   :  { %v1205_v14 = vpop.xlane.xlu1 %1204  ;;  %v1254_v46 = vmul.f32 1.442695, %v1235_v33 }
 0x3fd   :  { %4668 = vpow2.f32 %v802_v21  ;;  %v753_v29 = vpop.xlane.xlu0 %752  ;;  %v1234_v41 = vsub.f32 %v5293_v60, %v1205_v14 }
 0x3fe   :  { %4670 = vpow2.f32 %v1250_v25  ;;  %v781_v35 = vsub.f32 %v5256_v30, %v753_v29 }
 0x3ff   :  { %4672 = vpow2.f32 %v1248_v19  ;;  %v1252_v36 = vmul.f32 1.442695, %v1234_v41 }
 0x400   :  { %v800_v48 = vmul.f32 1.442695, %v781_v35  ;;  %v759_v1 = vpop.xlane.xlu1 %758 }
 0x401   :  { %v784_v27 = vsub.f32 %v5266_v40, %v759_v1  ;;  %v1211_v63 = vpop.xlane.xlu0 %1210 }
 0x402   :  { %4674 = vpow2.f32 %v800_v48  ;;  %v1237_v14 = vsub.f32 %v5296_v61, %v1211_v63 }
 0x403   :  { %v5360_v42 = vpop.eup %4664  ;;  %v806_v22 = vmul.f32 1.442695, %v784_v27 }
 0x404   :  { %v5362_v21 = vpop.eup %4666  ;;  %v1209_v31 = vpop.xlane.xlu1 %1208  ;;  %830 = vadd.xlane.f32.xlu1 %v5360_v42  ;;  %v1258_v62 = vmul.f32 1.442695, %v1237_v14 }
 0x405   :  { %4676 = vpow2.f32 %v806_v22  ;;  %828 = vadd.xlane.f32.xlu0 %v5362_v21  ;;  %v757_v19 = vpop.xlane.xlu0 %756  ;;  %v1236_v60 = vsub.f32 %v5299_v0, %v1209_v31 }
 0x406   :  { %4678 = vpow2.f32 %v1254_v46  ;;  %v783_v30 = vsub.f32 %v5260_v34, %v757_v19 }
 0x407   :  { %v5368_v40 = vpop.eup %4668  ;;  %4680 = vpow2.f32 %v1252_v36  ;;  %v1256_v33 = vmul.f32 1.442695, %v1236_v60 }
 0x408   :  { %v5370_v55 = vpop.eup %4670  ;;  %v804_v57 = vmul.f32 1.442695, %v783_v30  ;;  %v763_v59 = vpop.xlane.xlu1 %762  ;;  %834 = vadd.xlane.f32.xlu1 %v5368_v40 }
 0x409   :  { %v786_v56 = vsub.f32 %v5270_v44, %v763_v59  ;;  %1282 = vadd.xlane.f32.xlu0 %v5370_v55  ;;  %v1215_v53 = vpop.xlane.xlu0 %1214  ;;  %v5376_v61 = vpop.eup %4672 }
 0x40a   :  { %4682 = vpow2.f32 %v804_v57  ;;  %v1239_v44 = vsub.f32 %v5302_v2, %v1215_v53 }
 0x40b   :  { %v810_v34 = vmul.f32 1.442695, %v786_v56 }
 0x40c   :  { %v5378_v25 = vpop.eup %4674  ;;  %v1213_v29 = vpop.xlane.xlu1 %1212  ;;  %1280 = vadd.xlane.f32.xlu1 %v5376_v61  ;;  %v1262_v31 = vmul.f32 1.442695, %v1239_v44 }
 0x40d   :  { %4684 = vpow2.f32 %v810_v34  ;;  %832 = vadd.xlane.f32.xlu0 %v5378_v25  ;;  %v761_v0 = vpop.xlane.xlu0 %760  ;;  %v1238_v63 = vsub.f32 %v5305_v4, %v1213_v29 }
 0x40e   :  { %4686 = vpow2.f32 %v1258_v62  ;;  %v785_v35 = vsub.f32 %v5264_v37, %v761_v0 }
 0x40f   :  { %v5384_v48 = vpop.eup %4676  ;;  %4688 = vpow2.f32 %v1256_v33  ;;  %v1260_v14 = vmul.f32 1.442695, %v1238_v63 }
 0x410   :  { %v5386_v1 = vpop.eup %4678  ;;  %v808_v41 = vmul.f32 1.442695, %v785_v35  ;;  %v767_v27 = vpop.xlane.xlu1 %766  ;;  %838 = vadd.xlane.f32.xlu1 %v5384_v48 }
 0x411   :  { %v788_v46 = vsub.f32 %v5274_v47, %v767_v27  ;;  %1286 = vadd.xlane.f32.xlu0 %v5386_v1  ;;  %v1219_v22 = vpop.xlane.xlu0 %1218  ;;  %v5392_v2 = vpop.eup %4680 }
 0x412   :  { %4690 = vpow2.f32 %v808_v41  ;;  %v1241_v47 = vsub.f32 %v5308_v5, %v1219_v22 }
 0x413   :  { %v814_v37 = vmul.f32 1.442695, %v788_v46 }
 0x414   :  { %v5394_v36 = vpop.eup %4682  ;;  %v1217_v19 = vpop.xlane.xlu1 %1216  ;;  %1284 = vadd.xlane.f32.xlu1 %v5392_v2  ;;  %v1266_v29 = vmul.f32 1.442695, %v1241_v47 }
 0x415   :  { %4692 = vpow2.f32 %v814_v37  ;;  %836 = vadd.xlane.f32.xlu0 %v5394_v36  ;;  %v765_v4 = vpop.xlane.xlu0 %764  ;;  %v1240_v53 = vsub.f32 %v5311_v6, %v1217_v19 }
 0x416   :  { %4694 = vpow2.f32 %v1262_v31  ;;  %v787_v30 = vsub.f32 %v5268_v43, %v765_v4 }
 0x417   :  { %v5400_v57 = vpop.eup %4684  ;;  %4696 = vpow2.f32 %v1260_v14  ;;  %v1264_v44 = vmul.f32 1.442695, %v1240_v53 }
 0x418   :  { %v5402_v59 = vpop.eup %4686  ;;  %v812_v60 = vmul.f32 1.442695, %v787_v30  ;;  %v771_v56 = vpop.xlane.xlu1 %770  ;;  %842 = vadd.xlane.f32.xlu1 %v5400_v57 }
 0x419   :  { %v790_v62 = vsub.f32 %v5278_v50, %v771_v56  ;;  %1290 = vadd.xlane.f32.xlu0 %v5402_v59  ;;  %v1223_v34 = vpop.xlane.xlu0 %1222  ;;  %v5408_v5 = vpop.eup %4688 }
 0x41a   :  { %4698 = vpow2.f32 %v812_v60  ;;  %v1243_v50 = vsub.f32 %v5314_v7, %v1223_v34 }
 0x41b   :  { %v818_v43 = vmul.f32 1.442695, %v790_v62 }
 0x41c   :  { %v5410_v33 = vpop.eup %4690  ;;  %v1221_v0 = vpop.xlane.xlu1 %1220  ;;  %1288 = vadd.xlane.f32.xlu1 %v5408_v5  ;;  %v1270_v19 = vmul.f32 1.442695, %v1243_v50 }
 0x41d   :  { %4700 = vpow2.f32 %v818_v43  ;;  %840 = vadd.xlane.f32.xlu0 %v5410_v33  ;;  %v769_v6 = vpop.xlane.xlu0 %768  ;;  %v1242_v22 = vsub.f32 %v5317_v8, %v1221_v0 }
 0x41e   :  { %4702 = vpow2.f32 %v1266_v29  ;;  %v789_v35 = vsub.f32 %v5272_v45, %v769_v6 }
 0x41f   :  { %v5416_v41 = vpop.eup %4692  ;;  %4704 = vpow2.f32 %v1264_v44  ;;  %v1268_v4 = vmul.f32 1.442695, %v1242_v22  ;;  %v428_v22 = vld [vmem:[%s6400_s10] sm:$0xff] }
 0x420   :  { %v5418_v27 = vpop.eup %4694  ;;  %v816_v63 = vmul.f32 1.442695, %v789_v35  ;;  %v775_v46 = vpop.xlane.xlu1 %774  ;;  %846 = vadd.xlane.f32.xlu1 %v5416_v41 }
 0x421   :  { %v792_v31 = vsub.f32 %v5282_v54, %v775_v46  ;;  %1294 = vadd.xlane.f32.xlu0 %v5418_v27  ;;  %v1227_v37 = vpop.xlane.xlu0 %1226  ;;  %v5424_v7 = vpop.eup %4696 }
 0x422   :  { %4706 = vpow2.f32 %v816_v63  ;;  %v1245_v54 = vsub.f32 %v5320_v9, %v1227_v37  ;;  %v429_v37 = vld [vmem:[%s6400_s10 + $0x8] sm:$0xff] }
 0x423   :  { %v822_v45 = vmul.f32 1.442695, %v792_v31 }
 0x424   :  { %v5426_v14 = vpop.eup %4698  ;;  %1292 = vadd.xlane.f32.xlu1 %v5424_v7  ;;  %v1274_v62 = vmul.f32 1.442695, %v1245_v54  ;;  %v1225_v31 = vpop.xlane.xlu1 %1224 }
 0x425   :  { %4708 = vpow2.f32 %v822_v45  ;;  %844 = vadd.xlane.f32.xlu0 %v5426_v14  ;;  %v773_v47 = vpop.xlane.xlu0 %772  ;;  %v1437_v45 = vld [vmem:[%s6401_s12] sm:$0xff] }
 0x426   :  { %4710 = vpow2.f32 %v1270_v19  ;;  %v791_v8 = vsub.f32 %v5276_v49, %v773_v47  ;;  %v1244_v19 = vsub.f32 %v5323_v10, %v1225_v31  ;;  %v1439_v47 = vld [vmem:[%s6401_s12 + $0x10] sm:$0xff] }
 0x427   :  { %v5432_v30 = vpop.eup %4700  ;;  %4712 = vpow2.f32 %v1268_v4  ;;  %v430_v10 = vld [vmem:[%s6400_s10 + $0x10] sm:$0xff] }
 0x428   :  { %v5434_v60 = vpop.eup %4702  ;;  %v820_v56 = vmul.f32 1.442695, %v791_v8  ;;  %850 = vadd.xlane.f32.xlu1 %v5432_v30  ;;  %v1272_v4 = vmul.f32 1.442695, %v1244_v19  ;;  %v1229_v8 = vpop.xlane.xlu1 %1228 }
 0x429   :  { %1298 = vadd.xlane.f32.xlu0 %v5434_v60  ;;  %v1231_v53 = vpop.xlane.xlu0 %1230  ;;  %v5438_v34 = vpop.eup %4704 }
 0x42a   :  { %4714 = vpow2.f32 %v820_v56  ;;  %v1247_v9 = vsub.f32 %v5326_v20, %v1231_v53  ;;  %v1246_v56 = vsub.f32 %v5329_v3, %v1229_v8 }
 0x42b   :  { %4716 = vpow2.f32 %v1274_v62 }
 0x42c   :  { %v5440_v29 = vpop.eup %4706  ;;  %1296 = vadd.xlane.f32.xlu1 %v5438_v34  ;;  %v1278_v50 = vmul.f32 1.442695, %v1247_v9  ;;  %v1276_v62 = vmul.f32 1.442695, %v1246_v56 }
 0x42d   :  { %848 = vadd.xlane.f32.xlu0 %v5440_v29  ;;  %v777_v49 = vpop.xlane.xlu0 %776 }
 0x42e   :  { %v793_v43 = vsub.f32 %v5280_v51, %v777_v49 }
 0x42f   :  { %v5446_v0 = vpop.eup %4708 }
 0x430   :  { %v5448_v44 = vpop.eup %4710  ;;  %v824_v6 = vmul.f32 1.442695, %v793_v43  ;;  %854 = vadd.xlane.f32.xlu1 %v5446_v0 }
 0x431   :  { %1302 = vadd.xlane.f32.xlu0 %v5448_v44  ;;  %v5452_v35 = vpop.eup %4712 }
 0x432   :  { %4718 = vpow2.f32 %v824_v6 }
 0x433   :  { %4720 = vpow2.f32 %v1278_v50 }
 0x434   :  { %v5454_v63 = vpop.eup %4714  ;;  %1300 = vadd.xlane.f32.xlu1 %v5452_v35  ;;  %4722 = vpow2.f32 %v1272_v4 }
 0x435   :  { %852 = vadd.xlane.f32.xlu0 %v5454_v63  ;;  %v5458_v51 = vpop.eup %4716 }
 0x439   :  { %1306 = vadd.xlane.f32.xlu0 %v5458_v51 }
 0x43c   :  { %v5461_v20 = vpop.eup %4718 }
 0x43d   :  { %856 = vadd.xlane.f32.xlu0 %v5461_v20  ;;  %v5464_v46 = vpop.eup %4720 }
 0x43e   :  { %v5480_v54 = vpop.eup %4722 }
 0x441   :  { %1310 = vadd.xlane.f32.xlu0 %v5464_v46 }
 0x445   :  { %434 = vperm.xlu1 %4606, %v428_v22  }
 0x452   :  { %v827_v53 = vpop.xlane.xlu1 %826 }
 0x453   :  { %4724 = vrcp.f32 %v827_v53 }
 0x454   :  { %4726 = vpow2.f32 %v1276_v62 }
 0x457   :  { %439 = vperm.xlu0 %4605, %v429_v37  }
 0x45b   :  { %1443 = vperm.xlu0 %4605, %v1437_v45  }
 0x45d   :  { %v4725_v31 = vpop.eup %4724 }
 0x45e   :  { %v5487_v37 = vpop.eup %4726  ;;  %v874_v4 = vmul.f32 %v4725_v31, %v5348_v58 }
 0x45f   :  { %1453 = vperm.xlu0 %4605, %v1439_v47  }
 0x469   :  { %1304 = vadd.xlane.f32.xlu1 %v5480_v54 }
 0x47a   :  { %444 = vperm.xlu1 %4606, %v430_v10  }
 0x491   :  { %v831_v49 = vpop.xlane.xlu1 %830 }
 0x492   :  { %v829_v9 = vpop.xlane.xlu0 %828 }
 0x493   :  { %4728 = vrcp.f32 %v829_v9 }
 0x495   :  { %v835_v43 = vpop.xlane.xlu1 %834 }
 0x496   :  { %v1283_v6 = vpop.xlane.xlu0 %1282 }
 0x497   :  { %4730 = vrcp.f32 %v1283_v6 }
 0x498   :  { %4732 = vrcp.f32 %v831_v49 }
 0x499   :  { %v1281_v50 = vpop.xlane.xlu1 %1280 }
 0x49a   :  { %4734 = vrcp.f32 %v1281_v50  ;;  %v833_v22 = vpop.xlane.xlu0 %832 }
 0x49b   :  { %4736 = vrcp.f32 %v833_v22 }
 0x49d   :  { %v4729_v19 = vpop.eup %4728  ;;  %v839_v3 = vpop.xlane.xlu1 %838 }
 0x49e   :  { %1308 = vadd.xlane.f32.xlu1 %v5487_v37  ;;  %v1287_v45 = vpop.xlane.xlu0 %1286  ;;  %v875_v47 = vmul.f32 %v4729_v19, %v5362_v21 }
 0x49f   :  { %4738 = vrcp.f32 %v1287_v45 }
 0x4a0   :  { %v4393_v10 = vpack.c.bf16 %v875_v47, %v874_v4  ;;  %4740 = vrcp.f32 %v835_v43 }
 0x4a1   :  { %v1285_v8 = vpop.xlane.xlu1 %1284  ;;  %v4731_v56 = vpop.eup %4730 }
 0x4a2   :  { %4742 = vrcp.f32 %v1285_v8  ;;  %4394 = vmatprep.subr.bf16.mxu1 %v4393_v10  ;;  %v837_v53 = vpop.xlane.xlu0 %836  ;;  %v4733_v62 = vpop.eup %4732  ;;  %v1329_v58 = vmul.f32 %v4731_v56, %v5370_v55 }
 0x4a3   :  { %4744 = vrcp.f32 %v837_v53  ;;  %4396 = vmatpush3.bf16.xpose.msra.mxu1 %v4393_v10  ;;  %v876_v21 = vmul.f32 %v4733_v62, %v5360_v42  ;;  %v431_v42 = vld [vmem:[%s6400_s10 + $0x18] sm:$0xff] }
 0x4a4   :  { %v4735_v49 = vpop.eup %4734 }
 0x4a5   :  { %v4737_v9 = vpop.eup %4736  ;;  %v843_v6 = vpop.xlane.xlu1 %842  ;;  %v1328_v50 = vmul.f32 %v4735_v49, %v5376_v61 }
 0x4a6   :  { %v1291_v22 = vpop.xlane.xlu0 %1290  ;;  %v877_v43 = vmul.f32 %v4737_v9, %v5378_v25 }
 0x4a7   :  { %v4433_v31 = vpack.c.bf16 %v1329_v58, %v1328_v50  ;;  %4746 = vrcp.f32 %v1291_v22  ;;  %v1438_v50 = vld [vmem:[%s6401_s12 + $0x8] sm:$0xff] }
 0x4a8   :  { %v4397_v19 = vpack.c.bf16 %v877_v43, %v876_v21  ;;  %4748 = vrcp.f32 %v839_v3 }
 0x4a9   :  { %v1289_v45 = vpop.xlane.xlu1 %1288  ;;  %4434 = vmatprep.subr.bf16.mxu0 %v4433_v31  ;;  %v4739_v4 = vpop.eup %4738 }
 0x4aa   :  { %4750 = vrcp.f32 %v1289_v45  ;;  %4398 = vmatprep.subr.bf16.mxu1 %v4397_v19  ;;  %4436 = vmatpush3.bf16.xpose.msra.mxu0 %v4433_v31  ;;  %v841_v47 = vpop.xlane.xlu0 %840  ;;  %v4741_v10 = vpop.eup %4740  ;;  %v1331_v3 = vmul.f32 %v4739_v4, %v5386_v1 }
 0x4ab   :  { %4752 = vrcp.f32 %v841_v47  ;;  %4400 = vmatpush3.bf16.xpose.msra.mxu1 %v4397_v19  ;;  %v878_v53 = vmul.f32 %v4741_v10, %v5368_v40 }
 0x4ac   :  { %v4743_v55 = vpop.eup %4742 }
 0x4ad   :  { %v4745_v61 = vpop.eup %4744  ;;  %v847_v25 = vpop.xlane.xlu1 %846  ;;  %v1330_v8 = vmul.f32 %v4743_v55, %v5392_v2 }
 0x4ae   :  { %v1295_v56 = vpop.xlane.xlu0 %1294  ;;  %v879_v62 = vmul.f32 %v4745_v61, %v5394_v36  ;;  %v1440_v36 = vld [vmem:[%s6401_s12 + $0x18] sm:$0xff] }
 0x4af   :  { %449 = vperm.xlu1 %4606, %v431_v42   ;;  %v4437_v49 = vpack.c.bf16 %v1331_v3, %v1330_v8  ;;  %4754 = vrcp.f32 %v1295_v56 }
 0x4b0   :  { %v4401_v9 = vpack.c.bf16 %v879_v62, %v878_v53  ;;  %4756 = vrcp.f32 %v843_v6 }
 0x4b1   :  { %v1293_v58 = vpop.xlane.xlu1 %1292  ;;  %4438 = vmatprep.subr.bf16.mxu0 %v4437_v49  ;;  %v4747_v22 = vpop.eup %4746 }
 0x4b2   :  { %4758 = vrcp.f32 %v1293_v58  ;;  %4402 = vmatprep.subr.bf16.mxu1 %v4401_v9  ;;  %4440 = vmatpush3.bf16.xpose.msra.mxu0 %v4437_v49  ;;  %v845_v1 = vpop.xlane.xlu0 %844  ;;  %v4749_v2 = vpop.eup %4748  ;;  %v1333_v31 = vmul.f32 %v4747_v22, %v5402_v59 }
 0x4b3   :  { %4760 = vrcp.f32 %v845_v1  ;;  %1448 = vperm.xlu1 %4606, %v1438_v50   ;;  %4404 = vmatpush3.bf16.xpose.msra.mxu1 %v4401_v9  ;;  %v880_v45 = vmul.f32 %v4749_v2, %v5384_v48 }
 0x4b4   :  { %v4751_v40 = vpop.eup %4750 }
 0x4b5   :  { %v4753_v21 = vpop.eup %4752  ;;  %v851_v43 = vpop.xlane.xlu1 %850  ;;  %v1332_v6 = vmul.f32 %v4751_v40, %v5408_v5 }
 0x4b6   :  { %v1299_v19 = vpop.xlane.xlu0 %1298  ;;  %v881_v4 = vmul.f32 %v4753_v21, %v5410_v33 }
 0x4b7   :  { %1458 = vperm.xlu1 %4606, %v1440_v36   ;;  %v4441_v47 = vpack.c.bf16 %v1333_v31, %v1332_v6  ;;  %4762 = vrcp.f32 %v1299_v19 }
 0x4b8   :  { %v4405_v10 = vpack.c.bf16 %v881_v4, %v880_v45  ;;  %4764 = vrcp.f32 %v847_v25 }
 0x4b9   :  { %v1297_v55 = vpop.xlane.xlu1 %1296  ;;  %4442 = vmatprep.subr.bf16.mxu0 %v4441_v47  ;;  %v4755_v42 = vpop.eup %4754 }
 0x4ba   :  { %4766 = vrcp.f32 %v1297_v55  ;;  %4406 = vmatprep.subr.bf16.mxu1 %v4405_v10  ;;  %4444 = vmatpush3.bf16.xpose.msra.mxu0 %v4441_v47  ;;  %v849_v61 = vpop.xlane.xlu0 %848  ;;  %v4757_v5 = vpop.eup %4756  ;;  %v1335_v3 = vmul.f32 %v4755_v42, %v5418_v27 }
 0x4bb   :  { %4768 = vrcp.f32 %v849_v61  ;;  %4408 = vmatpush3.bf16.xpose.msra.mxu1 %v4405_v10  ;;  %v882_v25 = vmul.f32 %v4757_v5, %v5400_v57 }
 0x4bc   :  { %v4759_v59 = vpop.eup %4758 }
 0x4bd   :  { %v4761_v8 = vpop.eup %4760  ;;  %v855_v48 = vpop.xlane.xlu1 %854  ;;  %v1334_v33 = vmul.f32 %v4759_v59, %v5424_v7 }
 0x4be   :  { %v1303_v56 = vpop.xlane.xlu0 %1302  ;;  %v883_v53 = vmul.f32 %v4761_v8, %v5426_v14 }
 0x4bf   :  { %v4445_v62 = vpack.c.bf16 %v1335_v3, %v1334_v33  ;;  %4770 = vrcp.f32 %v1303_v56 }
 0x4c0   :  { %v4409_v49 = vpack.c.bf16 %v883_v53, %v882_v25  ;;  %4772 = vrcp.f32 %v851_v43 }
 0x4c1   :  { %v1301_v9 = vpop.xlane.xlu1 %1300  ;;  %4446 = vmatprep.subr.bf16.mxu0 %v4445_v62  ;;  %v4763_v50 = vpop.eup %4762 }
 0x4c2   :  { %4774 = vrcp.f32 %v1301_v9  ;;  %4410 = vmatprep.subr.bf16.mxu1 %v4409_v49  ;;  %4448 = vmatpush3.bf16.xpose.msra.mxu0 %v4445_v62  ;;  %v853_v58 = vpop.xlane.xlu0 %852  ;;  %v4765_v22 = vpop.eup %4764  ;;  %v1337_v14 = vmul.f32 %v4763_v50, %v5434_v60 }
 0x4c3   :  { %4776 = vrcp.f32 %v853_v58  ;;  %4412 = vmatpush3.bf16.xpose.msra.mxu1 %v4409_v49  ;;  %v884_v21 = vmul.f32 %v4765_v22, %v5416_v41  ;;  %v1833_v49 = vld [vmem:[%s6402_s3] sm:$0xff]  ;;  %v5568_v58 = vadd.f32 %v5067_v26, %v5093_v39  ;;  %v5572_v22 = vadd.f32 %v5077_v32, %v5109_v52 }
 0x4c4   :  { %v4767_v27 = vpop.eup %4766  ;;  %4778 = vrcp.f32 %v855_v48 }
 0x4c5   :  { %v4769_v7 = vpop.eup %4768  ;;  %v5517_v1 = vpop.permute.xlu1 %434  ;;  %v1336_v57 = vmul.f32 %v4767_v27, %v5438_v34 }
 0x4c6   :  { %v1307_v2 = vpop.xlane.xlu0 %1306  ;;  %v503_v40 = vadd.f32 %v5203_v11, %v5517_v1  ;;  %v505_v36 = vadd.f32 %v5205_v12, %v5517_v1  ;;  %v885_v43 = vmul.f32 %v4769_v7, %v5440_v29  ;;  %v1835_v7 = vld [vmem:[%s6402_s3 + $0x10] sm:$0xff] }
 0x4c7   :  { %v4449_v6 = vpack.c.bf16 %v1337_v14, %v1336_v57  ;;  %v6478_v57 = vld [vmem:[#allocation18_spill] sm:$0xff] }
 0x4c8   :  { %4065 = vmatprep.mubr.f32.mxu1 %v503_v40  ;;  %4135 = vmatprep.mubr.f32.mxu0 %v505_v36  ;;  %v4413_v31 = vpack.c.bf16 %v885_v43, %v884_v21  ;;  %v4861_v40 = vld [vmem:[%s6466_s6 + $0x18] sm:$0xff]  }
 0x4c9   :  { %4450 = vmatprep.subr.bf16.mxu0 %v4449_v6  ;;  %v4771_v34 = vpop.eup %4770 }
 0x4ca   :  { %4414 = vmatprep.subr.bf16.mxu1 %v4413_v31  ;;  %4452 = vmatpush3.bf16.xpose.msra.mxu0 %v4449_v6  ;;  %v857_v60 = vpop.xlane.xlu0 %856  ;;  %v4773_v19 = vpop.eup %4772  ;;  %v1339_v41 = vmul.f32 %v4771_v34, %v5448_v44 }
 0x4cb   :  { %4780 = vrcp.f32 %v857_v60  ;;  %4416 = vmatpush3.bf16.xpose.msra.mxu1 %v4413_v31  ;;  %v886_v29 = vmul.f32 %v4773_v19, %v5432_v30 }
 0x4cc   :  { %v4775_v11 = vpop.eup %4774  ;;  %4782 = vrcp.f32 %v1307_v2  ;;  %v4858_v2 = vld [vmem:[%s6466_s6] sm:$0xff]  }
 0x4cd   :  { %v4777_v45 = vpop.eup %4776  ;;  %v1338_v12 = vmul.f32 %v4775_v11, %v5452_v35 }
 0x4ce   :  { %v887_v4 = vmul.f32 %v4777_v45, %v5454_v63  ;;  %v4779_v55 = vpop.eup %4778  ;;  %v1311_v35 = vpop.xlane.xlu0 %1310 }
 0x4cf   :  { %v4453_v47 = vpack.c.bf16 %v1339_v41, %v1338_v12  ;;  %v888_v61 = vmul.f32 %v4779_v55, %v5446_v0 }
 0x4d0   :  { %v4417_v10 = vpack.c.bf16 %v887_v4, %v886_v29  ;;  %v4650_v4 = vld [vmem:[%s6403_s11] sm:$0xff]  }
 0x4d1   :  { %4454 = vmatprep.subr.bf16.mxu0 %v4453_v47 }
 0x4d2   :  { %4418 = vmatprep.subr.bf16.mxu1 %v4417_v10  ;;  %4456 = vmatpush3.bf16.xpose.msra.mxu0 %v4453_v47 }
 0x4d3   :  { %4420 = vmatpush3.bf16.xpose.msra.mxu1 %v4417_v10  ;;  %v6479_v10 = vld [vmem:[#allocation10_spill] sm:$0xff] }
 0x4d5   :  { %v4781_v42 = vpop.eup %4780 }
 0x4d6   :  { %v889_v5 = vmul.f32 %v4781_v42, %v5461_v20  ;;  %v5533_v44 = vpop.permute.xlu0 %439  ;;  %v4783_v20 = vpop.eup %4782 }
 0x4d7   :  { %v507_v30 = vadd.f32 %v5207_v13, %v5533_v44  ;;  %v1341_v3 = vmul.f32 %v4783_v20, %v5458_v51  ;;  %v6477_v51 = vmov 0   ;;  %v509_v32 = vadd.f32 %v5209_v15, %v5533_v44  ;;  %v4859_v15 = vld [vmem:[%s6466_s6 + $0x8] sm:$0xff]  }
 0x4d8   :  { %v4421_v59 = vpack.c.bf16 %v889_v5, %v888_v61  ;;  %v6480_v5 = vld [vmem:[#allocation11_spill] sm:$0xff] }
 0x4da   :  { %4422 = vmatprep.subr.bf16.mxu1 %v4421_v59 }
 0x4db   :  { %4424 = vmatpush3.bf16.xpose.msra.mxu1 %v4421_v59 }
 0x4e2   :  { %4066 = vmatmul.mubr.f32.vlgmr.msra.gmra.mrb[20].mxu1 %v507_v30 }
 0x4f6   :  { %v1305_v63 = vpop.xlane.xlu1 %1304 }
 0x4f7   :  { %4784 = vrcp.f32 %v1305_v63  ;;  %v6482_v63 = vld [vmem:[#allocation13_spill] sm:$0xff] }
 0x4f8   :  { %4786 = vrcp.f32 %v1311_v35  ;;  %v6481_v35 = vld [vmem:[#allocation12_spill] sm:$0xff] }
 0x4fa   :  { %v5537_v8 = vpop.permute.xlu1 %444 }
 0x4fb   :  { %v513_v0 = vadd.f32 %v5211_v16, %v5537_v8  ;;  %v5549_v16 = vadd.f32 %v5069_v28, %v5063_v23  ;;  %v515_v39 = vadd.f32 %v5213_v17, %v5537_v8  ;;  %v4860_v17 = vld [vmem:[%s6466_s6 + $0x10] sm:$0xff]  }
 0x4fd   :  { %4068 = vmatprep.mubr.f32.mxu1 %v513_v0  ;;  %v1837_v50 = vadd.f32 %v1833_v49, %v5549_v16 }
 0x501   :  { %v4785_v48 = vpop.eup %4784 }
 0x502   :  { %v1340_v33 = vmul.f32 %v4785_v48, %v5480_v54  ;;  %v5553_v54 = vadd.f32 %v5091_v38, %v5065_v24  ;;  %v4787_v62 = vpop.eup %4786  ;;  %v4651_v48 = vld [vmem:[%s6403_s11 + $0x8] sm:$0xff]  }
 0x503   :  { %v1343_v24 = vmul.f32 %v4787_v62, %v5464_v46  ;;  %v1839_v46 = vadd.f32 %v1835_v7, %v5568_v58  ;;  %v5628_v7 = vpop.permute.xlu0 %1443 }
 0x504   :  { %v4457_v56 = vpack.c.bf16 %v1341_v3, %v1340_v33 }
 0x506   :  { %4458 = vmatprep.subr.bf16.mxu0 %v4457_v56 }
 0x507   :  { %4460 = vmatpush3.bf16.xpose.msra.mxu0 %v4457_v56  ;;  %v6483_v56 = vld [vmem:[#allocation16_spill] sm:$0xff] }
 0x52b   :  { %v1309_v13 = vpop.xlane.xlu1 %1308 }
 0x52c   :  { %4788 = vrcp.f32 %v1309_v13 }
 0x52f   :  { %v5543_v25 = vpop.permute.xlu1 %449 }
 0x530   :  { %v517_v53 = vadd.f32 %v5215_v18, %v5543_v25  ;;  %v1834_v18 = vld [vmem:[%s6402_s3 + $0x8] sm:$0xff]  ;;  %v519_v14 = vadd.f32 %v6478_v57, %v5543_v25  ;;  %v1554_v57 = vld [vmem:[%s6405_s14 + $0x20] sm:$0xff] }
 0x531   :  { %v1838_v23 = vadd.f32 %v1834_v18, %v5553_v54  ;;  %v6485_v18 = vld [vmem:[#allocation14_spill] sm:$0xff] }
 0x532   :  { %4069 = vmatmul.mubr.f32.gmra.mrb[22].mxu1 %v517_v53  ;;  %v6484_v53 = vld [vmem:[#allocation17_spill] sm:$0xff] }
 0x533   :  { %1509 = vmatprep.mubr.bf16.mxu1 %v6477_v51  ;;  %v1841_v27 = vpack.c.bf16 %v1838_v23, %v1837_v50  ;;  %v6486_v50 = vld [vmem:[#allocation15_spill] sm:$0xff] }
 0x536   :  { %v4789_v9 = vpop.eup %4788 }
 0x537   :  { %v1342_v28 = vmul.f32 %v4789_v9, %v5487_v37  ;;  %v1836_v37 = vld [vmem:[%s6402_s3 + $0x18] sm:$0xff] }
 0x538   :  { %v1840_v26 = vadd.f32 %v1836_v37, %v5572_v22  ;;  %v5630_v37 = vpop.permute.xlu1 %1448 }
 0x539   :  { %v4461_v38 = vpack.c.bf16 %v1343_v24, %v1342_v28 }
 0x53a   :  { %v1842_v52 = vpack.c.bf16 %v1840_v26, %v1839_v46  ;;  %v1550_v46 = vld [vmem:[%s6405_s14] sm:$0xff]  ;;  %v5635_v26 = vpop.permute.xlu0 %1453 }
 0x53b   :  { %4462 = vmatprep.subr.bf16.mxu0 %v4461_v38 }
 0x53c   :  { %4464 = vmatpush3.bf16.xpose.msra.mxu0 %v4461_v38 }
 0x53d   :  { %4141 = vmatprep.subr.bf16.mxu0 %v1841_v27 }
 0x543   :  { %4136 = vmatmul.mubr.f32.vlgmr.msra.gmra.mrb[48].mxu0 %v509_v32  ;;  %v1552_v32 = vld [vmem:[%s6405_s14 + $0x10] sm:$0xff] }
 0x544   :  { %4138 = vmatprep.mubr.f32.mxu0 %v515_v39  ;;  %4142 = vmatpush3.bf16.msra.mxu0 %v1841_v27  ;;  %v5640_v39 = vpop.permute.xlu1 %1458 }
 0x545   :  { %4143 = vmatprep.subr.bf16.mxu0 %v1842_v52 }
 0x547   :  { %4139 = vmatmul.mubr.f32.gmra.mrb[50].mxu0 %v519_v14 }
 0x548   :  { %4144 = vmatpush3.bf16.msra.mxu0 %v1842_v52  ;;  %4145 = vmatprep.mubr.msk.bf16.mxu0 %vm334_vm2, %v4858_v2  ;;  %v1556_v2 = vld [vmem:[%s6405_s14 + $0x30] sm:$0xff] }
 0x54b   :  { %4146 = vmatmul.mubr.msk.bf16.vlgmr.msra.gmra.mrb[52].mxu0 %vm334_vm2, %v4859_v15 }
 0x54c   :  { %4149 = vmatprep.mubr.msk.bf16.mxu0 %vm334_vm2, %v4860_v17 }
 0x553   :  { %4150 = vmatmul.mubr.msk.bf16.gmra.mrb[56].mxu0 %vm334_vm2, %v4861_v40 }
 0x5b5   :  { %v4067_v36 = vpop.f32.mrb[20].mxu1 }
 0x5b6   :  { %v956_v21 = vpop.f32.mrb[21].mxu1 }
 0x5b7   :  { %v1433_v43 = vpack.c.bf16 %v4067_v36, %v956_v21 }
 0x605   :  { %v4070_v6 = vpop.f32.mrb[22].mxu1 }
 0x606   :  { %v966_v31 = vpop.f32.mrb[23].mxu1 }
 0x607   :  { %v1435_v34 = vpack.c.bf16 %v4070_v6, %v966_v31 }
 0x616   :  { %v4137_v60 = vpop.f32.mrb[48].mxu0 }
 0x617   :  { %v1410_v19 = vpop.f32.mrb[49].mxu0 }
 0x618   :  { %v1434_v11 = vpack.c.bf16 %v4137_v60, %v1410_v19 }
 0x61a   :  { %v4140_v45 = vpop.f32.mrb[50].mxu0  ;;  %1477 = vmatprep.subr.bf16.mxu1 %v1434_v11 }
 0x61b   :  { %v1420_v12 = vpop.f32.mrb[51].mxu0  ;;  %1478 = vmatpush1.bf16.msra.mxu1 %v1433_v43 }
 0x61c   :  { %v1436_v41 = vpack.c.bf16 %v4140_v45, %v1420_v12  ;;  %v1553_v45 = vld [vmem:[%s6405_s14 + $0x18] sm:$0xff] }
 0x61e   :  { %1479 = vmatprep.subr.bf16.mxu1 %v1436_v41  ;;  %v4147_v29 = vpop.f32.mrb[52].mxu0  ;;  %v1555_v41 = vld [vmem:[%s6405_s14 + $0x28] sm:$0xff] }
 0x61f   :  { %1480 = vmatpush1.bf16.msra.mxu1 %v1435_v34  ;;  %v1877_v47 = vpop.f32.mrb[53].mxu0  ;;  %v1886_v30 = vadd.f32 %v4147_v29, %v6481_v35  ;;  %v1551_v34 = vld [vmem:[%s6405_s14 + $0x8] sm:$0xff] }
 0x620   :  { %v1878_v55 = vadd.f32 %v1877_v47, %v6479_v10  ;;  %v4148_v42 = vpop.f32.mrb[54].mxu0 }
 0x621   :  { %v1880_v61 = vpop.f32.mrb[55].mxu0  ;;  %v1889_v0 = vadd.f32 %v4148_v42, %v6482_v63 }
 0x622   :  { %v1881_v59 = vadd.f32 %v1880_v61, %v6480_v5  ;;  %2333 = vrot.lane.b32.xlu0 %v1878_v55, %s4872_s27  ;;  %3706 = vmatmul.mubr.msk.bf16.vlgmr.msra.gmra.mrb[24].mxu1 %vm334_vm2, %v4650_v4  ;;  %v1557_v4 = vld [vmem:[%s6405_s14 + $0x38] sm:$0xff]  ;;  %s4874_s14 = smov 1  }
 0x623   :  { %1519 = vmatprep.mubr.bf16.mxu1 %v6477_v51 }
 0x624   :  { %2335 = vrot.lane.b32.xlu1 %v1881_v59, %s4872_s27 }
 0x626   :  { %v4151_v20 = vpop.f32.mrb[56].mxu0  ;;  %2337 = vrot.lane.b32.xlu0 %v1886_v30, %s4872_s27 }
 0x627   :  { %v1893_v33 = vpop.f32.mrb[57].mxu0  ;;  %v1902_v13 = vadd.f32 %v4151_v20, %v6483_v56  ;;  %v6488_v56 = vld [vmem:[#allocation2_spill] sm:$0xff] }
 0x628   :  { %v4152_v3 = vpop.f32.mrb[58].mxu0  ;;  %2339 = vrot.lane.b32.xlu1 %v1889_v0, %s4872_s27  ;;  %v1894_v9 = vadd.f32 %v1893_v33, %v6485_v18  ;;  %v6487_v33 = vld [vmem:[#allocation4_spill] sm:$0xff] }
 0x629   :  { %v1905_v62 = vadd.f32 %v4152_v3, %v6484_v53  ;;  %v1896_v49 = vpop.f32.mrb[59].mxu0  ;;  %v6489_v53 = vld [vmem:[#allocation5_spill] sm:$0xff] }
 0x62a   :  { %v1897_v23 = vadd.f32 %v1896_v49, %v6486_v50  ;;  %3707 = vmatmul.mubr.msk.bf16.gmra.mrb[28].mxu1 %vm334_vm2, %v4651_v48  ;;  %v6490_v49 = vld [vmem:[#allocation3_spill] sm:$0xff] }
 0x62b   :  { %v4607_v28 = vpack.i.bf16 %v1905_v62, %v1902_v13  ;;  %v4469_v24 = vpack.c.bf16 %v1905_v62, %v1902_v13  ;;  %1662 = vmatprep.mubr.bf16.mxu1 %v6477_v51 }
 0x62c   :  { %v4612_v38 = vpack.i.bf16 %v1897_v23, %v1894_v9  ;;  %v4465_v27 = vpack.c.bf16 %v1897_v23, %v1894_v9 }
 0x62d   :  { %4608 = vrot.lane.b32.xlu1 %v4607_v28, %s4872_s27 }
 0x62e   :  { %4466 = vmatprep.subr.bf16.mxu0 %v4465_v27  ;;  %4613 = vrot.lane.b32.xlu0 %v4612_v38, %s4872_s27 }
 0x62f   :  { %4468 = vmatpush3.bf16.msra.mxu0 %v4465_v27 }
 0x630   :  { %4470 = vmatprep.subr.bf16.mxu0 %v4469_v24 }
 0x633   :  { %4472 = vmatpush3.bf16.msra.mxu0 %v4469_v24 }
 0x64c   :  { %1959 = vxpose.xlu0.b32.start [1/4] (short) (narrow) %v1878_v55, 64 }
 0x650   :  { %1960 = vxpose.xlu0.b32.cont [2/4] (short) (narrow) %v1881_v59, 64 }
 0x654   :  { %1961 = vxpose.xlu0.b32.cont [3/4] (short) (narrow) %v1886_v30, 64 }
 0x658   :  { %1962 = vxpose.xlu0.b32.end [4/4] (short) (narrow) %v1889_v0, 64 }
 0x691   :  { %1560 = vperm.xlu0 %4605, %v1550_v46  }
 0x694   :  { %v2334_v52 = vpop.permute.xlu0 %2333 }
 0x695   :  { %1570 = vperm.xlu0 %4605, %v1552_v32   ;;  %2345 = vxpose.xlu1.b32.start [1/4] (short) (narrow) %v2334_v52, 64 }
 0x696   :  { %v2336_v14 = vpop.permute.xlu1 %2335 }
 0x698   :  { %v2338_v15 = vpop.permute.xlu0 %2337 }
 0x699   :  { %1580 = vperm.xlu0 %4605, %v1554_v57   ;;  %2346 = vxpose.xlu1.b32.cont [2/4] (short) (narrow) %v2336_v14, 64  ;;  %v6491_v57 = vld [vmem:[#allocation8_spill] sm:$0xff] }
 0x69a   :  { %v2340_v17 = vpop.permute.xlu1 %2339 }
 0x69d   :  { %1590 = vperm.xlu0 %4605, %v1556_v2   ;;  %2347 = vxpose.xlu1.b32.cont [3/4] (short) (narrow) %v2338_v15, 64  ;;  %v6492_v2 = vld [vmem:[#allocation6_spill] sm:$0xff] }
 0x69f   :  { %v4609_v6 = vpop.permute.xlu1 %4608 }
 0x6a0   :  { %v4614_v40 = vpop.permute.xlu0 %4613  ;;  %v4611_v60 = vunpack.i.h.bf16 %v4609_v6  ;;  %v4610_v19 = vunpack.i.l.bf16 %v4609_v6 }
 0x6a1   :  { %v4616_v36 = vunpack.i.h.bf16 %v4614_v40  ;;  %v4615_v21 = vunpack.i.l.bf16 %v4614_v40  ;;  %2348 = vxpose.xlu1.b32.end [4/4] (short) (narrow) %v2340_v17, 64  ;;  %v6494_v17 = vld [vmem:[#allocation9_spill] sm:$0xff] }
 0x6a2   :  { %v4501_v12 = vpack.c.bf16 %v4611_v60, %v4610_v19  ;;  %v4654_v19 = vld [vmem:[%s6404_s13 + $0x10] sm:$0xff]  }
 0x6a3   :  { %v4497_v43 = vpack.c.bf16 %v4616_v36, %v4615_v21  ;;  %v6496_v36 = vld [vmem:[#allocation7_spill] sm:$0xff] }
 0x6a5   :  { %4498 = vmatprep.subr.bf16.mxu0 %v4497_v43 }
 0x6cc   :  { %v1975_v31 = vpop.trf.xlu0 }
 0x6cd   :  { %4169 = vmatprep.mubr.msk.f32.mxu0 %vm334_vm2, %v1975_v31  ;;  %v4652_v31 = vld [vmem:[%s6404_s13] sm:$0xff]  }
 0x6cf   :  { %1565 = vperm.xlu1 %4606, %v1551_v34   ;;  %v4653_v34 = vld [vmem:[%s6404_s13 + $0x8] sm:$0xff]  }
 0x6d0   :  { %v1976_v11 = vpop.trf.xlu0 }
 0x6d1   :  { %4170 = vmatmul.mubr.msk.f32.vlgmr.msra.gmra.mrb[60].mxu0 %vm334_vm2, %v1976_v11 }
 0x6d2   :  { %4500 = vmatpush3.bf16.msra.mxu0 %v4497_v43 }
 0x6d3   :  { %4502 = vmatprep.subr.bf16.mxu0 %v4501_v12  ;;  %1575 = vperm.xlu1 %4606, %v1553_v45  }
 0x6d4   :  { %v1977_v29 = vpop.trf.xlu0 }
 0x6d5   :  { %4172 = vmatprep.mubr.msk.f32.mxu0 %vm334_vm2, %v1977_v29 }
 0x6d6   :  { %4504 = vmatpush3.bf16.msra.mxu0 %v4501_v12  ;;  %v4655_v12 = vld [vmem:[%s6404_s13 + $0x18] sm:$0xff]  }
 0x6d7   :  { %1585 = vperm.xlu1 %4606, %v1555_v41  }
 0x6d8   :  { %v1978_v47 = vpop.trf.xlu0 }
 0x6d9   :  { %4173 = vmatmul.mubr.msk.f32.gmra.mrb[62].mxu0 %vm334_vm2, %v1978_v47 }
 0x6db   :  { %1595 = vperm.xlu1 %4606, %v1557_v4  }
 0x6dc   :  { %v1979_v10 = vpop.trf.xlu0 }
 0x6dd   :  { %4175 = vmatprep.mubr.msk.f32.mxu0 %vm334_vm2, %v1979_v10 }
 0x6e0   :  { %v1980_v55 = vpop.trf.xlu0 }
 0x6e1   :  { %4176 = vmatmul.mubr.msk.f32.gmra.mrb[64].mxu0 %vm334_vm2, %v1980_v55 }
 0x6e4   :  { %v1981_v42 = vpop.trf.xlu0 }
 0x6e5   :  { %4178 = vmatprep.mubr.msk.f32.mxu0 %vm334_vm2, %v1981_v42 }
 0x6e8   :  { %v1982_v61 = vpop.trf.xlu0 }
 0x6e9   :  { %4179 = vmatmul.mubr.msk.f32.gmra.mrb[66].mxu0 %vm334_vm2, %v1982_v61 }
 0x6f5   :  { %v1511_v5 = vpop.f32.mrb[24].mxu1 }
 0x6f6   :  { %v1513_v59 = vpop.f32.mrb[25].mxu1  ;;  %v1512_v63 = vadd.f32 %v1511_v5, %v5628_v7 }
 0x6f7   :  { %v1514_v35 = vadd.f32 %v1513_v59, %v5628_v7  ;;  %v1515_v30 = vpop.f32.mrb[26].mxu1 }
 0x6f8   :  { %v1516_v0 = vadd.f32 %v1515_v30, %v5630_v37  ;;  %v1517_v20 = vpop.f32.mrb[27].mxu1  ;;  %v5682_v18 = vadd.f32 %v1512_v63, %v6490_v49 }
 0x6f9   :  { %v1518_v48 = vadd.f32 %v1517_v20, %v5630_v37  ;;  %v5676_v13 = vadd.f32 %v1514_v35, %v6488_v56 }
 0x6fa   :  { %v5673_v3 = vadd.f32 %v1516_v0, %v6487_v33 }
 0x6fb   :  { %v5679_v62 = vadd.f32 %v1518_v48, %v6489_v53 }
 0x6fc   :  { %v1546_v23 = vpack.c.bf16 %v5673_v3, %v5682_v18 }
 0x6fd   :  { %v1521_v9 = vpop.f32.mrb[28].mxu1  ;;  %v1547_v50 = vpack.c.bf16 %v5679_v62, %v5676_v13 }
 0x6fe   :  { %v1523_v28 = vpop.f32.mrb[29].mxu1  ;;  %v1522_v27 = vadd.f32 %v1521_v9, %v5635_v26 }
 0x6ff   :  { %v1524_v24 = vadd.f32 %v1523_v28, %v5635_v26  ;;  %v1525_v38 = vpop.f32.mrb[30].mxu1  ;;  %1630 = vmatprep.subr.bf16.mxu1 %v1547_v50 }
 0x700   :  { %v1526_v46 = vadd.f32 %v1525_v38, %v5640_v39  ;;  %v1527_v32 = vpop.f32.mrb[31].mxu1  ;;  %1631 = vmatpush1.bf16.msra.mxu1 %v1546_v23  ;;  %v5702_v21 = vadd.f32 %v1522_v27, %v6496_v36 }
 0x701   :  { %v1528_v52 = vadd.f32 %v1527_v32, %v5640_v39  ;;  %v5696_v15 = vadd.f32 %v1524_v24, %v6492_v2 }
 0x702   :  { %v5693_v14 = vadd.f32 %v1526_v46, %v6491_v57 }
 0x703   :  { %6493 = vst [vmem:[#allocation18_spill] sm:$0xff] %v5696_v15  ;;  %v5699_v40 = vadd.f32 %v1528_v52, %v6494_v17 }
 0x704   :  { %v1548_v6 = vpack.c.bf16 %v5693_v14, %v5702_v21 }
 0x705   :  { %6495 = vst [vmem:[#allocation10_spill] sm:$0xff] %v5699_v40  ;;  %v1549_v43 = vpack.c.bf16 %v5699_v40, %v5696_v15 }
 0x707   :  { %1632 = vmatprep.subr.bf16.mxu1 %v1549_v43 }
 0x708   :  { %1633 = vmatpush1.bf16.msra.mxu1 %v1548_v6 }
 0x70b   :  { %3712 = vmatmul.mubr.msk.bf16.vlgmr.msra.gmra.mrb[32].mxu1 %vm334_vm2, %v4652_v31 }
 0x70c   :  { %1672 = vmatprep.mubr.bf16.mxu1 %v6477_v51 }
 0x710   :  { %v5752_v0 = vpop.permute.xlu0 %1560 }
 0x713   :  { %3713 = vmatmul.mubr.msk.bf16.gmra.mrb[36].mxu1 %vm334_vm2, %v4653_v34 }
 0x714   :  { %1682 = vmatprep.mubr.bf16.mxu1 %v6477_v51  ;;  %v5760_v32 = vpop.permute.xlu0 %1570 }
 0x715   :  { %v2361_v60 = vpop.trf.xlu1 }
 0x716   :  { %4211 = vmatprep.mubr.msk.f32.mxu0 %vm334_vm2, %v2361_v60 }
 0x719   :  { %v2362_v11 = vpop.trf.xlu1 }
 0x71a   :  { %4212 = vmatmul.mubr.msk.f32.vlgmr.msra.gmra.mrb[68].mxu0 %vm334_vm2, %v2362_v11 }
 0x71b   :  { %3714 = vmatmul.mubr.msk.bf16.gmra.mrb[40].mxu1 %vm334_vm2, %v4654_v19 }
 0x71c   :  { %1692 = vmatprep.mubr.bf16.mxu1 %v6477_v51 }
 0x71d   :  { %v2363_v45 = vpop.trf.xlu1 }
 0x71e   :  { %4214 = vmatprep.mubr.msk.f32.mxu0 %vm334_vm2, %v2363_v45 }
 0x721   :  { %v2364_v41 = vpop.trf.xlu1 }
 0x722   :  { %4215 = vmatmul.mubr.msk.f32.gmra.mrb[70].mxu0 %vm334_vm2, %v2364_v41  ;;  %v5768_v41 = vpop.permute.xlu0 %1580 }
 0x723   :  { %3715 = vmatmul.mubr.msk.bf16.gmra.mrb[44].mxu1 %vm334_vm2, %v4655_v12 }
 0x724   :  { %1804 = vmatprep.mubr.bf16.mxu1 %v6477_v51 }
 0x725   :  { %v2365_v29 = vpop.trf.xlu1 }
 0x726   :  { %4217 = vmatprep.mubr.msk.f32.mxu0 %vm334_vm2, %v2365_v29 }
 0x729   :  { %v2366_v4 = vpop.trf.xlu1 }
 0x72a   :  { %4218 = vmatmul.mubr.msk.f32.gmra.mrb[72].mxu0 %vm334_vm2, %v2366_v4 }
 0x72d   :  { %v2367_v47 = vpop.trf.xlu1 }
 0x72e   :  { %4220 = vmatprep.mubr.msk.f32.mxu0 %vm334_vm2, %v2367_v47 }
 0x731   :  { %v2368_v10 = vpop.trf.xlu1 }
 0x732   :  { %4221 = vmatmul.mubr.msk.f32.gmra.mrb[74].mxu0 %vm334_vm2, %v2368_v10 }
 0x74e   :  { %v5755_v56 = vpop.permute.xlu1 %1565 }
 0x752   :  { %v5763_v36 = vpop.permute.xlu1 %1575 }
 0x7a4   :  { %v5736_v55 = vpop.f32.mrb[60].mxu0 }
 0x7a5   :  { %v5738_v42 = vpop.f32.mrb[61].mxu0 }
 0x7ac   :  { %v5740_v61 = vpop.f32.mrb[62].mxu0 }
 0x7ad   :  { %v5742_v5 = vpop.f32.mrb[63].mxu0 }
 0x7b4   :  { %v5744_v59 = vpop.f32.mrb[64].mxu0 }
 0x7b5   :  { %v5746_v35 = vpop.f32.mrb[65].mxu0 }
 0x7bc   :  { %v5748_v30 = vpop.f32.mrb[66].mxu0 }
 0x7bd   :  { %v5750_v63 = vpop.f32.mrb[67].mxu0 }
 0x7de   :  { %v1664_v20 = vpop.f32.mrb[32].mxu1 }
 0x7df   :  { %v1665_v48 = vadd.f32 %v1664_v20, %v5752_v0  ;;  %v1666_v33 = vpop.f32.mrb[33].mxu1 }
 0x7e0   :  { %v1667_v53 = vadd.f32 %v1666_v33, %v5752_v0  ;;  %v1668_v49 = vpop.f32.mrb[34].mxu1 }
 0x7e1   :  { %v1669_v9 = vadd.f32 %v1668_v49, %v5755_v56  ;;  %v1670_v50 = vpop.f32.mrb[35].mxu1  ;;  %v1703_v28 = vmax.f32 %v1665_v48, 0.0 }
 0x7e2   :  { %v1671_v23 = vadd.f32 %v1670_v50, %v5755_v56  ;;  %v1704_v38 = vmax.f32 %v1667_v53, 0.0 }
 0x7e3   :  { %v1705_v24 = vmax.f32 %v1669_v9, 0.0  ;;  %v5779_v9 = vpop.permute.xlu1 %1585 }
 0x7e4   :  { %v1706_v27 = vmax.f32 %v1671_v23, 0.0 }
 0x7e5   :  { %v1723_v46 = vpack.c.bf16 %v1705_v24, %v1703_v28 }
 0x7e6   :  { %v1724_v52 = vpack.c.bf16 %v1706_v27, %v1704_v38  ;;  %v1674_v57 = vpop.f32.mrb[36].mxu1 }
 0x7e7   :  { %v1675_v2 = vadd.f32 %v1674_v57, %v5760_v32  ;;  %v1676_v17 = vpop.f32.mrb[37].mxu1 }
 0x7e8   :  { %v1677_v43 = vadd.f32 %v1676_v17, %v5760_v32  ;;  %v1678_v6 = vpop.f32.mrb[38].mxu1  ;;  %1772 = vmatprep.subr.bf16.mxu1 %v1724_v52 }
 0x7e9   :  { %v1679_v31 = vadd.f32 %v1678_v6, %v5763_v36  ;;  %v1680_v34 = vpop.f32.mrb[39].mxu1  ;;  %1773 = vmatpush1.bf16.msra.mxu1 %v1723_v46  ;;  %v1707_v19 = vmax.f32 %v1675_v2, 0.0  ;;  %v5784_v2 = vpop.permute.xlu0 %1590 }
 0x7ea   :  { %v1681_v60 = vadd.f32 %v1680_v34, %v5763_v36  ;;  %v1708_v45 = vmax.f32 %v1677_v43, 0.0 }
 0x7eb   :  { %v1709_v11 = vmax.f32 %v1679_v31, 0.0 }
 0x7ec   :  { %v1710_v12 = vmax.f32 %v1681_v60, 0.0 }
 0x7ed   :  { %v1725_v29 = vpack.c.bf16 %v1709_v11, %v1707_v19  ;;  %v5770_v4 = vpop.f32.mrb[68].mxu0 }
 0x7ee   :  { %v1726_v47 = vpack.c.bf16 %v1710_v12, %v1708_v45  ;;  %v1684_v10 = vpop.f32.mrb[40].mxu1  ;;  %v5772_v20 = vpop.f32.mrb[69].mxu0  ;;  %v2525_v48 = vsel %vm1765_vm3, %v5770_v4, -inf }
 0x7ef   :  { %v1685_v33 = vadd.f32 %v1684_v10, %v5768_v41  ;;  %v1686_v53 = vpop.f32.mrb[41].mxu1  ;;  %2526 = vmax.xlane.f32.xlu1 %v2525_v48  ;;  %v2522_v49 = vsel %vm1765_vm3, %v5772_v20, -inf  ;;  %v5793_v45 = vpop.permute.xlu1 %1595 }
 0x7f0   :  { %v1687_v50 = vadd.f32 %v1686_v53, %v5768_v41  ;;  %v1688_v23 = vpop.f32.mrb[42].mxu1  ;;  %1774 = vmatprep.subr.bf16.mxu1 %v1726_v47  ;;  %2523 = vmax.xlane.f32.xlu0 %v2522_v49 }
 0x7f1   :  { %v1689_v28 = vadd.f32 %v1688_v23, %v5779_v9  ;;  %v1690_v24 = vpop.f32.mrb[43].mxu1  ;;  %1775 = vmatpush1.bf16.msra.mxu1 %v1725_v29  ;;  %v1711_v27 = vmax.f32 %v1685_v33, 0.0 }
 0x7f2   :  { %v1691_v38 = vadd.f32 %v1690_v24, %v5779_v9  ;;  %v1712_v52 = vmax.f32 %v1687_v50, 0.0 }
 0x7f3   :  { %v1713_v46 = vmax.f32 %v1689_v28, 0.0 }
 0x7f4   :  { %v1714_v57 = vmax.f32 %v1691_v38, 0.0 }
 0x7f5   :  { %v1727_v17 = vpack.c.bf16 %v1713_v46, %v1711_v27  ;;  %v5786_v43 = vpop.f32.mrb[70].mxu0 }
 0x7f6   :  { %v1728_v6 = vpack.c.bf16 %v1714_v57, %v1712_v52  ;;  %v1694_v31 = vpop.f32.mrb[44].mxu1  ;;  %v5788_v34 = vpop.f32.mrb[71].mxu0  ;;  %v2531_v48 = vsel %vm1765_vm3, %v5786_v43, -inf  ;;  %v1908_v57 = vpack.c.bf16 %v5553_v54, %v5549_v16 }
 0x7f7   :  { %v1695_v60 = vadd.f32 %v1694_v31, %v5784_v2  ;;  %v1696_v19 = vpop.f32.mrb[45].mxu1  ;;  %v2528_v11 = vsel %vm1765_vm3, %v5788_v34, -inf }
 0x7f8   :  { %v1697_v12 = vadd.f32 %v1696_v19, %v5784_v2  ;;  %v1698_v29 = vpop.f32.mrb[46].mxu1  ;;  %1776 = vmatprep.subr.bf16.mxu1 %v1728_v6  ;;  %2529 = vmax.xlane.f32.xlu0 %v2528_v11  ;;  %v1909_v6 = vpack.c.bf16 %v5572_v22, %v5568_v58 }
 0x7f9   :  { %v1699_v47 = vadd.f32 %v1698_v29, %v5793_v45  ;;  %v1700_v10 = vpop.f32.mrb[47].mxu1  ;;  %1777 = vmatpush1.bf16.msra.mxu1 %v1727_v17  ;;  %v1715_v53 = vmax.f32 %v1695_v60, 0.0  ;;  %v5813_v17 = vld [vmem:[%s6406_s15] sm:$0xff]   ;;  %v2123_v29 = vsel %vm1765_vm3, %v5736_v55, -inf }
 0x7fa   :  { %v1701_v33 = vadd.f32 %v1700_v10, %v5793_v45  ;;  %v1716_v50 = vmax.f32 %v1697_v12, 0.0  ;;  %v4657_v12 = vld [vmem:[%s6406_s15 + $0x8] sm:$0xff]   ;;  %v4862_v10 = vld [vmem:[%s6467_s26] sm:$0xff]  }
 0x7fb   :  { %v1717_v49 = vmax.f32 %v1699_v47, 0.0  ;;  %v2120_v47 = vsel %vm1765_vm3, %v5738_v42, -inf }
 0x7fc   :  { %v1718_v23 = vmax.f32 %v1701_v33, 0.0  ;;  %2532 = vmax.xlane.f32.xlu0 %v2531_v48  ;;  %v2129_v48 = vsel %vm1765_vm3, %v5740_v61, -inf  ;;  %v2126_v33 = vsel %vm1765_vm3, %v5742_v5, -inf }
 0x7fd   :  { %v1729_v28 = vpack.c.bf16 %v1717_v49, %v1715_v53  ;;  %v5800_v24 = vpop.f32.mrb[72].mxu0  ;;  %v2135_v53 = vsel %vm1765_vm3, %v5744_v59, -inf  ;;  %v2132_v49 = vsel %vm1765_vm3, %v5746_v35, -inf }
 0x7fe   :  { %v1730_v38 = vpack.c.bf16 %v1718_v23, %v1716_v50  ;;  %v5802_v27 = vpop.f32.mrb[73].mxu0  ;;  %v2537_v46 = vsel %vm1765_vm3, %v5800_v24, -inf  ;;  %v4863_v50 = vld [vmem:[%s6467_s26 + $0x8] sm:$0xff]   ;;  %v2141_v23 = vsel %vm1765_vm3, %v5748_v30, -inf }
 0x7ff   :  { %v2534_v52 = vsel %vm1765_vm3, %v5802_v27, -inf }
 0x800   :  { %1778 = vmatprep.subr.bf16.mxu1 %v1730_v38  ;;  %2538 = vmax.xlane.f32.xlu0 %v2537_v46 }
 0x801   :  { %2535 = vmax.xlane.f32.xlu1 %v2534_v52  ;;  %1779 = vmatpush1.bf16.msra.mxu1 %v1729_v28  ;;  %v2138_v28 = vsel %vm1765_vm3, %v5750_v63, -inf }
 0x802   :  { %4153 = vmatprep.subr.bf16.mxu1 %v1908_v57 }
 0x804   :  { %3718 = vmatmul.mubr.msk.bf16.vlgmr.msra.gmra.mrb[48].mxu1 %vm1765_vm3, %v5813_v17 }
 0x805   :  { %4154 = vmatpush3.bf16.msra.mxu1 %v1908_v57  ;;  %v5819_v31 = vpop.f32.mrb[74].mxu0  ;;  %1814 = vmatprep.mubr.bf16.mxu1 %v6477_v51 }
 0x806   :  { %4155 = vmatprep.subr.bf16.mxu1 %v1909_v6  ;;  %v5822_v60 = vpop.f32.mrb[75].mxu0  ;;  %v2543_v19 = vsel %vm1765_vm3, %v5819_v31, -inf }
 0x807   :  { %2544 = vmax.xlane.f32.xlu0 %v2543_v19  ;;  %v2540_v11 = vsel %vm1765_vm3, %v5822_v60, -inf }
 0x808   :  { %2541 = vmax.xlane.f32.xlu1 %v2540_v11 }
 0x809   :  { %4156 = vmatpush3.bf16.msra.mxu1 %v1909_v6 }
 0x80b   :  { %2124 = vmax.xlane.f32.xlu0 %v2123_v29 }
 0x80c   :  { %3719 = vmatmul.mubr.msk.bf16.gmra.mrb[52].mxu1 %vm1765_vm3, %v4657_v12  ;;  %2121 = vmax.xlane.f32.xlu1 %v2120_v47 }
 0x80d   :  { %4157 = vmatprep.mubr.msk.bf16.mxu1 %vm334_vm2, %v4862_v10 }
 0x80f   :  { %2130 = vmax.xlane.f32.xlu0 %v2129_v48 }
 0x810   :  { %2127 = vmax.xlane.f32.xlu1 %v2126_v33 }
 0x813   :  { %2136 = vmax.xlane.f32.xlu0 %v2135_v53 }
 0x814   :  { %4158 = vmatmul.mubr.msk.bf16.vlgmr.msra.gmra.mrb[56].mxu1 %vm334_vm2, %v4863_v50  ;;  %2133 = vmax.xlane.f32.xlu1 %v2132_v49 }
 0x817   :  { %2142 = vmax.xlane.f32.xlu0 %v2141_v23 }
 0x818   :  { %2139 = vmax.xlane.f32.xlu1 %v2138_v28 }
 0x87c   :  { %v2527_v38 = vpop.xlane.xlu1 %2526 }
 0x87d   :  { %v2547_v46 = vsub.f32 %v5770_v4, %v2527_v38  ;;  %v2524_v57 = vpop.xlane.xlu0 %2523 }
 0x87e   :  { %v2546_v50 = vsub.f32 %v5772_v20, %v2524_v57 }
 0x87f   :  { %v2556_v52 = vmul.f32 1.442695, %v2547_v46 }
 0x881   :  { %4790 = vpow2.f32 %v2556_v52 }
 0x885   :  { %v2530_v6 = vpop.xlane.xlu0 %2529 }
 0x889   :  { %v2533_v19 = vpop.xlane.xlu0 %2532 }
 0x88a   :  { %v2549_v11 = vsub.f32 %v5786_v43, %v2533_v19 }
 0x88b   :  { %v5858_v12 = vpop.eup %4790 }
 0x88c   :  { %v2560_v29 = vmul.f32 1.442695, %v2549_v11  ;;  %v2573_v47 = vsel %vm1765_vm3, %v5858_v12, 0.0  ;;  %v2554_v11 = vmul.f32 1.442695, %v2546_v50 }
 0x88d   :  { %2574 = vadd.xlane.f32.xlu0 %v2573_v47  ;;  %v2539_v10 = vpop.xlane.xlu0 %2538 }
 0x88e   :  { %4792 = vpow2.f32 %v2560_v29  ;;  %v2536_v48 = vpop.xlane.xlu1 %2535  ;;  %v2551_v4 = vsub.f32 %v5800_v24, %v2539_v10  ;;  %v2548_v29 = vsub.f32 %v5788_v34, %v2530_v6 }
 0x890   :  { %v2564_v52 = vmul.f32 1.442695, %v2551_v4  ;;  %v2558_v10 = vmul.f32 1.442695, %v2548_v29  ;;  %v2550_v4 = vsub.f32 %v5802_v27, %v2536_v48 }
 0x894   :  { %v2545_v33 = vpop.xlane.xlu0 %2544 }
 0x895   :  { %v2542_v53 = vpop.xlane.xlu1 %2541 }
 0x898   :  { %v5863_v49 = vpop.eup %4792  ;;  %v2125_v23 = vpop.xlane.xlu0 %2124 }
 0x899   :  { %v2145_v43 = vsub.f32 %v5736_v55, %v2125_v23  ;;  %v2122_v28 = vpop.xlane.xlu1 %2121  ;;  %v2579_v38 = vsel %vm1765_vm3, %v5863_v49, 0.0 }
 0x89a   :  { %v2144_v46 = vsub.f32 %v5738_v42, %v2122_v28  ;;  %2580 = vadd.xlane.f32.xlu0 %v2579_v38  ;;  %v2553_v42 = vsub.f32 %v5819_v31, %v2545_v33  ;;  %v2552_v28 = vsub.f32 %v5822_v60, %v2542_v53 }
 0x89b   :  { %v2154_v19 = vmul.f32 1.442695, %v2145_v43  ;;  %v2562_v43 = vmul.f32 1.442695, %v2550_v4 }
 0x89c   :  { %v2152_v24 = vmul.f32 1.442695, %v2144_v46  ;;  %v5871_v47 = vpop.xlane.xlu0 %2130  ;;  %v2568_v6 = vmul.f32 1.442695, %v2553_v42  ;;  %v2566_v27 = vmul.f32 1.442695, %v2552_v28 }
 0x89d   :  { %4794 = vpow2.f32 %v2154_v19  ;;  %v2147_v20 = vsub.f32 %v5740_v61, %v5871_v47  ;;  %v2128_v55 = vpop.xlane.xlu1 %2127 }
 0x89e   :  { %4796 = vpow2.f32 %v2152_v24  ;;  %v2146_v57 = vsub.f32 %v5742_v5, %v2128_v55 }
 0x89f   :  { %4798 = vpow2.f32 %v2564_v52 }
 0x8a0   :  { %4800 = vpow2.f32 %v2554_v11  ;;  %v2156_v50 = vmul.f32 1.442695, %v2146_v57  ;;  %v2137_v38 = vpop.xlane.xlu0 %2136 }
 0x8a1   :  { %v2134_v34 = vpop.xlane.xlu1 %2133  ;;  %v2149_v5 = vsub.f32 %v5744_v59, %v2137_v38 }
 0x8a2   :  { %4802 = vpow2.f32 %v2156_v50  ;;  %v2148_v23 = vsub.f32 %v5746_v35, %v2134_v34 }
 0x8a3   :  { %4804 = vpow2.f32 %v2558_v10  ;;  %v2162_v53 = vmul.f32 1.442695, %v2149_v5 }
 0x8a4   :  { %4806 = vpow2.f32 %v2568_v6  ;;  %v2160_v31 = vmul.f32 1.442695, %v2148_v23 }
 0x8a5   :  { %4808 = vpow2.f32 %v2562_v43  ;;  %v2140_v61 = vpop.xlane.xlu1 %2139 }
 0x8a6   :  { %4810 = vpow2.f32 %v2160_v31 }
 0x8a7   :  { %v5880_v46 = vpop.eup %4794  ;;  %4812 = vpow2.f32 %v2566_v27 }
 0x8a8   :  { %v5883_v33 = vpop.eup %4796  ;;  %v2171_v48 = vsel %vm1765_vm3, %v5880_v46, 0.0  ;;  %4814 = vpow2.f32 %v2162_v53 }
 0x8a9   :  { %v5887_v52 = vpop.eup %4798  ;;  %2172 = vadd.xlane.f32.xlu0 %v2171_v48  ;;  %v2168_v35 = vsel %vm1765_vm3, %v5883_v33, 0.0 }
 0x8aa   :  { %v5891_v60 = vpop.eup %4800  ;;  %2169 = vadd.xlane.f32.xlu1 %v2168_v35  ;;  %v2585_v59 = vsel %vm1765_vm3, %v5887_v52, 0.0 }
 0x8ab   :  { %v2570_v11 = vsel %vm1765_vm3, %v5891_v60, 0.0 }
 0x8ac   :  { %v5895_v19 = vpop.eup %4802 }
 0x8ad   :  { %2586 = vadd.xlane.f32.xlu0 %v2585_v59  ;;  %v5899_v29 = vpop.eup %4804  ;;  %v2174_v24 = vsel %vm1765_vm3, %v5895_v19, 0.0 }
 0x8ae   :  { %2571 = vadd.xlane.f32.xlu1 %v2570_v11  ;;  %v5903_v55 = vpop.eup %4806  ;;  %v2576_v57 = vsel %vm1765_vm3, %v5899_v29, 0.0 }
 0x8af   :  { %v5907_v42 = vpop.eup %4808  ;;  %v2591_v10 = vsel %vm1765_vm3, %v5903_v55, 0.0 }
 0x8b0   :  { %v5911_v4 = vpop.eup %4810  ;;  %v2582_v50 = vsel %vm1765_vm3, %v5907_v42, 0.0 }
 0x8b1   :  { %2175 = vadd.xlane.f32.xlu0 %v2174_v24  ;;  %v5915_v34 = vpop.eup %4812  ;;  %v2180_v6 = vsel %vm1765_vm3, %v5911_v4, 0.0 }
 0x8b2   :  { %2577 = vadd.xlane.f32.xlu1 %v2576_v57  ;;  %v5919_v23 = vpop.eup %4814  ;;  %v2588_v43 = vsel %vm1765_vm3, %v5915_v34, 0.0 }
 0x8b3   :  { %v2183_v28 = vsel %vm1765_vm3, %v5919_v23, 0.0 }
 0x8b5   :  { %2592 = vadd.xlane.f32.xlu0 %v2591_v10 }
 0x8b6   :  { %2583 = vadd.xlane.f32.xlu1 %v2582_v50 }
 0x8b9   :  { %2181 = vadd.xlane.f32.xlu0 %v2180_v6 }
 0x8ba   :  { %2589 = vadd.xlane.f32.xlu1 %v2588_v43 }
 0x8bd   :  { %2184 = vadd.xlane.f32.xlu0 %v2183_v28 }
 0x8d7   :  { %v5925_v38 = vpop.f32.mrb[48].mxu1 }
 0x8d8   :  { %v5927_v5 = vpop.f32.mrb[49].mxu1 }
 0x8d9   :  { %v5929_v31 = vpop.f32.mrb[50].mxu1 }
 0x8da   :  { %v5931_v27 = vpop.f32.mrb[51].mxu1 }
 0x8df   :  { %v5933_v48 = vpop.f32.mrb[52].mxu1 }
 0x8e0   :  { %v5935_v35 = vpop.f32.mrb[53].mxu1 }
 0x8e1   :  { %v5937_v53 = vpop.f32.mrb[54].mxu1 }
 0x8e2   :  { %v5939_v59 = vpop.f32.mrb[55].mxu1 }
 0x8e7   :  { %v4159_v11 = vpop.f32.mrb[56].mxu1 }
 0x8e8   :  { %v5942_v24 = vadd.f32 %v4159_v11, %v5537_v8  ;;  %v1944_v57 = vpop.f32.mrb[57].mxu1  ;;  %v2143_v8 = vpop.xlane.xlu0 %2142 }
 0x8e9   :  { %v1945_v10 = vadd.f32 %v1944_v57, %v5517_v1  ;;  %v4160_v50 = vpop.f32.mrb[58].mxu1  ;;  %v2151_v28 = vsub.f32 %v5748_v30, %v2143_v8  ;;  %v2158_v1 = vmul.f32 1.442695, %v2147_v20  ;;  %v2150_v20 = vsub.f32 %v5750_v63, %v2140_v61 }
 0x8ea   :  { %v1947_v6 = vpop.f32.mrb[59].mxu1  ;;  %2614 = vrot.lane.b32.xlu1 %v5942_v24, %s4872_s27  ;;  %v5967_v30 = vadd.f32 %v4160_v50, %v5543_v25 }
 0x8eb   :  { %v5948_v43 = vadd.f32 %v1947_v6, %v5533_v44  ;;  %4197 = vmatprep.mubr.msk.f32.mxu1 %vm1765_vm3, %v1945_v10  ;;  %v2166_v11 = vmul.f32 1.442695, %v2151_v28  ;;  %v2164_v28 = vmul.f32 1.442695, %v2150_v20 }
 0x8ed   :  { %2612 = vrot.lane.b32.xlu0 %v5948_v43, %s4872_s27  ;;  %4816 = vpow2.f32 %v2166_v11 }
 0x8ee   :  { %2610 = vrot.lane.b32.xlu1 %v1945_v10, %s4872_s27  ;;  %4818 = vpow2.f32 %v2158_v1 }
 0x8f7   :  { %v5958_v57 = vpop.eup %4816 }
 0x8f8   :  { %v2189_v44 = vsel %vm1765_vm3, %v5958_v57, 0.0  ;;  %v5962_v6 = vpop.eup %4818 }
 0x8f9   :  { %v2177_v10 = vsel %vm1765_vm3, %v5962_v6, 0.0 }
 0x90c   :  { %2190 = vadd.xlane.f32.xlu0 %v2189_v44 }
 0x912   :  { %2178 = vadd.xlane.f32.xlu1 %v2177_v10 }
 0x91a   :  { %v2575_v47 = vpop.xlane.xlu0 %2574 }
 0x923   :  { %2616 = vrot.lane.b32.xlu1 %v5967_v30, %s4872_s27 }
 0x927   :  { %v2581_v8 = vpop.xlane.xlu0 %2580 }
 0x936   :  { %v2173_v11 = vpop.xlane.xlu0 %2172 }
 0x937   :  { %4820 = vrcp.f32 %v2173_v11  ;;  %v2170_v1 = vpop.xlane.xlu1 %2169 }
 0x938   :  { %4822 = vrcp.f32 %v2170_v1 }
 0x939   :  { %4824 = vpow2.f32 %v2164_v28 }
 0x93a   :  { %4826 = vrcp.f32 %v2575_v47  ;;  %v2587_v10 = vpop.xlane.xlu0 %2586  ;;  %v2947_v47 = vld [vmem:[%s6407_s4 + $0x28] sm:$0xff] }
 0x93b   :  { %v2572_v44 = vpop.xlane.xlu1 %2571 }
 0x93c   :  { %4828 = vrcp.f32 %v2572_v44 }
 0x93d   :  { %4830 = vrcp.f32 %v2581_v8 }
 0x93e   :  { %v2176_v63 = vpop.xlane.xlu0 %2175 }
 0x93f   :  { %v2578_v25 = vpop.xlane.xlu1 %2577 }
 0x940   :  { %4832 = vrcp.f32 %v2578_v25 }
 0x941   :  { %v4821_v50 = vpop.eup %4820  ;;  %4834 = vrcp.f32 %v2587_v10 }
 0x942   :  { %v4823_v51 = vpop.eup %4822  ;;  %v2201_v40 = vmul.f32 %v4821_v50, %v5880_v46  ;;  %v2593_v10 = vpop.xlane.xlu0 %2592 }
 0x943   :  { %v5973_v15 = vpop.eup %4824  ;;  %v2584_v61 = vpop.xlane.xlu1 %2583  ;;  %v2200_v20 = vmul.f32 %v4823_v51, %v5883_v33 }
 0x944   :  { %v4827_v11 = vpop.eup %4826  ;;  %4836 = vrcp.f32 %v2584_v61  ;;  %v2186_v46 = vsel %vm1765_vm3, %v5973_v15, 0.0 }
 0x945   :  { %v4473_v8 = vpack.c.bf16 %v2201_v40, %v2200_v20  ;;  %v2603_v33 = vmul.f32 %v4827_v11, %v5858_v12 }
 0x946   :  { %v4829_v28 = vpop.eup %4828 }
 0x947   :  { %2187 = vadd.xlane.f32.xlu1 %v2186_v46  ;;  %4475 = vmatprep.subr.msk.bf16.mxu1 %vm5978_vm4, %v4473_v8  ;;  %v2590_v1 = vpop.xlane.xlu1 %2589  ;;  %v2602_v51 = vmul.f32 %v4829_v28, %v5891_v60  ;;  %v4831_v44 = vpop.eup %4830 }
 0x948   :  { %4478 = vmatpush3.bf16.xpose.msk.msra.mxu1 %vm5978_vm4, %v4473_v8  ;;  %4838 = vrcp.f32 %v2590_v1  ;;  %v2605_v61 = vmul.f32 %v4831_v44, %v5863_v49 }
 0x949   :  { %v4505_v25 = vpack.c.bf16 %v2603_v33, %v2602_v51  ;;  %4840 = vrcp.f32 %v2593_v10 }
 0x94a   :  { %v4833_v40 = vpop.eup %4832  ;;  %4842 = vrcp.f32 %v2176_v63 }
 0x94b   :  { %4507 = vmatprep.subr.msk.bf16.mxu0 %vm5978_vm4, %v4505_v25  ;;  %v2604_v50 = vmul.f32 %v4833_v40, %v5899_v29  ;;  %v4835_v12 = vpop.eup %4834 }
 0x94c   :  { %4510 = vmatpush3.bf16.xpose.msk.msra.mxu0 %vm5978_vm4, %v4505_v25  ;;  %v2607_v8 = vmul.f32 %v4835_v12, %v5887_v52  ;;  %v2182_v52 = vpop.xlane.xlu0 %2181 }
 0x94d   :  { %v4511_v60 = vpack.c.bf16 %v2605_v61, %v2604_v50 }
 0x94e   :  { %v4837_v20 = vpop.eup %4836 }
 0x94f   :  { %4513 = vmatprep.subr.msk.bf16.mxu0 %vm5978_vm4, %v4511_v60  ;;  %v2606_v11 = vmul.f32 %v4837_v20, %v5907_v42 }
 0x950   :  { %v2185_v44 = vpop.xlane.xlu0 %2184 }
 0x951   :  { %v4517_v28 = vpack.c.bf16 %v2607_v8, %v2606_v11  ;;  %4844 = vrcp.f32 %v2185_v44  ;;  %v6088_v44 = vld [vmem:[%s6407_s4 + $0x68] sm:$0xff] }
 0x952   :  { %v4839_v46 = vpop.eup %4838  ;;  %4846 = vrcp.f32 %v2182_v52  ;;  %v6078_v52 = vld [vmem:[%s6407_s4 + $0x58] sm:$0xff] }
 0x953   :  { %v4841_v49 = vpop.eup %4840  ;;  %v2608_v29 = vmul.f32 %v4839_v46, %v5915_v34 }
 0x954   :  { %4516 = vmatpush3.bf16.xpose.msk.msra.mxu0 %vm5978_vm4, %v4511_v60  ;;  %v2609_v1 = vmul.f32 %v4841_v49, %v5903_v55  ;;  %v4843_v25 = vpop.eup %4842 }
 0x955   :  { %4519 = vmatprep.subr.msk.bf16.mxu0 %vm5978_vm4, %v4517_v28  ;;  %v2202_v12 = vmul.f32 %v4843_v25, %v5895_v19 }
 0x956   :  { %v4523_v51 = vpack.c.bf16 %v2609_v1, %v2608_v29 }
 0x95b   :  { %v4845_v40 = vpop.eup %4844 }
 0x95c   :  { %4522 = vmatpush3.bf16.xpose.msk.msra.mxu0 %vm5978_vm4, %v4517_v28  ;;  %v2615_v42 = vpop.permute.xlu1 %2614  ;;  %v4847_v50 = vpop.eup %4846  ;;  %v2205_v20 = vmul.f32 %v4845_v40, %v5919_v23 }
 0x95d   :  { %4525 = vmatprep.subr.msk.bf16.mxu0 %vm5978_vm4, %v4523_v51  ;;  %v2204_v63 = vmul.f32 %v4847_v50, %v5911_v4 }
 0x95f   :  { %v2613_v10 = vpop.permute.xlu0 %2612  ;;  %v4485_v8 = vpack.c.bf16 %v2205_v20, %v2204_v63  ;;  %v2948_v20 = vld [vmem:[%s6407_s4 + $0x30] sm:$0xff] }
 0x960   :  { %v2611_v33 = vpop.permute.xlu1 %2610 }
 0x961   :  { %4239 = vmatprep.mubr.msk.f32.mxu0 %vm1765_vm3, %v2611_v33  ;;  %v1732_v33 = vld [vmem:[%s6408_s16 + $0x8] sm:$0xff] }
 0x964   :  { %4528 = vmatpush3.bf16.xpose.msk.msra.mxu0 %vm5978_vm4, %v4523_v51  ;;  %v6064_v51 = vld [vmem:[%s6407_s4 + $0x38] sm:$0xff] }
 0x96b   :  { %4240 = vmatmul.mubr.msk.f32.vlgmr.msra.gmra.mrb[76].mxu0 %vm1765_vm3, %v2613_v10  ;;  %v1734_v10 = vld [vmem:[%s6408_s16 + $0x18] sm:$0xff] }
 0x96c   :  { %4242 = vmatprep.mubr.msk.f32.mxu0 %vm1765_vm3, %v2615_v42  ;;  %v6071_v42 = vld [vmem:[%s6407_s4 + $0x48] sm:$0xff] }
 0x999   :  { %v2191_v19 = vpop.xlane.xlu0 %2190 }
 0x99f   :  { %v2179_v55 = vpop.xlane.xlu1 %2178 }
 0x9a0   :  { %4848 = vrcp.f32 %v2179_v55  ;;  %v2944_v55 = vld [vmem:[%s6407_s4 + $0x10] sm:$0xff] }
 0x9a1   :  { %4850 = vrcp.f32 %v2191_v19 }
 0x9a3   :  { %v2617_v34 = vpop.permute.xlu1 %2616 }
 0x9a4   :  { %4243 = vmatmul.mubr.msk.f32.gmra.mrb[78].mxu0 %vm1765_vm3, %v2617_v34 }
 0x9aa   :  { %v4849_v61 = vpop.eup %4848 }
 0x9ab   :  { %v2203_v60 = vmul.f32 %v4849_v61, %v5962_v6  ;;  %v4851_v23 = vpop.eup %4850 }
 0x9ac   :  { %v2207_v46 = vmul.f32 %v4851_v23, %v5958_v57  ;;  %v3047_v23 = vsel %vm3043_vm5, %v2944_v55, 0.0 }
 0x9ad   :  { %v4479_v11 = vpack.c.bf16 %v2203_v60, %v2202_v12  ;;  %v2946_v12 = vld [vmem:[%s6407_s4 + $0x20] sm:$0xff] }
 0x9ae   :  { %v4537_v60 = vpack.c.bf16 %v2947_v47, %v2946_v12 }
 0x9af   :  { %4481 = vmatprep.subr.msk.bf16.mxu1 %vm5978_vm4, %v4479_v11 }
 0x9b0   :  { %4484 = vmatpush3.bf16.xpose.msk.msra.mxu1 %vm5978_vm4, %v4479_v11 }
 0x9b1   :  { %4487 = vmatprep.subr.msk.bf16.mxu1 %vm5978_vm4, %v4485_v8 }
 0x9b8   :  { %4490 = vmatpush3.bf16.xpose.msk.msra.mxu1 %vm5978_vm4, %v4485_v8  ;;  %v4541_v8 = vpack.c.bf16 %v6064_v51, %v2948_v20 }
 0x9d4   :  { %v2188_v6 = vpop.xlane.xlu1 %2187 }
 0x9d5   :  { %4852 = vrcp.f32 %v2188_v6  ;;  %v2950_v6 = vld [vmem:[%s6407_s4 + $0x40] sm:$0xff] }
 0x9df   :  { %v4853_v28 = vpop.eup %4852 }
 0x9e0   :  { %v2206_v4 = vmul.f32 %v4853_v28, %v5973_v15  ;;  %v4864_v15 = vld [vmem:[%s6403_s11] sm:$0xff]   ;;  %v4545_v28 = vpack.c.bf16 %v6071_v42, %v2950_v6 }
 0x9e2   :  { %v4491_v49 = vpack.c.bf16 %v2207_v46, %v2206_v4  ;;  %v2957_v4 = vld [vmem:[%s6407_s4 + $0x78] sm:$0xff] }
 0x9e4   :  { %4493 = vmatprep.subr.msk.bf16.mxu1 %vm5978_vm4, %v4491_v49 }
 0x9e5   :  { %4496 = vmatpush3.bf16.xpose.msk.msra.mxu1 %vm5978_vm4, %v4491_v49  ;;  %v2952_v49 = vld [vmem:[%s6407_s4 + $0x50] sm:$0xff] }
 0x9ec   :  { %4198 = vmatmul.mubr.msk.f32.vlgmr.msra.gmra.mrb[60].mxu1 %vm1765_vm3, %v5948_v43  ;;  %v2942_v43 = vld [vmem:[%s6407_s4] sm:$0xff] }
 0x9ed   :  { %4200 = vmatprep.mubr.msk.f32.mxu1 %vm1765_vm3, %v5942_v24  ;;  %v2943_v24 = vld [vmem:[%s6407_s4 + $0x8] sm:$0xff]  ;;  %v3044_v11 = vsel %vm3043_vm5, %v2942_v43, 0.0 }
 0x9ee   :  { %v4529_v25 = vpack.c.bf16 %v2943_v24, %v2942_v43  ;;  %v3045_v63 = vsel %vm3043_vm5, %v2943_v24, 0.0 }
 0x9ef   :  { %v3046_v19 = vadd.f32 %v3045_v63, %v3044_v11 }
 0x9f0   :  { %4201 = vmatmul.mubr.msk.f32.gmra.mrb[62].mxu1 %vm1765_vm3, %v5967_v30  ;;  %v2945_v30 = vld [vmem:[%s6407_s4 + $0x18] sm:$0xff]  ;;  %4530 = vmatprep.subr.bf16.mxu0 %v4529_v25 }
 0x9f1   :  { %4249 = vmatprep.mubr.msk.bf16.mxu1 %vm334_vm2, %v4864_v15  ;;  %v4533_v40 = vpack.c.bf16 %v2945_v30, %v2944_v55  ;;  %4532 = vmatpush3.bf16.msra.mxu0 %v4529_v25  ;;  %v3048_v46 = vadd.f32 %v3047_v23, %v3046_v19  ;;  %v3049_v15 = vsel %vm3043_vm5, %v2945_v30, 0.0  ;;  %v3055_v25 = vsel %vm3043_vm5, %v2948_v20, 0.0 }
 0x9f2   :  { %v3065_v19 = vsel %vm3043_vm5, %v6078_v52, 0.0 }
 0x9f3   :  { %4534 = vmatprep.subr.bf16.mxu0 %v4533_v40 }
 0x9f5   :  { %4536 = vmatpush3.bf16.msra.mxu0 %v4533_v40 }
 0x9f6   :  { %4538 = vmatprep.subr.bf16.mxu0 %v4537_v60 }
 0x9f9   :  { %4540 = vmatpush3.bf16.msra.mxu0 %v4537_v60  ;;  %v3059_v60 = vsel %vm3043_vm5, %v2950_v6, 0.0 }
 0x9fa   :  { %4542 = vmatprep.subr.bf16.mxu0 %v4541_v8 }
 0x9fd   :  { %4544 = vmatpush3.bf16.msra.mxu0 %v4541_v8  ;;  %v3063_v8 = vsel %vm3043_vm5, %v2952_v49, 0.0 }
 0x9fe   :  { %4546 = vmatprep.subr.bf16.mxu0 %v4545_v28 }
 0xa01   :  { %4548 = vmatpush3.bf16.msra.mxu0 %v4545_v28 }
 0xa3e   :  { %v4241_v57 = vpop.f32.mrb[76].mxu0 }
 0xa3f   :  { %v2716_v29 = vpop.f32.mrb[77].mxu0 }
 0xa40   :  { %v4617_v1 = vpack.i.bf16 %v4241_v57, %v2716_v29  ;;  %v4549_v57 = vpack.c.bf16 %v6078_v52, %v2952_v49  ;;  %v3050_v29 = vadd.f32 %v3049_v15, %v3048_v46 }
 0xa42   :  { %4618 = vrot.lane.b32.xlu1 %v4617_v1, %s4872_s27  ;;  %v2954_v1 = vld [vmem:[%s6407_s4 + $0x60] sm:$0xff]  ;;  %4550 = vmatprep.subr.bf16.mxu0 %v4549_v57 }
 0xa43   :  { %4552 = vmatpush3.bf16.msra.mxu0 %v4549_v57  ;;  %v3067_v28 = vsel %vm3043_vm5, %v2954_v1, 0.0 }
 0xa46   :  { %3107 = vrot.lane.b32.xlu1 %v2942_v43, %s4873_s24  ;;  %v3051_v43 = vsel %vm3043_vm5, %v2946_v12, 0.0 }
 0xa4a   :  { %3109 = vrot.lane.b32.xlu1 %v2943_v24, %s4873_s24  ;;  %v4553_v24 = vpack.c.bf16 %v6088_v44, %v2954_v1 }
 0xa4c   :  { %4554 = vmatprep.subr.bf16.mxu0 %v4553_v24 }
 0xa4d   :  { %4556 = vmatpush3.bf16.msra.mxu0 %v4553_v24 }
 0xa4e   :  { %3113 = vrot.lane.b32.xlu1 %v2945_v30, %s4873_s24  ;;  %v3053_v30 = vsel %vm3043_vm5, %v2947_v47, 0.0 }
 0xa52   :  { %3117 = vrot.lane.b32.xlu1 %v2947_v47, %s4873_s24  ;;  %v3057_v47 = vsel %vm3043_vm5, %v6064_v51, 0.0 }
 0xa56   :  { %3121 = vrot.lane.b32.xlu1 %v6064_v51, %s4873_s24 }
 0xa5a   :  { %3125 = vrot.lane.b32.xlu1 %v6071_v42, %s4873_s24 }
 0xa5e   :  { %3129 = vrot.lane.b32.xlu1 %v6078_v52, %s4873_s24 }
 0xa62   :  { %1742 = vperm.xlu1 %4606, %v1732_v33   ;;  %v3052_v33 = vadd.f32 %v3051_v43, %v3050_v29  ;;  %v3073_v43 = vsel %vm3043_vm5, %v2957_v4, 0.0 }
 0xa66   :  { %3133 = vrot.lane.b32.xlu1 %v6088_v44, %s4873_s24 }
 0xa6a   :  { %1752 = vperm.xlu1 %4606, %v1734_v10   ;;  %v1731_v10 = vld [vmem:[%s6408_s16] sm:$0xff] }
 0xa6e   :  { %3137 = vrot.lane.b32.xlu1 %v2957_v4, %s4873_s24 }
 0xa77   :  { %v4244_v34 = vpop.f32.mrb[78].mxu0 }
 0xa78   :  { %v2726_v50 = vpop.f32.mrb[79].mxu0 }
 0xa79   :  { %v4622_v61 = vpack.i.bf16 %v4244_v34, %v2726_v50  ;;  %v2956_v34 = vld [vmem:[%s6407_s4 + $0x70] sm:$0xff] }
 0xa7a   :  { %v4557_v40 = vpack.c.bf16 %v2957_v4, %v2956_v34  ;;  %v3071_v57 = vsel %vm3043_vm5, %v2956_v34, 0.0 }
 0xa7b   :  { %4623 = vrot.lane.b32.xlu0 %v4622_v61, %s4872_s27  ;;  %v1733_v61 = vld [vmem:[%s6408_s16 + $0x10] sm:$0xff] }
 0xa7c   :  { %4558 = vmatprep.subr.bf16.mxu0 %v4557_v40 }
 0xa7d   :  { %4560 = vmatpush3.bf16.msra.mxu0 %v4557_v40 }
 0xa7f   :  { %3111 = vrot.lane.b32.xlu0 %v2944_v55, %s4873_s24  ;;  %v3054_v55 = vadd.f32 %v3053_v30, %v3052_v33 }
 0xa81   :  { %v3056_v50 = vadd.f32 %v3055_v25, %v3054_v55 }
 0xa83   :  { %3115 = vrot.lane.b32.xlu0 %v2946_v12, %s4873_s24  ;;  %v3058_v12 = vadd.f32 %v3057_v47, %v3056_v50 }
 0xa85   :  { %v3060_v11 = vadd.f32 %v3059_v60, %v3058_v12 }
 0xa87   :  { %3119 = vrot.lane.b32.xlu0 %v2948_v20, %s4873_s24  ;;  %v3061_v20 = vsel %vm3043_vm5, %v6071_v42, 0.0 }
 0xa88   :  { %v3062_v63 = vadd.f32 %v3061_v20, %v3060_v11 }
 0xa8a   :  { %v3064_v51 = vadd.f32 %v3063_v8, %v3062_v63 }
 0xa8b   :  { %3123 = vrot.lane.b32.xlu0 %v2950_v6, %s4873_s24  ;;  %v3069_v6 = vsel %vm3043_vm5, %v6088_v44, 0.0 }
 0xa8c   :  { %v3066_v23 = vadd.f32 %v3065_v19, %v3064_v51 }
 0xa8e   :  { %v3068_v46 = vadd.f32 %v3067_v28, %v3066_v23 }
 0xa8f   :  { %3127 = vrot.lane.b32.xlu0 %v2952_v49, %s4873_s24 }
 0xa90   :  { %v3070_v15 = vadd.f32 %v3069_v6, %v3068_v46 }
 0xa92   :  { %v3072_v29 = vadd.f32 %v3071_v57, %v3070_v15 }
 0xa93   :  { %1737 = vperm.xlu0 %4605, %v1731_v10  }
 0xa94   :  { %v3074_v49 = vadd.f32 %v3073_v43, %v3072_v29 }
 0xa97   :  { %3131 = vrot.lane.b32.xlu0 %v2954_v1, %s4873_s24 }
 0xa9b   :  { %1747 = vperm.xlu0 %4605, %v1733_v61  }
 0xa9f   :  { %3135 = vrot.lane.b32.xlu0 %v2956_v34, %s4873_s24 }
 0xab4   :  { %v4619_v42 = vpop.permute.xlu1 %4618 }
 0xab5   :  { %v4621_v10 = vunpack.i.h.bf16 %v4619_v42  ;;  %v4620_v44 = vunpack.i.l.bf16 %v4619_v42 }
 0xab8   :  { %v3108_v24 = vpop.permute.xlu1 %3107 }
 0xab9   :  { %v3240_v33 = vsel %vm3043_vm5, %v3108_v24, 0.0 }
 0xabc   :  { %v3110_v30 = vpop.permute.xlu1 %3109 }
 0xabd   :  { %v6159_v52 = vpack.c.bf16 %v3110_v30, %v3108_v24  ;;  %v3241_v1 = vsel %vm3043_vm5, %v3110_v30, 0.0 }
 0xabe   :  { %v3242_v55 = vadd.f32 %v3241_v1, %v3240_v33  ;;  %3075 = vadd.xlane.f32.xlu0 %v3074_v49  ;;  %v4865_v33 = vld [vmem:[%s6403_s11 + $0x8] sm:$0xff]   ;;  %v4866_v1 = vld [vmem:[%s6404_s13] sm:$0xff]  }
 0xabf   :  { %v4199_v25 = vpop.f32.mrb[60].mxu1 }
 0xac0   :  { %v2752_v34 = vsel %vm1765_vm3, %v4199_v25, %v4621_v10  ;;  %v2310_v40 = vpop.f32.mrb[61].mxu1  ;;  %v3114_v12 = vpop.permute.xlu1 %3113 }
 0xac1   :  { %v2751_v50 = vsel %vm1765_vm3, %v2310_v40, %v4620_v44  ;;  %v3245_v28 = vsel %vm3043_vm5, %v3114_v12, 0.0 }
 0xac2   :  { %v2755_v4 = vpack.c.bf16 %v2752_v34, %v2751_v50 }
 0xac3   :  { %v4202_v47 = vpop.f32.mrb[62].mxu1 }
 0xac4   :  { %v2320_v61 = vpop.f32.mrb[63].mxu1  ;;  %4245 = vmatprep.subr.bf16.mxu1 %v2755_v4  ;;  %v3118_v63 = vpop.permute.xlu1 %3117 }
 0xac5   :  { %4246 = vmatpush3.bf16.msra.mxu1 %v2755_v4  ;;  %v3249_v43 = vsel %vm3043_vm5, %v3118_v63, 0.0 }
 0xac8   :  { %v3122_v57 = vpop.permute.xlu1 %3121 }
 0xac9   :  { %v3253_v44 = vsel %vm3043_vm5, %v3122_v57, 0.0 }
 0xacc   :  { %v3126_v40 = vpop.permute.xlu1 %3125 }
 0xaed   :  { %v4624_v60 = vpop.permute.xlu0 %4623 }
 0xaee   :  { %v4626_v11 = vunpack.i.h.bf16 %v4624_v60  ;;  %v4625_v20 = vunpack.i.l.bf16 %v4624_v60 }
 0xaf0   :  { %v2753_v8 = vsel %vm1765_vm3, %v2320_v61, %v4625_v20  ;;  %v2754_v51 = vsel %vm1765_vm3, %v4202_v47, %v4626_v11  ;;  %v3257_v61 = vsel %vm3043_vm5, %v3126_v40, 0.0  ;;  %v3130_v20 = vpop.permute.xlu1 %3129 }
 0xaf1   :  { %v2756_v19 = vpack.c.bf16 %v2754_v51, %v2753_v8  ;;  %v3112_v23 = vpop.permute.xlu0 %3111  ;;  %v3261_v51 = vsel %vm3043_vm5, %v3130_v20, 0.0 }
 0xaf2   :  { %v6167_v46 = vpack.c.bf16 %v3114_v12, %v3112_v23  ;;  %v3243_v6 = vsel %vm3043_vm5, %v3112_v23, 0.0 }
 0xaf3   :  { %4247 = vmatprep.subr.bf16.mxu1 %v2756_v19  ;;  %v3244_v15 = vadd.f32 %v3243_v6, %v3242_v55 }
 0xaf4   :  { %4248 = vmatpush3.bf16.msra.mxu1 %v2756_v19 }
 0xaf5   :  { %v3116_v42 = vpop.permute.xlu0 %3115  ;;  %v3246_v29 = vadd.f32 %v3245_v28, %v3244_v15  ;;  %v6194_v15 = vpop.permute.xlu1 %1742 }
 0xaf6   :  { %v6171_v24 = vpack.c.bf16 %v3118_v63, %v3116_v42  ;;  %v3247_v49 = vsel %vm3043_vm5, %v3116_v42, 0.0  ;;  %v1811_v42 = vadd.f32 %v5929_v31, %v6194_v15 }
 0xaf7   :  { %4250 = vmatmul.mubr.msk.bf16.vlgmr.msra.gmra.mrb[64].mxu1 %vm334_vm2, %v4865_v33  ;;  %v3248_v30 = vadd.f32 %v3247_v49, %v3246_v29 }
 0xaf8   :  { %4257 = vmatprep.mubr.msk.bf16.mxu1 %vm334_vm2, %v4866_v1  ;;  %v1827_v33 = vadd.f32 %v1811_v42, %v5673_v3 }
 0xaf9   :  { %v3120_v10 = vpop.permute.xlu0 %3119  ;;  %v3250_v55 = vadd.f32 %v3249_v43, %v3248_v30 }
 0xafa   :  { %v6183_v25 = vpack.c.bf16 %v3122_v57, %v3120_v10  ;;  %v3251_v34 = vsel %vm3043_vm5, %v3120_v10, 0.0  ;;  %v3134_v57 = vpop.permute.xlu1 %3133 }
 0xafb   :  { %v3252_v50 = vadd.f32 %v3251_v34, %v3250_v55  ;;  %v3265_v1 = vsel %vm3043_vm5, %v3134_v57, 0.0 }
 0xafd   :  { %v3124_v4 = vpop.permute.xlu0 %3123  ;;  %v3254_v47 = vadd.f32 %v3253_v44, %v3252_v50 }
 0xafe   :  { %v6187_v12 = vpack.c.bf16 %v3126_v40, %v3124_v4  ;;  %v3255_v60 = vsel %vm3043_vm5, %v3124_v4, 0.0  ;;  %v6205_v10 = vpop.permute.xlu1 %1752 }
 0xaff   :  { %v3256_v11 = vadd.f32 %v3255_v60, %v3254_v47  ;;  %v1821_v34 = vadd.f32 %v5937_v53, %v6205_v10 }
 0xb01   :  { %v3128_v63 = vpop.permute.xlu0 %3127  ;;  %v3258_v8 = vadd.f32 %v3257_v61, %v3256_v11  ;;  %v1831_v50 = vadd.f32 %v1821_v34, %v5693_v14 }
 0xb02   :  { %v6191_v19 = vpack.c.bf16 %v3130_v20, %v3128_v63  ;;  %v3259_v23 = vsel %vm3043_vm5, %v3128_v63, 0.0 }
 0xb03   :  { %v3260_v28 = vadd.f32 %v3259_v23, %v3258_v8 }
 0xb05   :  { %v3262_v6 = vadd.f32 %v3261_v51, %v3260_v28 }
 0xb12   :  { %v6198_v29 = vpop.permute.xlu0 %1737 }
 0xb13   :  { %v1807_v43 = vadd.f32 %v5925_v38, %v6198_v29 }
 0xb15   :  { %v1825_v49 = vadd.f32 %v1807_v43, %v5682_v18 }
 0xb16   :  { %v3132_v30 = vpop.permute.xlu0 %3131 }
 0xb17   :  { %v6207_v55 = vpack.c.bf16 %v3134_v57, %v3132_v30  ;;  %v3263_v44 = vsel %vm3043_vm5, %v3132_v30, 0.0  ;;  %4309 = vmatprep.mubr.f32.mxu0 %v1825_v49 }
 0xb18   :  { %v3264_v31 = vadd.f32 %v3263_v44, %v3262_v6  ;;  %4310 = vmatmul.mubr.f32.vlgmr.msra.gmra.mrb[80].mxu0 %v1827_v33  ;;  %v6264_v44 = vpop.permute.xlu1 %3137 }
 0xb1a   :  { %v6212_v38 = vpop.permute.xlu0 %1747  ;;  %v3266_v18 = vadd.f32 %v3265_v1, %v3264_v31  ;;  %v3269_v31 = vsel %vm3043_vm5, %v6264_v44, 0.0 }
 0xb1b   :  { %v1817_v3 = vadd.f32 %v5933_v48, %v6212_v38 }
 0xb1d   :  { %v1829_v40 = vadd.f32 %v1817_v3, %v5702_v21 }
 0xb1e   :  { %v6218_v4 = vpop.permute.xlu0 %3135 }
 0xb1f   :  { %4312 = vmatprep.mubr.f32.mxu0 %v1829_v40  ;;  %v3267_v30 = vsel %vm3043_vm5, %v6218_v4, 0.0 }
 0xb20   :  { %4313 = vmatmul.mubr.f32.gmra.mrb[82].mxu0 %v1831_v50  ;;  %v3268_v1 = vadd.f32 %v3267_v30, %v3266_v18 }
 0xb22   :  { %v3270_v34 = vadd.f32 %v3269_v31, %v3268_v1  ;;  %v6499_v31 = vld [vmem:[#allocation18_spill] sm:$0xff] }
 0xb24   :  { %3271 = vadd.xlane.f32.xlu1 %v3270_v34 }
 0xb4b   :  { %v3076_v47 = vpop.xlane.xlu0 %3075 }
 0xb4c   :  { %v3077_v61 = vrot.slane %v3076_v47, 4 }
 0xb4e   :  { %v3078_v60 = vadd.f32 %v3077_v61, %v3076_v47 }
 0xb50   :  { %v3079_v11 = vrot.slane %v3078_v60, 2 }
 0xb52   :  { %v3080_v20 = vadd.f32 %v3079_v11, %v3078_v60 }
 0xb54   :  { %v3081_v53 = vrot.slane %v3080_v20, 1 }
 0xb56   :  { %v3082_v63 = vadd.f32 %v3081_v53, %v3080_v20 }
 0xb58   :  { %4594 = vpush %v3082_v63 }
 0xbca   :  { %v4251_v8 = vpop.f32.mrb[64].mxu1 }
 0xbcb   :  { %v2791_v51 = vpop.f32.mrb[65].mxu1  ;;  %v2800_v28 = vadd.f32 %v4251_v8, %v5635_v26 }
 0xbcc   :  { %v2792_v48 = vadd.f32 %v2791_v51, %v5628_v7  ;;  %v4252_v23 = vpop.f32.mrb[66].mxu1 }
 0xbcd   :  { %v2803_v21 = vadd.f32 %v4252_v23, %v5640_v39  ;;  %v2794_v14 = vpop.f32.mrb[67].mxu1  ;;  %v6234_v49 = vadd.f32 %v2800_v28, %v5568_v58  ;;  %v4869_v58 = vld [vmem:[%s6404_s13 + $0x18] sm:$0xff]  }
 0xbce   :  { %v2795_v6 = vadd.f32 %v2794_v14, %v5630_v37  ;;  %v6225_v57 = vadd.f32 %v2792_v48, %v5549_v16  ;;  %v4867_v16 = vld [vmem:[%s6404_s13 + $0x8] sm:$0xff]  }
 0xbcf   :  { %v6228_v42 = vadd.f32 %v2803_v21, %v5572_v22 }
 0xbd0   :  { %v6231_v43 = vadd.f32 %v2795_v6, %v5553_v54  ;;  %v4868_v54 = vld [vmem:[%s6404_s13 + $0x10] sm:$0xff]  }
 0xbd1   :  { %v2811_v26 = vpack.c.bf16 %v6228_v42, %v6234_v49 }
 0xbd2   :  { %v2810_v7 = vpack.c.bf16 %v6231_v43, %v6225_v57 }
 0xbd4   :  { %4253 = vmatprep.subr.bf16.mxu1 %v2810_v7 }
 0xbd5   :  { %4254 = vmatpush3.bf16.msra.mxu1 %v2810_v7 }
 0xbd6   :  { %4255 = vmatprep.subr.bf16.mxu1 %v2811_v26 }
 0xbd9   :  { %4256 = vmatpush3.bf16.msra.mxu1 %v2811_v26 }
 0xbdc   :  { %4258 = vmatmul.mubr.msk.bf16.vlgmr.msra.gmra.mrb[68].mxu1 %vm334_vm2, %v4867_v16 }
 0xbdd   :  { %4261 = vmatprep.mubr.msk.bf16.mxu1 %vm334_vm2, %v4868_v54 }
 0xbe4   :  { %4262 = vmatmul.mubr.msk.bf16.gmra.mrb[72].mxu1 %vm334_vm2, %v4869_v58 }
 0xbe5   :  { %4273 = vmatprep.mubr.msk.bf16.mxu1 %vm1765_vm3, %v5813_v17 }
 0xbeb   :  { %v6254_v22 = vpop.f32.mrb[80].mxu0 }
 0xbec   :  { %v6256_v37 = vpop.f32.mrb[81].mxu0 }
 0xbf3   :  { %v6258_v39 = vpop.f32.mrb[82].mxu0 }
 0xbf4   :  { %v6260_v33 = vpop.f32.mrb[83].mxu0 }
 0xcaf   :  { %v4259_v17 = vpop.f32.mrb[68].mxu1 }
 0xcb0   :  { %v2855_v3 = vadd.f32 %v4259_v17, %v5760_v32  ;;  %v2846_v40 = vpop.f32.mrb[69].mxu1 }
 0xcb1   :  { %v2847_v50 = vadd.f32 %v2846_v40, %v5752_v0  ;;  %v4260_v47 = vpop.f32.mrb[70].mxu1 }
 0xcb2   :  { %v2858_v61 = vadd.f32 %v4260_v47, %v5763_v36  ;;  %v2849_v60 = vpop.f32.mrb[71].mxu1  ;;  %v2879_v18 = vmax.f32 %v2855_v3, 0.0 }
 0xcb3   :  { %v2850_v11 = vadd.f32 %v2849_v60, %v5755_v56  ;;  %v2877_v53 = vmax.f32 %v2847_v50, 0.0 }
 0xcb4   :  { %v2880_v20 = vmax.f32 %v2858_v61, 0.0 }
 0xcb5   :  { %v2878_v63 = vmax.f32 %v2850_v11, 0.0 }
 0xcb6   :  { %v2886_v8 = vpack.c.bf16 %v2880_v20, %v2879_v18 }
 0xcb7   :  { %v2885_v51 = vpack.c.bf16 %v2878_v63, %v2877_v53  ;;  %v4263_v48 = vpop.f32.mrb[72].mxu1 }
 0xcb8   :  { %v2871_v23 = vadd.f32 %v4263_v48, %v5784_v2  ;;  %v2862_v21 = vpop.f32.mrb[73].mxu1 }
 0xcb9   :  { %v2863_v32 = vadd.f32 %v2862_v21, %v5768_v41  ;;  %v4264_v14 = vpop.f32.mrb[74].mxu1  ;;  %4265 = vmatprep.subr.bf16.mxu1 %v2885_v51  ;;  %v1809_v41 = vadd.f32 %v5927_v5, %v6198_v29  ;;  %v3314_v21 = vld [vmem:[%s6410_s18 + $0x8] sm:$0xff] }
 0xcba   :  { %v2874_v0 = vadd.f32 %v4264_v14, %v5793_v45  ;;  %v2865_v36 = vpop.f32.mrb[75].mxu1  ;;  %4266 = vmatpush3.bf16.msra.mxu1 %v2885_v51  ;;  %v2883_v28 = vmax.f32 %v2871_v23, 0.0  ;;  %v3313_v51 = vld [vmem:[%s6410_s18] sm:$0xff]  ;;  %v3315_v23 = vld [vmem:[%s6410_s18 + $0x10] sm:$0xff]  ;;  %v3316_v14 = vld [vmem:[%s6410_s18 + $0x18] sm:$0xff] }
 0xcbb   :  { %v2866_v56 = vadd.f32 %v2865_v36, %v5779_v9  ;;  %4267 = vmatprep.subr.bf16.mxu1 %v2886_v8  ;;  %v2881_v7 = vmax.f32 %v2863_v32, 0.0  ;;  %v1826_v2 = vadd.f32 %v1809_v41, %v5676_v13  ;;  %v4870_v9 = vld [vmem:[%s6406_s15 + $0x8] sm:$0xff]   ;;  %v3272_v13 = vpop.xlane.xlu1 %3271  ;;  %s6320_s15 = spop %4594  ;;  %v3408_v32 = vld [vmem:[%s6412_s20] sm:$0xff]  ;;  %v3410_v36 = vld [vmem:[%s6412_s20 + $0x10] sm:$0xff] }
 0xcbc   :  { %v2884_v6 = vmax.f32 %v2874_v0, 0.0  ;;  %v3273_v45 = vrot.slane %v3272_v13, 4  ;;  %v3409_v0 = vld [vmem:[%s6412_s20 + $0x8] sm:$0xff]  ;;  %s3084_s29 = sadd.f32 1e-06, %s6320_s15 }
 0xcbd   :  { %v2882_v26 = vmax.f32 %v2866_v56, 0.0 }
 0xcbe   :  { %v2888_v16 = vpack.c.bf16 %v2884_v6, %v2883_v28  ;;  %4268 = vmatpush3.bf16.msra.mxu1 %v2886_v8  ;;  %v3274_v5 = vadd.f32 %v3273_v45, %v3272_v13  ;;  %v3085_v56 = vstv %s3084_s29 }
 0xcbf   :  { %v2887_v54 = vpack.c.bf16 %v2882_v26, %v2881_v7 }
 0xcc0   :  { %v3275_v58 = vrot.slane %v3274_v5, 2 }
 0xcc1   :  { %4269 = vmatprep.subr.bf16.mxu1 %v2887_v54 }
 0xcc2   :  { %4270 = vmatpush3.bf16.msra.mxu1 %v2887_v54 }
 0xcc3   :  { %4271 = vmatprep.subr.bf16.mxu1 %v2888_v16 }
 0xcc6   :  { %4272 = vmatpush3.bf16.msra.mxu1 %v2888_v16 }
 0xcc7   :  { %4562 = vmatprep.subr.bf16.mxu1 %v6159_v52 }
 0xcc9   :  { %4274 = vmatmul.mubr.msk.bf16.vlgmr.msra.gmra.mrb[76].mxu1 %vm1765_vm3, %v4870_v9 }
 0xcca   :  { %4564 = vmatpush3.bf16.msra.mxu1 %v6159_v52  ;;  %4347 = vmatprep.mubr.f32.mxu1 %v1826_v2  ;;  %v3276_v52 = vadd.f32 %v3275_v58, %v3274_v5 }
 0xccb   :  { %4566 = vmatprep.subr.bf16.mxu1 %v6167_v46 }
 0xcce   :  { %4568 = vmatpush3.bf16.msra.mxu1 %v6167_v46  ;;  %v3277_v46 = vrot.slane %v3276_v52, 1 }
 0xccf   :  { %4570 = vmatprep.subr.bf16.mxu1 %v6171_v24 }
 0xcd0   :  { %v3278_v30 = vadd.f32 %v3277_v46, %v3276_v52 }
 0xcd2   :  { %4572 = vmatpush3.bf16.msra.mxu1 %v6171_v24  ;;  %4596 = vpush %v3278_v30  ;;  %v4589_v24 = vpack.c.bf16 %v6264_v44, %v6218_v4  ;;  %v6500_v4 = vld [vmem:[#allocation10_spill] sm:$0xff]  ;;  %v4659_v30 = vld [vmem:[%s6409_s17 + $0x8] sm:$0xff]  }
 0xcd3   :  { %4574 = vmatprep.subr.bf16.mxu1 %v6183_v25 }
 0xcd6   :  { %4576 = vmatpush3.bf16.msra.mxu1 %v6183_v25  ;;  %v1813_v25 = vadd.f32 %v5931_v27, %v6194_v15 }
 0xcd7   :  { %4578 = vmatprep.subr.bf16.mxu1 %v6187_v12 }
 0xcd8   :  { %v1828_v1 = vadd.f32 %v1813_v25, %v5679_v62 }
 0xcda   :  { %4580 = vmatpush3.bf16.msra.mxu1 %v6187_v12  ;;  %v1819_v12 = vadd.f32 %v5935_v35, %v6212_v38 }
 0xcdb   :  { %4582 = vmatprep.subr.bf16.mxu1 %v6191_v19 }
 0xcdc   :  { %v1830_v34 = vadd.f32 %v1819_v12, %v6499_v31 }
 0xcde   :  { %4584 = vmatpush3.bf16.msra.mxu1 %v6191_v19  ;;  %v1823_v19 = vadd.f32 %v5939_v59, %v6205_v10 }
 0xcdf   :  { %4586 = vmatprep.subr.bf16.mxu1 %v6207_v55 }
 0xce0   :  { %v1832_v44 = vadd.f32 %v1823_v19, %v6500_v4 }
 0xce2   :  { %4588 = vmatpush3.bf16.msra.mxu1 %v6207_v55 }
 0xce3   :  { %4590 = vmatprep.subr.bf16.mxu1 %v4589_v24 }
 0xce6   :  { %4592 = vmatpush3.bf16.msra.mxu1 %v4589_v24  ;;  %v4875_v24 = vmov 1  }
 0xce9   :  { %4348 = vmatmul.mubr.f32.vlgmr.msra.gmra.mrb[80].mxu1 %v1828_v1 }
 0xcea   :  { %4350 = vmatprep.mubr.f32.mxu1 %v1830_v34 }
 0xced   :  { %4351 = vmatmul.mubr.f32.gmra.mrb[82].mxu1 %v1832_v44 }
 0xd03   :  { %s4597_s6 = spop %4596 }
 0xd04   :  { %s3280_s0 = sadd.f32 1e-06, %s4597_s6 }
 0xd9c   :  { %v4275_v55 = vpop.f32.mrb[76].mxu1 }
 0xd9d   :  { %v2932_v27 = vadd.f32 %v4275_v55, %v6212_v38  ;;  %v2923_v17 = vpop.f32.mrb[77].mxu1 }
 0xd9e   :  { %v2924_v3 = vadd.f32 %v2923_v17, %v6198_v29  ;;  %v4276_v35 = vpop.f32.mrb[78].mxu1  ;;  %v3281_v29 = vstv %s3280_s0  ;;  %v3411_v17 = vld [vmem:[%s6412_s20 + $0x18] sm:$0xff] }
 0xd9f   :  { %v2935_v40 = vadd.f32 %v4276_v35, %v6205_v10  ;;  %v2926_v62 = vpop.f32.mrb[79].mxu1  ;;  %v2940_v59 = vadd.f32 %v2932_v27, %v6234_v49  ;;  %4854 = vrcp.f32 %v3281_v29  ;;  %v6501_v35 = vmov 0  }
 0xda0   :  { %v2927_v50 = vadd.f32 %v2926_v62, %v6194_v15  ;;  %v2938_v61 = vadd.f32 %v2924_v3, %v6225_v57  ;;  %v4658_v57 = vld [vmem:[%s6409_s17] sm:$0xff]   ;;  %4856 = vrcp.f32 %v3085_v56 }
 0xda1   :  { %v2941_v47 = vadd.f32 %v2935_v40, %v6228_v42  ;;  %4357 = vmatprep.mubr.msk.bf16.mxu0 %vm334_vm2, %v4658_v57 }
 0xda2   :  { %v2939_v60 = vadd.f32 %v2927_v50, %v6231_v43 }
 0xda3   :  { %v6316_v11 = vpack.c.bf16 %v2941_v47, %v2940_v59 }
 0xda4   :  { %v6318_v38 = vpack.c.bf16 %v2939_v60, %v2938_v61  ;;  %v4876_v61 = vmov 0.0  }
 0xda5   :  { %4369 = vmatprep.subr.bf16.mxu1 %v4876_v61  ;;  %4373 = vmatprep.mubr.msk.bf16.mxu1 %vm4877_vm6, %v4876_v61 }
 0xda9   :  { %v4855_v10 = vpop.eup %4854 }
 0xdaa   :  { %v4857_v28 = vpop.eup %4856 }
 0xdab   :  { %v3088_v7 = vmul.f32 %v4857_v28, %v6254_v22  ;;  %v3087_v26 = vmul.f32 %v4857_v28, %v6256_v37  ;;  %v3090_v45 = vmul.f32 %v4857_v28, %v6258_v39  ;;  %v3089_v5 = vmul.f32 %v4857_v28, %v6260_v33  ;;  %v4660_v39 = vld [vmem:[%s6411_s19] sm:$0xff]   ;;  %v4661_v33 = vld [vmem:[%s6411_s19 + $0x8] sm:$0xff]  }
 0xdbc   :  { %v4349_v15 = vpop.f32.mrb[80].mxu1 }
 0xdbd   :  { %v3284_v18 = vmul.f32 %v4855_v10, %v4349_v15  ;;  %v3221_v49 = vpop.f32.mrb[81].mxu1 }
 0xdbe   :  { %v3283_v20 = vmul.f32 %v4855_v10, %v3221_v49 }
 0xdc0   :  { %v4627_v42 = vpack.i.bf16 %v3284_v18, %v3283_v20  ;;  %v4352_v53 = vpop.f32.mrb[82].mxu1 }
 0xdc1   :  { %v3286_v43 = vmul.f32 %v4855_v10, %v4352_v53  ;;  %v3231_v63 = vpop.f32.mrb[83].mxu1 }
 0xdc2   :  { %v3285_v8 = vmul.f32 %v4855_v10, %v3231_v63  ;;  %4628 = vrot.lane.b32.xlu0 %v4627_v42, %s4874_s14 }
 0xdc4   :  { %v4632_v48 = vpack.i.bf16 %v3286_v43, %v3285_v8 }
 0xdc6   :  { %3319 = vperm.xlu0 %4605, %v3313_v51   ;;  %4633 = vrot.lane.b32.xlu1 %v4632_v48, %s4874_s14 }
 0xdca   :  { %3329 = vperm.xlu0 %4605, %v3315_v23   ;;  %3324 = vperm.xlu1 %4606, %v3314_v21   ;;  %v3524_v21 = vld [vmem:[%s6413_s22] sm:$0x1f] }
 0xdce   :  { %3414 = vperm.xlu0 %4605, %v3408_v32   ;;  %3334 = vperm.xlu1 %4606, %v3316_v14  }
 0xdd2   :  { %3419 = vperm.xlu1 %4606, %v3409_v0   ;;  %4637 = vset.pattern.permute.xlu0 %v4875_v24  ;;  %v3521_v0 = vld [vmem:[%s6414_s21] sm:$0x7] }
 0xdd6   :  { %3424 = vperm.xlu1 %4606, %v3410_v36  }
 0xdda   :  { %4639 = vset.pattern.permute.xlu1 %v4875_v24 }
 0xe34   :  { %v4629_v6 = vpop.permute.xlu0 %4628 }
 0xe35   :  { %v4631_v16 = vunpack.i.h.bf16 %v4629_v6  ;;  %v4630_v54 = vunpack.i.l.bf16 %v4629_v6 }
 0xe37   :  { %v3303_v41 = vsel %vm3043_vm5, %v3087_v26, %v4630_v54  ;;  %v3304_v2 = vsel %vm3043_vm5, %v3088_v7, %v4631_v16 }
 0xe38   :  { %v4634_v9 = vpop.permute.xlu1 %4633  ;;  %v3311_v13 = vpack.c.bf16 %v3304_v2, %v3303_v41 }
 0xe39   :  { %v4636_v58 = vunpack.i.h.bf16 %v4634_v9  ;;  %v4635_v52 = vunpack.i.l.bf16 %v4634_v9 }
 0xe3a   :  { %4353 = vmatprep.subr.bf16.mxu0 %v3311_v13 }
 0xe3b   :  { %4354 = vmatpush3.bf16.msra.mxu0 %v3311_v13  ;;  %v3305_v22 = vsel %vm3043_vm5, %v3089_v5, %v4635_v52  ;;  %v3306_v37 = vsel %vm3043_vm5, %v3090_v45, %v4636_v58 }
 0xe3c   :  { %v3312_v46 = vpack.c.bf16 %v3306_v37, %v3305_v22 }
 0xe3e   :  { %4355 = vmatprep.subr.bf16.mxu0 %v3312_v46 }
 0xe3f   :  { %4356 = vmatpush3.bf16.msra.mxu0 %v3312_v46 }
 0xe40   :  { %4361 = vmatprep.subr.bf16.mxu0 %v6318_v38 }
 0xe42   :  { %4358 = vmatmul.mubr.msk.bf16.vlgmr.msra.gmra.mrb[84].mxu0 %vm334_vm2, %v4659_v30 }
 0xe43   :  { %4362 = vmatpush3.bf16.msra.mxu0 %v6318_v38  ;;  %4365 = vmatprep.mubr.msk.bf16.mxu0 %vm334_vm2, %v4660_v39 }
 0xe44   :  { %4363 = vmatprep.subr.bf16.mxu0 %v6316_v11 }
 0xe45   :  { %v3320_v25 = vpop.permute.xlu0 %3319 }
 0xe47   :  { %4364 = vmatpush3.bf16.msra.mxu0 %v6316_v11 }
 0xe48   :  { %4377 = vmatprep.subr.bf16.mxu0 %v4876_v61 }
 0xe49   :  { %v3330_v12 = vpop.permute.xlu0 %3329  ;;  %v3325_v34 = vpop.permute.xlu1 %3324 }
 0xe4a   :  { %4366 = vmatmul.mubr.msk.bf16.vlgmr.msra.gmra.mrb[88].mxu0 %vm334_vm2, %v4661_v33 }
 0xe4b   :  { %4381 = vmatprep.mubr.msk.bf16.mxu0 %vm4877_vm6, %v4876_v61 }
 0xe4d   :  { %v3335_v3 = vpop.permute.xlu1 %3334  ;;  %v3415_v38 = vpop.permute.xlu0 %3414 }
 0xe51   :  { %v3420_v60 = vpop.permute.xlu1 %3419 }
 0xe55   :  { %v3425_v11 = vpop.permute.xlu1 %3424 }
 0xf15   :  { %v4359_v1 = vpop.f32.mrb[84].mxu0 }
 0xf16   :  { %v3396_v19 = vadd.f32 %v4359_v1, %v3330_v12  ;;  %v3387_v31 = vpop.f32.mrb[85].mxu0 }
 0xf17   :  { %v3388_v4 = vadd.f32 %v3387_v31, %v3320_v25  ;;  %v4360_v44 = vpop.f32.mrb[86].mxu0 }
 0xf18   :  { %3582 = vperm.xlu1 %4639, %v3396_v19   ;;  %v3390_v55 = vpop.f32.mrb[87].mxu0  ;;  %v3399_v62 = vadd.f32 %v4360_v44, %v3335_v3 }
 0xf19   :  { %v3391_v27 = vadd.f32 %v3390_v55, %v3325_v34  ;;  %3574 = vperm.xlu0 %4637, %v3388_v4  }
 0xf1c   :  { %3578 = vperm.xlu1 %4639, %v3391_v27  }
 0xf1d   :  { %4638 = vset.pattern.permute.xlu0 %v6501_v35  ;;  %v4367_v40 = vpop.f32.mrb[88].mxu0 }
 0xf1e   :  { %3429 = vperm.xlu0 %4638, %v3411_v17   ;;  %v3482_v50 = vpop.f32.mrb[89].mxu0  ;;  %v3491_v57 = vadd.f32 %v4367_v40, %v3425_v11 }
 0xf1f   :  { %v4368_v59 = vpop.f32.mrb[90].mxu0  ;;  %v3483_v15 = vadd.f32 %v3482_v50, %v3415_v38 }
 0xf20   :  { %3586 = vperm.xlu1 %4639, %v3399_v62   ;;  %v3485_v47 = vpop.f32.mrb[91].mxu0 }
 0xf21   :  { %v3486_v18 = vadd.f32 %v3485_v47, %v3420_v60 }
 0xf24   :  { %4640 = vset.pattern.permute.xlu1 %v6501_v35 }
 0xf97   :  { %v3583_v29 = vpop.permute.xlu1 %3582 }
 0xf98   :  { %v3575_v10 = vpop.permute.xlu0 %3574  ;;  %v3591_v51 = vmul.f32 %v3583_v29, %v3491_v57 }
 0xf99   :  { %v3589_v20 = vmul.f32 %v3575_v10, %v3483_v15 }
 0xf9b   :  { %v3579_v49 = vpop.permute.xlu1 %3578 }
 0xf9c   :  { %v3590_v42 = vmul.f32 %v3579_v49, %v3486_v18 }
 0xf9d   :  { %v3430_v53 = vpop.permute.xlu0 %3429 }
 0xf9e   :  { %v3593_v43 = vpack.c.bf16 %v3590_v42, %v3589_v20  ;;  %v3494_v63 = vadd.f32 %v4368_v59, %v3430_v53 }
 0xf9f   :  { %v3587_v8 = vpop.permute.xlu1 %3586 }
 0xfa0   :  { %v3592_v48 = vmul.f32 %v3587_v8, %v3494_v63  ;;  %3597 = vrot.lane.b32.xlu0 %v3593_v43, %s4872_s27 }
 0xfa2   :  { %v3594_v23 = vpack.c.bf16 %v3592_v48, %v3591_v51 }
 0xfa4   :  { %3599 = vrot.lane.b32.xlu1 %v3594_v23, %s4872_s27  ;;  %3499 = vperm.xlu0 %4638, %v3388_v4  }
 0xfa8   :  { %3504 = vperm.xlu1 %4640, %v3391_v27   ;;  %3509 = vperm.xlu0 %4638, %v3396_v19  }
 0xfac   :  { %3514 = vperm.xlu1 %4640, %v3399_v62   ;;  %3527 = vperm.xlu0 %4638, %v3524_v21  }
 0xfb0   :  { %4641 = vset.pattern.permute.xlu0 %v4875_v24 }
0x1012   :  { %v3598_v32 = vpop.permute.xlu0 %3597 }
0x1013   :  { %4378 = vmatpush3.bf16.msra.mxu0 %v3598_v32 }
0x1014   :  { %4379 = vmatprep.subr.bf16.mxu0 %v4876_v61 }
0x1016   :  { %v3600_v14 = vpop.permute.xlu1 %3599 }
0x1017   :  { %4380 = vmatpush3.bf16.msra.mxu0 %v3600_v14 }
0x101a   :  { %4382 = vmatmul.mubr.msk.bf16.vlgmr.msra.gmra.mrb[92].mxu0 %vm334_vm2, %v3521_v0 }
0x1023   :  { %v3500_v36 = vpop.permute.xlu0 %3499 }
0x1024   :  { %v3517_v28 = vmul.f32 %v3500_v36, %v3483_v15 }
0x1027   :  { %v3505_v56 = vpop.permute.xlu1 %3504  ;;  %v3510_v7 = vpop.permute.xlu0 %3509 }
0x1028   :  { %v3518_v6 = vmul.f32 %v3505_v56, %v3486_v18  ;;  %v3519_v54 = vmul.f32 %v3510_v7, %v3491_v57 }
0x102a   :  { %v3522_v26 = vpack.c.bf16 %v3518_v6, %v3517_v28 }
0x102b   :  { %v3515_v16 = vpop.permute.xlu1 %3514  ;;  %v3528_v9 = vpop.permute.xlu0 %3527 }
0x102c   :  { %v3520_v41 = vmul.f32 %v3515_v16, %v3494_v63  ;;  %4370 = vmatpush3.bf16.msra.mxu1 %v3522_v26 }
0x102d   :  { %4371 = vmatprep.subr.bf16.mxu1 %v4876_v61 }
0x102e   :  { %v3523_v2 = vpack.c.bf16 %v3520_v41, %v3519_v54 }
0x1030   :  { %4372 = vmatpush3.bf16.msra.mxu1 %v3523_v2 }
0x1033   :  { %4374 = vmatmul.mubr.msk.bf16.vlgmr.msra.gmra.mrb[84].mxu1 %vm334_vm2, %v3521_v0 }
0x10ed   :  { %v3637_v13 = vpop.f32.mrb[92].mxu0 }
0x10ee   :  { %v3638_v45 = vadd.f32 %v3637_v13, %v3528_v9  ;;  %v4383_v5 = vpop.f32.mrb[93].mxu0 }
0x10ef   :  { %v3640_v58 = vpop.f32.mrb[94].mxu0 }
0x10f0   :  { %3644 = vrot.lane.b32.xlu1 %v3638_v45, %s4872_s27  ;;  %v4384_v52 = vpop.f32.mrb[95].mxu0 }
0x1106   :  { %v3567_v22 = vpop.f32.mrb[84].mxu1 }
0x1107   :  { %v3568_v37 = vadd.f32 %v3567_v22, %v3528_v9  ;;  %v4375_v46 = vpop.f32.mrb[85].mxu1 }
0x1108   :  { %v3570_v30 = vpop.f32.mrb[86].mxu1 }
0x1109   :  { %v4376_v39 = vpop.f32.mrb[87].mxu1 }
0x1162   :  { %v3645_v33 = vpop.permute.xlu1 %3644 }
0x1163   :  { %v3647_v24 = vsel %vm1765_vm3, %v3568_v37, %v3645_v33 }
0x1164   :  { %3648 = vst [vmem:[%s6415_s23] sm:$0x1f] %v3647_v24 }

</bundles_post_ra>
